<compile_context>
chip_gen: v7x
topology: tpu7x:2x2x1
jax: 0.10.0
libtpu: 0.0.40
codegen_flags: <defaults>
</compile_context>

<pallas_src>
import math

import jax
import jax.numpy as jnp
from jax import lax
from jax.experimental import pallas as pl
from jax.experimental.pallas import tpu as pltpu


_VMEM = pl.BlockSpec(memory_space=pltpu.MemorySpace.VMEM)


# ----------------------------- Pallas kernel --------------------------------

def _make_textrnn_kernel(num_layers, num_hidden):
    """Build the fused whole-model kernel for a fixed layer count."""
    H = num_hidden

    def kernel(*refs):
        x_ref = refs[0]                                   # (T, B, I0) time-major
        layer_refs = refs[1:1 + 3 * num_layers]
        fcw_ref = refs[1 + 3 * num_layers]                # (2H, C)
        fcb_ref = refs[2 + 3 * num_layers]                # (1, C)
        logits_ref, hn_ref, cn_ref = refs[3 + 3 * num_layers:]

        T, B, _ = x_ref.shape
        x = x_ref[...]

        def cell_half(g4, c):
            # gate column order (i, f, o, g): one contiguous sigmoid + tanh.
            sig = jax.nn.sigmoid(g4[:, 0:3 * H])
            i = sig[:, 0:H]
            f = sig[:, H:2 * H]
            o = sig[:, 2 * H:3 * H]
            g = jnp.tanh(g4[:, 3 * H:4 * H])
            c_new = f * c + i * g
            h_new = o * jnp.tanh(c_new)
            return h_new, c_new

        for layer in range(num_layers):
            wih = layer_refs[3 * layer][...]              # (I, 8H)
            whh_bd = layer_refs[3 * layer + 1][...]       # (2H, 8H) block-diag
            bias = layer_refs[3 * layer + 2][...]         # (1, 8H)
            is_last = layer == num_layers - 1
            in_size = x.shape[-1]

            # Hoisted input projection for BOTH directions (bias folded in):
            # one MXU matmul outside the serial recurrence.
            xp = (jnp.dot(x.reshape(T * B, in_size), wih,
                          preferred_element_type=jnp.float32)
                  + bias).reshape(T, B, 8 * H)

            zeros = jnp.zeros((B, H), jnp.float32)
            h_f, c_f, h_b, c_b = zeros, zeros, zeros, zeros
            h_b_at_last = zeros
            hs = [None] * T

            # T static & small -> full unroll; backward direction handled with
            # reversed index math (no data reversal).
            for t in range(T):
                tb = T - 1 - t
                # Per-step pre-activations for both directions: two
                # vreg-aligned 4H(=128)-lane slices, one lane concat.
                pre = jnp.concatenate(
                    [xp[t][:, 0:4 * H], xp[tb][:, 4 * H:8 * H]], axis=-1)
                h2 = jnp.concatenate([h_f, h_b], axis=-1)      # (B, 2H)
                gates = pre + jnp.dot(h2, whh_bd,
                                      preferred_element_type=jnp.float32)
                h_f, c_f = cell_half(gates[:, 0:4 * H], c_f)
                h_b, c_b = cell_half(gates[:, 4 * H:8 * H], c_b)
                if t == 0:
                    h_b_at_last = h_b        # backward output at time T-1
                if not is_last:
                    hs[t] = (h_f, h_b)

            # Final per-direction states for this layer.
            hn_ref[2 * layer] = h_f
            hn_ref[2 * layer + 1] = h_b
            cn_ref[2 * layer] = c_f
            cn_ref[2 * layer + 1] = c_b

            if not is_last:
                # Stack the per-step outputs ONCE (registers only) as the next
                # layer's input; backward outputs land at their forward index.
                x = jnp.stack(
                    [jnp.concatenate([hs[t][0], hs[T - 1 - t][1]], axis=-1)
                     for t in range(T)], axis=0)            # (T, B, 2H)
            else:
                # Fused FC epilogue on out[:, -1, :] = [h_f(T-1) | h_b(T-1)].
                last_vec = jnp.concatenate([h_f, h_b_at_last], axis=-1)
                logits_ref[...] = (
                    jnp.dot(last_vec, fcw_ref[...],
                            preferred_element_type=jnp.float32)
                    + fcb_ref[...])

    return kernel


# ------------------------------- Wrapper -------------------------------------

def run_textrnn(kp, x_emb_tmajor):
    """x_emb_tmajor: (T, B, E) f32 -> (logits (B,C), h_n, c_n)."""
    T, B, E = x_emb_tmajor.shape
    layers = kp["layers"]
    num_layers = len(layers)
    H = layers[0]["whh_bd"].shape[0] // 2
    C = kp["fc_wt"].shape[1]

    args = [x_emb_tmajor]
    for lp in layers:
        args += [lp["wih8"], lp["whh_bd"], lp["bias8"]]
    args += [kp["fc_wt"], kp["fc_b"]]

    out_shape = (jax.ShapeDtypeStruct((B, C), jnp.float32),
                 jax.ShapeDtypeStruct((2 * num_layers, B, H), jnp.float32),
                 jax.ShapeDtypeStruct((2 * num_layers, B, H), jnp.float32))

    # Advisory cost hint for XLA's scheduler around the custom call.
    flops = 0
    in_size = E
    for _ in range(num_layers):
        flops += 2 * B * T * in_size * 8 * H        # hoisted input projection
        flops += 2 * B * T * (2 * H) * (8 * H)      # fused recurrence matmuls
        in_size = 2 * H
    flops += 2 * B * (2 * H) * C                    # fused FC
    transcendentals = num_layers * B * T * 2 * (3 * H + 2 * H)
    bytes_accessed = sum(int(a.size) * a.dtype.itemsize for a in args)
    bytes_accessed += sum(math.prod(s.shape) * 4 for s in out_shape)

    return pl.pallas_call(
        _make_textrnn_kernel(num_layers, H),
        out_shape=out_shape,
        in_specs=[_VMEM] * len(args),
        out_specs=(_VMEM,) * 3,
        cost_estimate=pl.CostEstimate(flops=flops,
                                      transcendentals=transcendentals,
                                      bytes_accessed=bytes_accessed),
    )(*args)


# ------------------------------ Parameters -----------------------------------

def init_params(key, vocab_size, embed_size, num_hidden, num_layers,
                classes_num):
    """Raw parameters in PyTorch layout (gate order i,f,g,o)."""
    keys = iter(jax.random.split(key, 3 + num_layers * 2 * 4))
    k = num_hidden ** -0.5

    def unif(kk, shape):
        return jax.random.uniform(kk, shape, jnp.float32, -k, k)

    raw = {
        "embedding": jax.random.normal(next(keys), (vocab_size, embed_size),
                                       jnp.float32),
        "lstm": [],
        "fc_w": unif(next(keys), (classes_num, 2 * num_hidden)),
        "fc_b": unif(next(keys), (classes_num,)),
    }
    for layer in range(num_layers):
        in_size = embed_size if layer == 0 else 2 * num_hidden
        dirs = []
        for _ in range(2):                      # forward, backward
            dirs.append({
                "w_ih": unif(next(keys), (4 * num_hidden, in_size)),
                "w_hh": unif(next(keys), (4 * num_hidden, num_hidden)),
                "b_ih": unif(next(keys), (4 * num_hidden,)),
                "b_hh": unif(next(keys), (4 * num_hidden,)),
            })
        raw["lstm"].append(dirs)
    return raw


def _reorder_ifgo_to_ifog(w, axis=0):
    i, f, g, o = jnp.split(w, 4, axis=axis)
    return jnp.concatenate([i, f, o, g], axis=axis)


def prepare_kernel_params(raw):
    """Fuse / permute weights into the layout the fused kernel expects."""
    H = raw["lstm"][0][0]["w_hh"].shape[1]
    kp = {
        "embedding": raw["embedding"],
        "fc_wt": raw["fc_w"].T,                        # (2H, C)
        "fc_b": raw["fc_b"].reshape(1, -1),            # (1, C)
        "layers": [],
    }
    for dirs in raw["lstm"]:
        wih_ts, whh_ts, biases = [], [], []
        for d in dirs:
            wih_ts.append(_reorder_ifgo_to_ifog(d["w_ih"]).T)     # (I, 4H)
            whh_ts.append(_reorder_ifgo_to_ifog(d["w_hh"]).T)     # (H, 4H)
            biases.append(_reorder_ifgo_to_ifog(d["b_ih"] + d["b_hh"]))
        z = jnp.zeros((H, 4 * H), jnp.float32)
        # Block-diagonal hidden->gate weight: [h_f | h_b] @ whh_bd covers both
        # directions with a single MXU matmul per timestep.
        whh_bd = jnp.concatenate(
            [jnp.concatenate([whh_ts[0], z], axis=1),
             jnp.concatenate([z, whh_ts[1]], axis=1)], axis=0)    # (2H, 8H)
        kp["layers"].append({
            "wih8": jnp.concatenate(wih_ts, axis=1),              # (I, 8H)
            "whh_bd": whh_bd,                                     # (2H, 8H)
            "bias8": jnp.concatenate(biases, axis=0).reshape(1, -1),  # (1,8H)
        })
    return kp


# -------------------------------- Forward -------------------------------------

@jax.jit
def forward(kp, tokens):
    """tokens: (B, T) int32 -> (logits (B, C), (h_n, c_n))."""
    # Embed directly in time-major order (matches nn.LSTM internal layout).
    x = jnp.take(kp["embedding"], tokens.T, axis=0).astype(jnp.float32)  # (T,B,E)
    logits, h_n, c_n = run_textrnn(kp, x)
    return logits, (h_n, c_n)


# --------------------------- Pure-JAX reference -------------------------------

def reference_forward(raw, tokens):
    """Plain-JAX nn.LSTM-equivalent (time-major, explicit reverses)."""
    HIGH = jax.lax.Precision.HIGHEST
    emb = jnp.take(raw["embedding"], tokens, axis=0)            # (B, T, E)
    x = jnp.transpose(emb, (1, 0, 2))                           # (T, B, E)

    def run_dir(xs, w_ih, w_hh, b_ih, b_hh):
        T, B, _ = xs.shape
        H = w_hh.shape[1]

        def step(carry, x_t):
            h, c = carry
            gates = (jnp.dot(x_t, w_ih.T, precision=HIGH)
                     + jnp.dot(h, w_hh.T, precision=HIGH) + b_ih + b_hh)
            i = jax.nn.sigmoid(gates[:, 0:H])
            f = jax.nn.sigmoid(gates[:, H:2 * H])
            g = jnp.tanh(gates[:, 2 * H:3 * H])
            o = jax.nn.sigmoid(gates[:, 3 * H:4 * H])
            c = f * c + i * g
            h = o * jnp.tanh(c)
            return (h, c), h

        init = (jnp.zeros((B, H), jnp.float32), jnp.zeros((B, H), jnp.float32))
        (h_n, c_n), hs = lax.scan(step, init, xs)
        return hs, h_n, c_n

    layer_in = x
    h_states, c_states = [], []
    for dirs in raw["lstm"]:
        fwd, bwd = dirs
        hs_f, hn_f, cn_f = run_dir(layer_in, fwd["w_ih"], fwd["w_hh"],
                                   fwd["b_ih"], fwd["b_hh"])
        hs_b_rev, hn_b, cn_b = run_dir(layer_in[::-1], bwd["w_ih"],
                                       bwd["w_hh"], bwd["b_ih"], bwd["b_hh"])
        hs_b = hs_b_rev[::-1]
        layer_in = jnp.concatenate([hs_f, hs_b], axis=-1)
        h_states += [hn_f, hn_b]
        c_states += [cn_f, cn_b]

    last = layer_in[-1]                                          # (B, 2H)
    logits = jnp.dot(last, raw["fc_w"].T, precision=HIGH) + raw["fc_b"]
    return logits, (jnp.stack(h_states, 0), jnp.stack(c_states, 0))


# ---------------------------------- Main --------------------------------------

if __name__ == "__main__":
    vocab_size = 50
    embed_size = 32
    num_hidden = 32
    num_layers = 2
    classes_num = 4
    batch, seq = 2, 8

    root = jax.random.PRNGKey(0)
    k_param, k_tok = jax.random.split(root)
    raw = init_params(k_param, vocab_size, embed_size, num_hidden,
                      num_layers, classes_num)
    kp = prepare_kernel_params(raw)
    tokens = jax.random.randint(k_tok, (batch, seq), 0, vocab_size,
                                dtype=jnp.int32)

    logits, (h_n, c_n) = forward(kp, tokens)
    jax.block_until_ready((logits, h_n, c_n))

    assert logits.shape == (batch, classes_num)
    assert h_n.shape == (num_layers * 2, batch, num_hidden)
    assert c_n.shape == (num_layers * 2, batch, num_hidden)

    # Sanity-check the fused Pallas path against a plain-JAX nn.LSTM reference.
    ref_logits, (ref_h, ref_c) = reference_forward(raw, tokens)
    assert jnp.allclose(logits, ref_logits, atol=1e-2, rtol=1e-2)
    assert jnp.allclose(h_n, ref_h, atol=1e-2, rtol=1e-2)
    assert jnp.allclose(c_n, ref_c, atol=1e-2, rtol=1e-2)

    print("KERNEL_OK")
</pallas_src>

<mosaic_0001>
module attributes {stable_mosaic.version = 11 : i64} {
  func.func @kernel(%arg0: memref<8x2x32xf32, #tpu.memory_space<vmem>>, %arg1: memref<32x256xf32, #tpu.memory_space<vmem>>, %arg2: memref<64x256xf32, #tpu.memory_space<vmem>>, %arg3: memref<1x256xf32, #tpu.memory_space<vmem>>, %arg4: memref<64x256xf32, #tpu.memory_space<vmem>>, %arg5: memref<64x256xf32, #tpu.memory_space<vmem>>, %arg6: memref<1x256xf32, #tpu.memory_space<vmem>>, %arg7: memref<64x4xf32, #tpu.memory_space<vmem>>, %arg8: memref<1x4xf32, #tpu.memory_space<vmem>>, %arg9: memref<2x4xf32, #tpu.memory_space<vmem>>, %arg10: memref<4x2x32xf32, #tpu.memory_space<vmem>>, %arg11: memref<4x2x32xf32, #tpu.memory_space<vmem>>) attributes {dimension_semantics = [], scalar_prefetch = 0 : i64, scratch_operands = 0 : i64, tpu.core_type = #tpu.core_type<tc>} {
    %c0 = arith.constant 0 : index
    %c0_0 = arith.constant 0 : index
    %c0_1 = arith.constant 0 : index
    %0 = vector.load %arg0[%c0, %c0_0, %c0_1] : memref<8x2x32xf32, #tpu.memory_space<vmem>>, vector<8x2x32xf32>
    %c0_2 = arith.constant 0 : index
    %c0_3 = arith.constant 0 : index
    %1 = vector.load %arg1[%c0_2, %c0_3] : memref<32x256xf32, #tpu.memory_space<vmem>>, vector<32x256xf32>
    %c0_4 = arith.constant 0 : index
    %c0_5 = arith.constant 0 : index
    %2 = vector.load %arg2[%c0_4, %c0_5] : memref<64x256xf32, #tpu.memory_space<vmem>>, vector<64x256xf32>
    %c0_6 = arith.constant 0 : index
    %c0_7 = arith.constant 0 : index
    %3 = vector.load %arg3[%c0_6, %c0_7] : memref<1x256xf32, #tpu.memory_space<vmem>>, vector<1x256xf32>
    %4 = vector.shape_cast %0 : vector<8x2x32xf32> to vector<16x32xf32>
    %cst = arith.constant dense<0.000000e+00> : vector<16x256xf32>
    %5 = tpu.matmul %4, %1, %cst {dimension_numbers = #tpu.dot_dimension_numbers<[1], [0], [0], [1], [0, 0, 1, 1], [], []>} : vector<16x32xf32>, vector<32x256xf32>, vector<16x256xf32> -> vector<16x256xf32>
    %6 = vector.broadcast %3 : vector<1x256xf32> to vector<16x256xf32>
    %7 = arith.addf %5, %6 : vector<16x256xf32>
    %8 = vector.shape_cast %7 : vector<16x256xf32> to vector<8x2x256xf32>
    %cst_8 = arith.constant 0.000000e+00 : f32
    %9 = vector.broadcast %cst_8 : f32 to vector<2x32xf32>
    %10 = vector.extract_strided_slice %8 {offsets = [0, 0, 0], sizes = [1, 2, 256], strides = [1, 1, 1]} : vector<8x2x256xf32> to vector<1x2x256xf32>
    %11 = vector.shape_cast %10 : vector<1x2x256xf32> to vector<2x256xf32>
    %12 = vector.extract_strided_slice %11 {offsets = [0, 0], sizes = [2, 128], strides = [1, 1]} : vector<2x256xf32> to vector<2x128xf32>
    %13 = vector.extract_strided_slice %8 {offsets = [7, 0, 0], sizes = [1, 2, 256], strides = [1, 1, 1]} : vector<8x2x256xf32> to vector<1x2x256xf32>
    %14 = vector.shape_cast %13 : vector<1x2x256xf32> to vector<2x256xf32>
    %15 = vector.extract_strided_slice %14 {offsets = [0, 128], sizes = [2, 128], strides = [1, 1]} : vector<2x256xf32> to vector<2x128xf32>
    %16 = tpu.concatenate %12, %15 in 1 : vector<2x128xf32>, vector<2x128xf32> -> vector<2x256xf32>
    %17 = tpu.concatenate %9, %9 in 1 : vector<2x32xf32>, vector<2x32xf32> -> vector<2x64xf32>
    %cst_9 = arith.constant dense<0.000000e+00> : vector<2x256xf32>
    %18 = tpu.matmul %17, %2, %cst_9 {dimension_numbers = #tpu.dot_dimension_numbers<[1], [0], [0], [1], [0, 0, 1, 1], [], []>} : vector<2x64xf32>, vector<64x256xf32>, vector<2x256xf32> -> vector<2x256xf32>
    %19 = arith.addf %16, %18 : vector<2x256xf32>
    %20 = vector.extract_strided_slice %19 {offsets = [0, 0], sizes = [2, 128], strides = [1, 1]} : vector<2x256xf32> to vector<2x128xf32>
    %21 = vector.extract_strided_slice %20 {offsets = [0, 0], sizes = [2, 96], strides = [1, 1]} : vector<2x128xf32> to vector<2x96xf32>
    %22 = arith.negf %21 : vector<2x96xf32>
    %23 = math.exp %22 : vector<2x96xf32>
    %cst_10 = arith.constant 1.000000e+00 : f32
    %24 = vector.broadcast %cst_10 : f32 to vector<2x96xf32>
    %25 = arith.addf %24, %23 : vector<2x96xf32>
    %26 = arith.divf %24, %25 : vector<2x96xf32>
    %27 = vector.extract_strided_slice %26 {offsets = [0, 0], sizes = [2, 32], strides = [1, 1]} : vector<2x96xf32> to vector<2x32xf32>
    %28 = vector.extract_strided_slice %26 {offsets = [0, 32], sizes = [2, 32], strides = [1, 1]} : vector<2x96xf32> to vector<2x32xf32>
    %29 = vector.extract_strided_slice %26 {offsets = [0, 64], sizes = [2, 32], strides = [1, 1]} : vector<2x96xf32> to vector<2x32xf32>
    %30 = vector.extract_strided_slice %20 {offsets = [0, 96], sizes = [2, 32], strides = [1, 1]} : vector<2x128xf32> to vector<2x32xf32>
    %31 = math.tanh %30 : vector<2x32xf32>
    %32 = arith.mulf %28, %9 : vector<2x32xf32>
    %33 = arith.mulf %27, %31 : vector<2x32xf32>
    %34 = arith.addf %32, %33 : vector<2x32xf32>
    %35 = math.tanh %34 : vector<2x32xf32>
    %36 = arith.mulf %29, %35 : vector<2x32xf32>
    %37 = vector.extract_strided_slice %19 {offsets = [0, 128], sizes = [2, 128], strides = [1, 1]} : vector<2x256xf32> to vector<2x128xf32>
    %38 = vector.extract_strided_slice %37 {offsets = [0, 0], sizes = [2, 96], strides = [1, 1]} : vector<2x128xf32> to vector<2x96xf32>
    %39 = arith.negf %38 : vector<2x96xf32>
    %40 = math.exp %39 : vector<2x96xf32>
    %cst_11 = arith.constant 1.000000e+00 : f32
    %41 = vector.broadcast %cst_11 : f32 to vector<2x96xf32>
    %42 = arith.addf %41, %40 : vector<2x96xf32>
    %43 = arith.divf %41, %42 : vector<2x96xf32>
    %44 = vector.extract_strided_slice %43 {offsets = [0, 0], sizes = [2, 32], strides = [1, 1]} : vector<2x96xf32> to vector<2x32xf32>
    %45 = vector.extract_strided_slice %43 {offsets = [0, 32], sizes = [2, 32], strides = [1, 1]} : vector<2x96xf32> to vector<2x32xf32>
    %46 = vector.extract_strided_slice %43 {offsets = [0, 64], sizes = [2, 32], strides = [1, 1]} : vector<2x96xf32> to vector<2x32xf32>
    %47 = vector.extract_strided_slice %37 {offsets = [0, 96], sizes = [2, 32], strides = [1, 1]} : vector<2x128xf32> to vector<2x32xf32>
    %48 = math.tanh %47 : vector<2x32xf32>
    %49 = arith.mulf %45, %9 : vector<2x32xf32>
    %50 = arith.mulf %44, %48 : vector<2x32xf32>
    %51 = arith.addf %49, %50 : vector<2x32xf32>
    %52 = math.tanh %51 : vector<2x32xf32>
    %53 = arith.mulf %46, %52 : vector<2x32xf32>
    %54 = vector.extract_strided_slice %8 {offsets = [1, 0, 0], sizes = [1, 2, 256], strides = [1, 1, 1]} : vector<8x2x256xf32> to vector<1x2x256xf32>
    %55 = vector.shape_cast %54 : vector<1x2x256xf32> to vector<2x256xf32>
    %56 = vector.extract_strided_slice %55 {offsets = [0, 0], sizes = [2, 128], strides = [1, 1]} : vector<2x256xf32> to vector<2x128xf32>
    %57 = vector.extract_strided_slice %8 {offsets = [6, 0, 0], sizes = [1, 2, 256], strides = [1, 1, 1]} : vector<8x2x256xf32> to vector<1x2x256xf32>
    %58 = vector.shape_cast %57 : vector<1x2x256xf32> to vector<2x256xf32>
    %59 = vector.extract_strided_slice %58 {offsets = [0, 128], sizes = [2, 128], strides = [1, 1]} : vector<2x256xf32> to vector<2x128xf32>
    %60 = tpu.concatenate %56, %59 in 1 : vector<2x128xf32>, vector<2x128xf32> -> vector<2x256xf32>
    %61 = tpu.concatenate %36, %53 in 1 : vector<2x32xf32>, vector<2x32xf32> -> vector<2x64xf32>
    %cst_12 = arith.constant dense<0.000000e+00> : vector<2x256xf32>
    %62 = tpu.matmul %61, %2, %cst_12 {dimension_numbers = #tpu.dot_dimension_numbers<[1], [0], [0], [1], [0, 0, 1, 1], [], []>} : vector<2x64xf32>, vector<64x256xf32>, vector<2x256xf32> -> vector<2x256xf32>
    %63 = arith.addf %60, %62 : vector<2x256xf32>
    %64 = vector.extract_strided_slice %63 {offsets = [0, 0], sizes = [2, 128], strides = [1, 1]} : vector<2x256xf32> to vector<2x128xf32>
    %65 = vector.extract_strided_slice %64 {offsets = [0, 0], sizes = [2, 96], strides = [1, 1]} : vector<2x128xf32> to vector<2x96xf32>
    %66 = arith.negf %65 : vector<2x96xf32>
    %67 = math.exp %66 : vector<2x96xf32>
    %cst_13 = arith.constant 1.000000e+00 : f32
    %68 = vector.broadcast %cst_13 : f32 to vector<2x96xf32>
    %69 = arith.addf %68, %67 : vector<2x96xf32>
    %70 = arith.divf %68, %69 : vector<2x96xf32>
    %71 = vector.extract_strided_slice %70 {offsets = [0, 0], sizes = [2, 32], strides = [1, 1]} : vector<2x96xf32> to vector<2x32xf32>
    %72 = vector.extract_strided_slice %70 {offsets = [0, 32], sizes = [2, 32], strides = [1, 1]} : vector<2x96xf32> to vector<2x32xf32>
    %73 = vector.extract_strided_slice %70 {offsets = [0, 64], sizes = [2, 32], strides = [1, 1]} : vector<2x96xf32> to vector<2x32xf32>
    %74 = vector.extract_strided_slice %64 {offsets = [0, 96], sizes = [2, 32], strides = [1, 1]} : vector<2x128xf32> to vector<2x32xf32>
    %75 = math.tanh %74 : vector<2x32xf32>
    %76 = arith.mulf %72, %34 : vector<2x32xf32>
    %77 = arith.mulf %71, %75 : vector<2x32xf32>
    %78 = arith.addf %76, %77 : vector<2x32xf32>
    %79 = math.tanh %78 : vector<2x32xf32>
    %80 = arith.mulf %73, %79 : vector<2x32xf32>
    %81 = vector.extract_strided_slice %63 {offsets = [0, 128], sizes = [2, 128], strides = [1, 1]} : vector<2x256xf32> to vector<2x128xf32>
    %82 = vector.extract_strided_slice %81 {offsets = [0, 0], sizes = [2, 96], strides = [1, 1]} : vector<2x128xf32> to vector<2x96xf32>
    %83 = arith.negf %82 : vector<2x96xf32>
    %84 = math.exp %83 : vector<2x96xf32>
    %cst_14 = arith.constant 1.000000e+00 : f32
    %85 = vector.broadcast %cst_14 : f32 to vector<2x96xf32>
    %86 = arith.addf %85, %84 : vector<2x96xf32>
    %87 = arith.divf %85, %86 : vector<2x96xf32>
    %88 = vector.extract_strided_slice %87 {offsets = [0, 0], sizes = [2, 32], strides = [1, 1]} : vector<2x96xf32> to vector<2x32xf32>
    %89 = vector.extract_strided_slice %87 {offsets = [0, 32], sizes = [2, 32], strides = [1, 1]} : vector<2x96xf32> to vector<2x32xf32>
    %90 = vector.extract_strided_slice %87 {offsets = [0, 64], sizes = [2, 32], strides = [1, 1]} : vector<2x96xf32> to vector<2x32xf32>
    %91 = vector.extract_strided_slice %81 {offsets = [0, 96], sizes = [2, 32], strides = [1, 1]} : vector<2x128xf32> to vector<2x32xf32>
    %92 = math.tanh %91 : vector<2x32xf32>
    %93 = arith.mulf %89, %51 : vector<2x32xf32>
    %94 = arith.mulf %88, %92 : vector<2x32xf32>
    %95 = arith.addf %93, %94 : vector<2x32xf32>
    %96 = math.tanh %95 : vector<2x32xf32>
    %97 = arith.mulf %90, %96 : vector<2x32xf32>
    %98 = vector.extract_strided_slice %8 {offsets = [2, 0, 0], sizes = [1, 2, 256], strides = [1, 1, 1]} : vector<8x2x256xf32> to vector<1x2x256xf32>
    %99 = vector.shape_cast %98 : vector<1x2x256xf32> to vector<2x256xf32>
    %100 = vector.extract_strided_slice %99 {offsets = [0, 0], sizes = [2, 128], strides = [1, 1]} : vector<2x256xf32> to vector<2x128xf32>
    %101 = vector.extract_strided_slice %8 {offsets = [5, 0, 0], sizes = [1, 2, 256], strides = [1, 1, 1]} : vector<8x2x256xf32> to vector<1x2x256xf32>
    %102 = vector.shape_cast %101 : vector<1x2x256xf32> to vector<2x256xf32>
    %103 = vector.extract_strided_slice %102 {offsets = [0, 128], sizes = [2, 128], strides = [1, 1]} : vector<2x256xf32> to vector<2x128xf32>
    %104 = tpu.concatenate %100, %103 in 1 : vector<2x128xf32>, vector<2x128xf32> -> vector<2x256xf32>
    %105 = tpu.concatenate %80, %97 in 1 : vector<2x32xf32>, vector<2x32xf32> -> vector<2x64xf32>
    %cst_15 = arith.constant dense<0.000000e+00> : vector<2x256xf32>
    %106 = tpu.matmul %105, %2, %cst_15 {dimension_numbers = #tpu.dot_dimension_numbers<[1], [0], [0], [1], [0, 0, 1, 1], [], []>} : vector<2x64xf32>, vector<64x256xf32>, vector<2x256xf32> -> vector<2x256xf32>
    %107 = arith.addf %104, %106 : vector<2x256xf32>
    %108 = vector.extract_strided_slice %107 {offsets = [0, 0], sizes = [2, 128], strides = [1, 1]} : vector<2x256xf32> to vector<2x128xf32>
    %109 = vector.extract_strided_slice %108 {offsets = [0, 0], sizes = [2, 96], strides = [1, 1]} : vector<2x128xf32> to vector<2x96xf32>
    %110 = arith.negf %109 : vector<2x96xf32>
    %111 = math.exp %110 : vector<2x96xf32>
    %cst_16 = arith.constant 1.000000e+00 : f32
    %112 = vector.broadcast %cst_16 : f32 to vector<2x96xf32>
    %113 = arith.addf %112, %111 : vector<2x96xf32>
    %114 = arith.divf %112, %113 : vector<2x96xf32>
    %115 = vector.extract_strided_slice %114 {offsets = [0, 0], sizes = [2, 32], strides = [1, 1]} : vector<2x96xf32> to vector<2x32xf32>
    %116 = vector.extract_strided_slice %114 {offsets = [0, 32], sizes = [2, 32], strides = [1, 1]} : vector<2x96xf32> to vector<2x32xf32>
    %117 = vector.extract_strided_slice %114 {offsets = [0, 64], sizes = [2, 32], strides = [1, 1]} : vector<2x96xf32> to vector<2x32xf32>
    %118 = vector.extract_strided_slice %108 {offsets = [0, 96], sizes = [2, 32], strides = [1, 1]} : vector<2x128xf32> to vector<2x32xf32>
    %119 = math.tanh %118 : vector<2x32xf32>
    %120 = arith.mulf %116, %78 : vector<2x32xf32>
    %121 = arith.mulf %115, %119 : vector<2x32xf32>
    %122 = arith.addf %120, %121 : vector<2x32xf32>
    %123 = math.tanh %122 : vector<2x32xf32>
    %124 = arith.mulf %117, %123 : vector<2x32xf32>
    %125 = vector.extract_strided_slice %107 {offsets = [0, 128], sizes = [2, 128], strides = [1, 1]} : vector<2x256xf32> to vector<2x128xf32>
    %126 = vector.extract_strided_slice %125 {offsets = [0, 0], sizes = [2, 96], strides = [1, 1]} : vector<2x128xf32> to vector<2x96xf32>
    %127 = arith.negf %126 : vector<2x96xf32>
    %128 = math.exp %127 : vector<2x96xf32>
    %cst_17 = arith.constant 1.000000e+00 : f32
    %129 = vector.broadcast %cst_17 : f32 to vector<2x96xf32>
    %130 = arith.addf %129, %128 : vector<2x96xf32>
    %131 = arith.divf %129, %130 : vector<2x96xf32>
    %132 = vector.extract_strided_slice %131 {offsets = [0, 0], sizes = [2, 32], strides = [1, 1]} : vector<2x96xf32> to vector<2x32xf32>
    %133 = vector.extract_strided_slice %131 {offsets = [0, 32], sizes = [2, 32], strides = [1, 1]} : vector<2x96xf32> to vector<2x32xf32>
    %134 = vector.extract_strided_slice %131 {offsets = [0, 64], sizes = [2, 32], strides = [1, 1]} : vector<2x96xf32> to vector<2x32xf32>
    %135 = vector.extract_strided_slice %125 {offsets = [0, 96], sizes = [2, 32], strides = [1, 1]} : vector<2x128xf32> to vector<2x32xf32>
    %136 = math.tanh %135 : vector<2x32xf32>
    %137 = arith.mulf %133, %95 : vector<2x32xf32>
    %138 = arith.mulf %132, %136 : vector<2x32xf32>
    %139 = arith.addf %137, %138 : vector<2x32xf32>
    %140 = math.tanh %139 : vector<2x32xf32>
    %141 = arith.mulf %134, %140 : vector<2x32xf32>
    %142 = vector.extract_strided_slice %8 {offsets = [3, 0, 0], sizes = [1, 2, 256], strides = [1, 1, 1]} : vector<8x2x256xf32> to vector<1x2x256xf32>
    %143 = vector.shape_cast %142 : vector<1x2x256xf32> to vector<2x256xf32>
    %144 = vector.extract_strided_slice %143 {offsets = [0, 0], sizes = [2, 128], strides = [1, 1]} : vector<2x256xf32> to vector<2x128xf32>
    %145 = vector.extract_strided_slice %8 {offsets = [4, 0, 0], sizes = [1, 2, 256], strides = [1, 1, 1]} : vector<8x2x256xf32> to vector<1x2x256xf32>
    %146 = vector.shape_cast %145 : vector<1x2x256xf32> to vector<2x256xf32>
    %147 = vector.extract_strided_slice %146 {offsets = [0, 128], sizes = [2, 128], strides = [1, 1]} : vector<2x256xf32> to vector<2x128xf32>
    %148 = tpu.concatenate %144, %147 in 1 : vector<2x128xf32>, vector<2x128xf32> -> vector<2x256xf32>
    %149 = tpu.concatenate %124, %141 in 1 : vector<2x32xf32>, vector<2x32xf32> -> vector<2x64xf32>
    %cst_18 = arith.constant dense<0.000000e+00> : vector<2x256xf32>
    %150 = tpu.matmul %149, %2, %cst_18 {dimension_numbers = #tpu.dot_dimension_numbers<[1], [0], [0], [1], [0, 0, 1, 1], [], []>} : vector<2x64xf32>, vector<64x256xf32>, vector<2x256xf32> -> vector<2x256xf32>
    %151 = arith.addf %148, %150 : vector<2x256xf32>
    %152 = vector.extract_strided_slice %151 {offsets = [0, 0], sizes = [2, 128], strides = [1, 1]} : vector<2x256xf32> to vector<2x128xf32>
    %153 = vector.extract_strided_slice %152 {offsets = [0, 0], sizes = [2, 96], strides = [1, 1]} : vector<2x128xf32> to vector<2x96xf32>
    %154 = arith.negf %153 : vector<2x96xf32>
    %155 = math.exp %154 : vector<2x96xf32>
    %cst_19 = arith.constant 1.000000e+00 : f32
    %156 = vector.broadcast %cst_19 : f32 to vector<2x96xf32>
    %157 = arith.addf %156, %155 : vector<2x96xf32>
    %158 = arith.divf %156, %157 : vector<2x96xf32>
    %159 = vector.extract_strided_slice %158 {offsets = [0, 0], sizes = [2, 32], strides = [1, 1]} : vector<2x96xf32> to vector<2x32xf32>
    %160 = vector.extract_strided_slice %158 {offsets = [0, 32], sizes = [2, 32], strides = [1, 1]} : vector<2x96xf32> to vector<2x32xf32>
    %161 = vector.extract_strided_slice %158 {offsets = [0, 64], sizes = [2, 32], strides = [1, 1]} : vector<2x96xf32> to vector<2x32xf32>
    %162 = vector.extract_strided_slice %152 {offsets = [0, 96], sizes = [2, 32], strides = [1, 1]} : vector<2x128xf32> to vector<2x32xf32>
    %163 = math.tanh %162 : vector<2x32xf32>
    %164 = arith.mulf %160, %122 : vector<2x32xf32>
    %165 = arith.mulf %159, %163 : vector<2x32xf32>
    %166 = arith.addf %164, %165 : vector<2x32xf32>
    %167 = math.tanh %166 : vector<2x32xf32>
    %168 = arith.mulf %161, %167 : vector<2x32xf32>
    %169 = vector.extract_strided_slice %151 {offsets = [0, 128], sizes = [2, 128], strides = [1, 1]} : vector<2x256xf32> to vector<2x128xf32>
    %170 = vector.extract_strided_slice %169 {offsets = [0, 0], sizes = [2, 96], strides = [1, 1]} : vector<2x128xf32> to vector<2x96xf32>
    %171 = arith.negf %170 : vector<2x96xf32>
    %172 = math.exp %171 : vector<2x96xf32>
    %cst_20 = arith.constant 1.000000e+00 : f32
    %173 = vector.broadcast %cst_20 : f32 to vector<2x96xf32>
    %174 = arith.addf %173, %172 : vector<2x96xf32>
    %175 = arith.divf %173, %174 : vector<2x96xf32>
    %176 = vector.extract_strided_slice %175 {offsets = [0, 0], sizes = [2, 32], strides = [1, 1]} : vector<2x96xf32> to vector<2x32xf32>
    %177 = vector.extract_strided_slice %175 {offsets = [0, 32], sizes = [2, 32], strides = [1, 1]} : vector<2x96xf32> to vector<2x32xf32>
    %178 = vector.extract_strided_slice %175 {offsets = [0, 64], sizes = [2, 32], strides = [1, 1]} : vector<2x96xf32> to vector<2x32xf32>
    %179 = vector.extract_strided_slice %169 {offsets = [0, 96], sizes = [2, 32], strides = [1, 1]} : vector<2x128xf32> to vector<2x32xf32>
    %180 = math.tanh %179 : vector<2x32xf32>
    %181 = arith.mulf %177, %139 : vector<2x32xf32>
    %182 = arith.mulf %176, %180 : vector<2x32xf32>
    %183 = arith.addf %181, %182 : vector<2x32xf32>
    %184 = math.tanh %183 : vector<2x32xf32>
    %185 = arith.mulf %178, %184 : vector<2x32xf32>
    %186 = vector.extract_strided_slice %8 {offsets = [4, 0, 0], sizes = [1, 2, 256], strides = [1, 1, 1]} : vector<8x2x256xf32> to vector<1x2x256xf32>
    %187 = vector.shape_cast %186 : vector<1x2x256xf32> to vector<2x256xf32>
    %188 = vector.extract_strided_slice %187 {offsets = [0, 0], sizes = [2, 128], strides = [1, 1]} : vector<2x256xf32> to vector<2x128xf32>
    %189 = vector.extract_strided_slice %8 {offsets = [3, 0, 0], sizes = [1, 2, 256], strides = [1, 1, 1]} : vector<8x2x256xf32> to vector<1x2x256xf32>
    %190 = vector.shape_cast %189 : vector<1x2x256xf32> to vector<2x256xf32>
    %191 = vector.extract_strided_slice %190 {offsets = [0, 128], sizes = [2, 128], strides = [1, 1]} : vector<2x256xf32> to vector<2x128xf32>
    %192 = tpu.concatenate %188, %191 in 1 : vector<2x128xf32>, vector<2x128xf32> -> vector<2x256xf32>
    %193 = tpu.concatenate %168, %185 in 1 : vector<2x32xf32>, vector<2x32xf32> -> vector<2x64xf32>
    %cst_21 = arith.constant dense<0.000000e+00> : vector<2x256xf32>
    %194 = tpu.matmul %193, %2, %cst_21 {dimension_numbers = #tpu.dot_dimension_numbers<[1], [0], [0], [1], [0, 0, 1, 1], [], []>} : vector<2x64xf32>, vector<64x256xf32>, vector<2x256xf32> -> vector<2x256xf32>
    %195 = arith.addf %192, %194 : vector<2x256xf32>
    %196 = vector.extract_strided_slice %195 {offsets = [0, 0], sizes = [2, 128], strides = [1, 1]} : vector<2x256xf32> to vector<2x128xf32>
    %197 = vector.extract_strided_slice %196 {offsets = [0, 0], sizes = [2, 96], strides = [1, 1]} : vector<2x128xf32> to vector<2x96xf32>
    %198 = arith.negf %197 : vector<2x96xf32>
    %199 = math.exp %198 : vector<2x96xf32>
    %cst_22 = arith.constant 1.000000e+00 : f32
    %200 = vector.broadcast %cst_22 : f32 to vector<2x96xf32>
    %201 = arith.addf %200, %199 : vector<2x96xf32>
    %202 = arith.divf %200, %201 : vector<2x96xf32>
    %203 = vector.extract_strided_slice %202 {offsets = [0, 0], sizes = [2, 32], strides = [1, 1]} : vector<2x96xf32> to vector<2x32xf32>
    %204 = vector.extract_strided_slice %202 {offsets = [0, 32], sizes = [2, 32], strides = [1, 1]} : vector<2x96xf32> to vector<2x32xf32>
    %205 = vector.extract_strided_slice %202 {offsets = [0, 64], sizes = [2, 32], strides = [1, 1]} : vector<2x96xf32> to vector<2x32xf32>
    %206 = vector.extract_strided_slice %196 {offsets = [0, 96], sizes = [2, 32], strides = [1, 1]} : vector<2x128xf32> to vector<2x32xf32>
    %207 = math.tanh %206 : vector<2x32xf32>
    %208 = arith.mulf %204, %166 : vector<2x32xf32>
    %209 = arith.mulf %203, %207 : vector<2x32xf32>
    %210 = arith.addf %208, %209 : vector<2x32xf32>
    %211 = math.tanh %210 : vector<2x32xf32>
    %212 = arith.mulf %205, %211 : vector<2x32xf32>
    %213 = vector.extract_strided_slice %195 {offsets = [0, 128], sizes = [2, 128], strides = [1, 1]} : vector<2x256xf32> to vector<2x128xf32>
    %214 = vector.extract_strided_slice %213 {offsets = [0, 0], sizes = [2, 96], strides = [1, 1]} : vector<2x128xf32> to vector<2x96xf32>
    %215 = arith.negf %214 : vector<2x96xf32>
    %216 = math.exp %215 : vector<2x96xf32>
    %cst_23 = arith.constant 1.000000e+00 : f32
    %217 = vector.broadcast %cst_23 : f32 to vector<2x96xf32>
    %218 = arith.addf %217, %216 : vector<2x96xf32>
    %219 = arith.divf %217, %218 : vector<2x96xf32>
    %220 = vector.extract_strided_slice %219 {offsets = [0, 0], sizes = [2, 32], strides = [1, 1]} : vector<2x96xf32> to vector<2x32xf32>
    %221 = vector.extract_strided_slice %219 {offsets = [0, 32], sizes = [2, 32], strides = [1, 1]} : vector<2x96xf32> to vector<2x32xf32>
    %222 = vector.extract_strided_slice %219 {offsets = [0, 64], sizes = [2, 32], strides = [1, 1]} : vector<2x96xf32> to vector<2x32xf32>
    %223 = vector.extract_strided_slice %213 {offsets = [0, 96], sizes = [2, 32], strides = [1, 1]} : vector<2x128xf32> to vector<2x32xf32>
    %224 = math.tanh %223 : vector<2x32xf32>
    %225 = arith.mulf %221, %183 : vector<2x32xf32>
    %226 = arith.mulf %220, %224 : vector<2x32xf32>
    %227 = arith.addf %225, %226 : vector<2x32xf32>
    %228 = math.tanh %227 : vector<2x32xf32>
    %229 = arith.mulf %222, %228 : vector<2x32xf32>
    %230 = vector.extract_strided_slice %8 {offsets = [5, 0, 0], sizes = [1, 2, 256], strides = [1, 1, 1]} : vector<8x2x256xf32> to vector<1x2x256xf32>
    %231 = vector.shape_cast %230 : vector<1x2x256xf32> to vector<2x256xf32>
    %232 = vector.extract_strided_slice %231 {offsets = [0, 0], sizes = [2, 128], strides = [1, 1]} : vector<2x256xf32> to vector<2x128xf32>
    %233 = vector.extract_strided_slice %8 {offsets = [2, 0, 0], sizes = [1, 2, 256], strides = [1, 1, 1]} : vector<8x2x256xf32> to vector<1x2x256xf32>
    %234 = vector.shape_cast %233 : vector<1x2x256xf32> to vector<2x256xf32>
    %235 = vector.extract_strided_slice %234 {offsets = [0, 128], sizes = [2, 128], strides = [1, 1]} : vector<2x256xf32> to vector<2x128xf32>
    %236 = tpu.concatenate %232, %235 in 1 : vector<2x128xf32>, vector<2x128xf32> -> vector<2x256xf32>
    %237 = tpu.concatenate %212, %229 in 1 : vector<2x32xf32>, vector<2x32xf32> -> vector<2x64xf32>
    %cst_24 = arith.constant dense<0.000000e+00> : vector<2x256xf32>
    %238 = tpu.matmul %237, %2, %cst_24 {dimension_numbers = #tpu.dot_dimension_numbers<[1], [0], [0], [1], [0, 0, 1, 1], [], []>} : vector<2x64xf32>, vector<64x256xf32>, vector<2x256xf32> -> vector<2x256xf32>
    %239 = arith.addf %236, %238 : vector<2x256xf32>
    %240 = vector.extract_strided_slice %239 {offsets = [0, 0], sizes = [2, 128], strides = [1, 1]} : vector<2x256xf32> to vector<2x128xf32>
    %241 = vector.extract_strided_slice %240 {offsets = [0, 0], sizes = [2, 96], strides = [1, 1]} : vector<2x128xf32> to vector<2x96xf32>
    %242 = arith.negf %241 : vector<2x96xf32>
    %243 = math.exp %242 : vector<2x96xf32>
    %cst_25 = arith.constant 1.000000e+00 : f32
    %244 = vector.broadcast %cst_25 : f32 to vector<2x96xf32>
    %245 = arith.addf %244, %243 : vector<2x96xf32>
    %246 = arith.divf %244, %245 : vector<2x96xf32>
    %247 = vector.extract_strided_slice %246 {offsets = [0, 0], sizes = [2, 32], strides = [1, 1]} : vector<2x96xf32> to vector<2x32xf32>
    %248 = vector.extract_strided_slice %246 {offsets = [0, 32], sizes = [2, 32], strides = [1, 1]} : vector<2x96xf32> to vector<2x32xf32>
    %249 = vector.extract_strided_slice %246 {offsets = [0, 64], sizes = [2, 32], strides = [1, 1]} : vector<2x96xf32> to vector<2x32xf32>
    %250 = vector.extract_strided_slice %240 {offsets = [0, 96], sizes = [2, 32], strides = [1, 1]} : vector<2x128xf32> to vector<2x32xf32>
    %251 = math.tanh %250 : vector<2x32xf32>
    %252 = arith.mulf %248, %210 : vector<2x32xf32>
    %253 = arith.mulf %247, %251 : vector<2x32xf32>
    %254 = arith.addf %252, %253 : vector<2x32xf32>
    %255 = math.tanh %254 : vector<2x32xf32>
    %256 = arith.mulf %249, %255 : vector<2x32xf32>
    %257 = vector.extract_strided_slice %239 {offsets = [0, 128], sizes = [2, 128], strides = [1, 1]} : vector<2x256xf32> to vector<2x128xf32>
    %258 = vector.extract_strided_slice %257 {offsets = [0, 0], sizes = [2, 96], strides = [1, 1]} : vector<2x128xf32> to vector<2x96xf32>
    %259 = arith.negf %258 : vector<2x96xf32>
    %260 = math.exp %259 : vector<2x96xf32>
    %cst_26 = arith.constant 1.000000e+00 : f32
    %261 = vector.broadcast %cst_26 : f32 to vector<2x96xf32>
    %262 = arith.addf %261, %260 : vector<2x96xf32>
    %263 = arith.divf %261, %262 : vector<2x96xf32>
    %264 = vector.extract_strided_slice %263 {offsets = [0, 0], sizes = [2, 32], strides = [1, 1]} : vector<2x96xf32> to vector<2x32xf32>
    %265 = vector.extract_strided_slice %263 {offsets = [0, 32], sizes = [2, 32], strides = [1, 1]} : vector<2x96xf32> to vector<2x32xf32>
    %266 = vector.extract_strided_slice %263 {offsets = [0, 64], sizes = [2, 32], strides = [1, 1]} : vector<2x96xf32> to vector<2x32xf32>
    %267 = vector.extract_strided_slice %257 {offsets = [0, 96], sizes = [2, 32], strides = [1, 1]} : vector<2x128xf32> to vector<2x32xf32>
    %268 = math.tanh %267 : vector<2x32xf32>
    %269 = arith.mulf %265, %227 : vector<2x32xf32>
    %270 = arith.mulf %264, %268 : vector<2x32xf32>
    %271 = arith.addf %269, %270 : vector<2x32xf32>
    %272 = math.tanh %271 : vector<2x32xf32>
    %273 = arith.mulf %266, %272 : vector<2x32xf32>
    %274 = vector.extract_strided_slice %8 {offsets = [6, 0, 0], sizes = [1, 2, 256], strides = [1, 1, 1]} : vector<8x2x256xf32> to vector<1x2x256xf32>
    %275 = vector.shape_cast %274 : vector<1x2x256xf32> to vector<2x256xf32>
    %276 = vector.extract_strided_slice %275 {offsets = [0, 0], sizes = [2, 128], strides = [1, 1]} : vector<2x256xf32> to vector<2x128xf32>
    %277 = vector.extract_strided_slice %8 {offsets = [1, 0, 0], sizes = [1, 2, 256], strides = [1, 1, 1]} : vector<8x2x256xf32> to vector<1x2x256xf32>
    %278 = vector.shape_cast %277 : vector<1x2x256xf32> to vector<2x256xf32>
    %279 = vector.extract_strided_slice %278 {offsets = [0, 128], sizes = [2, 128], strides = [1, 1]} : vector<2x256xf32> to vector<2x128xf32>
    %280 = tpu.concatenate %276, %279 in 1 : vector<2x128xf32>, vector<2x128xf32> -> vector<2x256xf32>
    %281 = tpu.concatenate %256, %273 in 1 : vector<2x32xf32>, vector<2x32xf32> -> vector<2x64xf32>
    %cst_27 = arith.constant dense<0.000000e+00> : vector<2x256xf32>
    %282 = tpu.matmul %281, %2, %cst_27 {dimension_numbers = #tpu.dot_dimension_numbers<[1], [0], [0], [1], [0, 0, 1, 1], [], []>} : vector<2x64xf32>, vector<64x256xf32>, vector<2x256xf32> -> vector<2x256xf32>
    %283 = arith.addf %280, %282 : vector<2x256xf32>
    %284 = vector.extract_strided_slice %283 {offsets = [0, 0], sizes = [2, 128], strides = [1, 1]} : vector<2x256xf32> to vector<2x128xf32>
    %285 = vector.extract_strided_slice %284 {offsets = [0, 0], sizes = [2, 96], strides = [1, 1]} : vector<2x128xf32> to vector<2x96xf32>
    %286 = arith.negf %285 : vector<2x96xf32>
    %287 = math.exp %286 : vector<2x96xf32>
    %cst_28 = arith.constant 1.000000e+00 : f32
    %288 = vector.broadcast %cst_28 : f32 to vector<2x96xf32>
    %289 = arith.addf %288, %287 : vector<2x96xf32>
    %290 = arith.divf %288, %289 : vector<2x96xf32>
    %291 = vector.extract_strided_slice %290 {offsets = [0, 0], sizes = [2, 32], strides = [1, 1]} : vector<2x96xf32> to vector<2x32xf32>
    %292 = vector.extract_strided_slice %290 {offsets = [0, 32], sizes = [2, 32], strides = [1, 1]} : vector<2x96xf32> to vector<2x32xf32>
    %293 = vector.extract_strided_slice %290 {offsets = [0, 64], sizes = [2, 32], strides = [1, 1]} : vector<2x96xf32> to vector<2x32xf32>
    %294 = vector.extract_strided_slice %284 {offsets = [0, 96], sizes = [2, 32], strides = [1, 1]} : vector<2x128xf32> to vector<2x32xf32>
    %295 = math.tanh %294 : vector<2x32xf32>
    %296 = arith.mulf %292, %254 : vector<2x32xf32>
    %297 = arith.mulf %291, %295 : vector<2x32xf32>
    %298 = arith.addf %296, %297 : vector<2x32xf32>
    %299 = math.tanh %298 : vector<2x32xf32>
    %300 = arith.mulf %293, %299 : vector<2x32xf32>
    %301 = vector.extract_strided_slice %283 {offsets = [0, 128], sizes = [2, 128], strides = [1, 1]} : vector<2x256xf32> to vector<2x128xf32>
    %302 = vector.extract_strided_slice %301 {offsets = [0, 0], sizes = [2, 96], strides = [1, 1]} : vector<2x128xf32> to vector<2x96xf32>
    %303 = arith.negf %302 : vector<2x96xf32>
    %304 = math.exp %303 : vector<2x96xf32>
    %cst_29 = arith.constant 1.000000e+00 : f32
    %305 = vector.broadcast %cst_29 : f32 to vector<2x96xf32>
    %306 = arith.addf %305, %304 : vector<2x96xf32>
    %307 = arith.divf %305, %306 : vector<2x96xf32>
    %308 = vector.extract_strided_slice %307 {offsets = [0, 0], sizes = [2, 32], strides = [1, 1]} : vector<2x96xf32> to vector<2x32xf32>
    %309 = vector.extract_strided_slice %307 {offsets = [0, 32], sizes = [2, 32], strides = [1, 1]} : vector<2x96xf32> to vector<2x32xf32>
    %310 = vector.extract_strided_slice %307 {offsets = [0, 64], sizes = [2, 32], strides = [1, 1]} : vector<2x96xf32> to vector<2x32xf32>
    %311 = vector.extract_strided_slice %301 {offsets = [0, 96], sizes = [2, 32], strides = [1, 1]} : vector<2x128xf32> to vector<2x32xf32>
    %312 = math.tanh %311 : vector<2x32xf32>
    %313 = arith.mulf %309, %271 : vector<2x32xf32>
    %314 = arith.mulf %308, %312 : vector<2x32xf32>
    %315 = arith.addf %313, %314 : vector<2x32xf32>
    %316 = math.tanh %315 : vector<2x32xf32>
    %317 = arith.mulf %310, %316 : vector<2x32xf32>
    %318 = vector.extract_strided_slice %8 {offsets = [7, 0, 0], sizes = [1, 2, 256], strides = [1, 1, 1]} : vector<8x2x256xf32> to vector<1x2x256xf32>
    %319 = vector.shape_cast %318 : vector<1x2x256xf32> to vector<2x256xf32>
    %320 = vector.extract_strided_slice %319 {offsets = [0, 0], sizes = [2, 128], strides = [1, 1]} : vector<2x256xf32> to vector<2x128xf32>
    %321 = vector.extract_strided_slice %8 {offsets = [0, 0, 0], sizes = [1, 2, 256], strides = [1, 1, 1]} : vector<8x2x256xf32> to vector<1x2x256xf32>
    %322 = vector.shape_cast %321 : vector<1x2x256xf32> to vector<2x256xf32>
    %323 = vector.extract_strided_slice %322 {offsets = [0, 128], sizes = [2, 128], strides = [1, 1]} : vector<2x256xf32> to vector<2x128xf32>
    %324 = tpu.concatenate %320, %323 in 1 : vector<2x128xf32>, vector<2x128xf32> -> vector<2x256xf32>
    %325 = tpu.concatenate %300, %317 in 1 : vector<2x32xf32>, vector<2x32xf32> -> vector<2x64xf32>
    %cst_30 = arith.constant dense<0.000000e+00> : vector<2x256xf32>
    %326 = tpu.matmul %325, %2, %cst_30 {dimension_numbers = #tpu.dot_dimension_numbers<[1], [0], [0], [1], [0, 0, 1, 1], [], []>} : vector<2x64xf32>, vector<64x256xf32>, vector<2x256xf32> -> vector<2x256xf32>
    %327 = arith.addf %324, %326 : vector<2x256xf32>
    %328 = vector.extract_strided_slice %327 {offsets = [0, 0], sizes = [2, 128], strides = [1, 1]} : vector<2x256xf32> to vector<2x128xf32>
    %329 = vector.extract_strided_slice %328 {offsets = [0, 0], sizes = [2, 96], strides = [1, 1]} : vector<2x128xf32> to vector<2x96xf32>
    %330 = arith.negf %329 : vector<2x96xf32>
    %331 = math.exp %330 : vector<2x96xf32>
    %cst_31 = arith.constant 1.000000e+00 : f32
    %332 = vector.broadcast %cst_31 : f32 to vector<2x96xf32>
    %333 = arith.addf %332, %331 : vector<2x96xf32>
    %334 = arith.divf %332, %333 : vector<2x96xf32>
    %335 = vector.extract_strided_slice %334 {offsets = [0, 0], sizes = [2, 32], strides = [1, 1]} : vector<2x96xf32> to vector<2x32xf32>
    %336 = vector.extract_strided_slice %334 {offsets = [0, 32], sizes = [2, 32], strides = [1, 1]} : vector<2x96xf32> to vector<2x32xf32>
    %337 = vector.extract_strided_slice %334 {offsets = [0, 64], sizes = [2, 32], strides = [1, 1]} : vector<2x96xf32> to vector<2x32xf32>
    %338 = vector.extract_strided_slice %328 {offsets = [0, 96], sizes = [2, 32], strides = [1, 1]} : vector<2x128xf32> to vector<2x32xf32>
    %339 = math.tanh %338 : vector<2x32xf32>
    %340 = arith.mulf %336, %298 : vector<2x32xf32>
    %341 = arith.mulf %335, %339 : vector<2x32xf32>
    %342 = arith.addf %340, %341 : vector<2x32xf32>
    %343 = math.tanh %342 : vector<2x32xf32>
    %344 = arith.mulf %337, %343 : vector<2x32xf32>
    %345 = vector.extract_strided_slice %327 {offsets = [0, 128], sizes = [2, 128], strides = [1, 1]} : vector<2x256xf32> to vector<2x128xf32>
    %346 = vector.extract_strided_slice %345 {offsets = [0, 0], sizes = [2, 96], strides = [1, 1]} : vector<2x128xf32> to vector<2x96xf32>
    %347 = arith.negf %346 : vector<2x96xf32>
    %348 = math.exp %347 : vector<2x96xf32>
    %cst_32 = arith.constant 1.000000e+00 : f32
    %349 = vector.broadcast %cst_32 : f32 to vector<2x96xf32>
    %350 = arith.addf %349, %348 : vector<2x96xf32>
    %351 = arith.divf %349, %350 : vector<2x96xf32>
    %352 = vector.extract_strided_slice %351 {offsets = [0, 0], sizes = [2, 32], strides = [1, 1]} : vector<2x96xf32> to vector<2x32xf32>
    %353 = vector.extract_strided_slice %351 {offsets = [0, 32], sizes = [2, 32], strides = [1, 1]} : vector<2x96xf32> to vector<2x32xf32>
    %354 = vector.extract_strided_slice %351 {offsets = [0, 64], sizes = [2, 32], strides = [1, 1]} : vector<2x96xf32> to vector<2x32xf32>
    %355 = vector.extract_strided_slice %345 {offsets = [0, 96], sizes = [2, 32], strides = [1, 1]} : vector<2x128xf32> to vector<2x32xf32>
    %356 = math.tanh %355 : vector<2x32xf32>
    %357 = arith.mulf %353, %315 : vector<2x32xf32>
    %358 = arith.mulf %352, %356 : vector<2x32xf32>
    %359 = arith.addf %357, %358 : vector<2x32xf32>
    %360 = math.tanh %359 : vector<2x32xf32>
    %361 = arith.mulf %354, %360 : vector<2x32xf32>
    %c0_33 = arith.constant 0 : index
    %c0_34 = arith.constant 0 : index
    %c0_35 = arith.constant 0 : index
    %362 = vector.load %arg10[%c0_33, %c0_34, %c0_35] : memref<4x2x32xf32, #tpu.memory_space<vmem>>, vector<1x2x32xf32>
    %363 = vector.shape_cast %362 : vector<1x2x32xf32> to vector<2x32xf32>
    %364 = vector.shape_cast %344 : vector<2x32xf32> to vector<1x2x32xf32>
    tpu.vector_store %arg10[%c0_33, %c0_34, %c0_35], %364 {strides = array<i32>} : memref<4x2x32xf32, #tpu.memory_space<vmem>>, vector<1x2x32xf32>,
    %c1 = arith.constant 1 : index
    %c0_36 = arith.constant 0 : index
    %c0_37 = arith.constant 0 : index
    %365 = vector.load %arg10[%c1, %c0_36, %c0_37] : memref<4x2x32xf32, #tpu.memory_space<vmem>>, vector<1x2x32xf32>
    %366 = vector.shape_cast %365 : vector<1x2x32xf32> to vector<2x32xf32>
    %367 = vector.shape_cast %361 : vector<2x32xf32> to vector<1x2x32xf32>
    tpu.vector_store %arg10[%c1, %c0_36, %c0_37], %367 {strides = array<i32>} : memref<4x2x32xf32, #tpu.memory_space<vmem>>, vector<1x2x32xf32>,
    %c0_38 = arith.constant 0 : index
    %c0_39 = arith.constant 0 : index
    %c0_40 = arith.constant 0 : index
    %368 = vector.load %arg11[%c0_38, %c0_39, %c0_40] : memref<4x2x32xf32, #tpu.memory_space<vmem>>, vector<1x2x32xf32>
    %369 = vector.shape_cast %368 : vector<1x2x32xf32> to vector<2x32xf32>
    %370 = vector.shape_cast %342 : vector<2x32xf32> to vector<1x2x32xf32>
    tpu.vector_store %arg11[%c0_38, %c0_39, %c0_40], %370 {strides = array<i32>} : memref<4x2x32xf32, #tpu.memory_space<vmem>>, vector<1x2x32xf32>,
    %c1_41 = arith.constant 1 : index
    %c0_42 = arith.constant 0 : index
    %c0_43 = arith.constant 0 : index
    %371 = vector.load %arg11[%c1_41, %c0_42, %c0_43] : memref<4x2x32xf32, #tpu.memory_space<vmem>>, vector<1x2x32xf32>
    %372 = vector.shape_cast %371 : vector<1x2x32xf32> to vector<2x32xf32>
    %373 = vector.shape_cast %359 : vector<2x32xf32> to vector<1x2x32xf32>
    tpu.vector_store %arg11[%c1_41, %c0_42, %c0_43], %373 {strides = array<i32>} : memref<4x2x32xf32, #tpu.memory_space<vmem>>, vector<1x2x32xf32>,
    %374 = tpu.concatenate %36, %361 in 1 : vector<2x32xf32>, vector<2x32xf32> -> vector<2x64xf32>
    %375 = tpu.concatenate %80, %317 in 1 : vector<2x32xf32>, vector<2x32xf32> -> vector<2x64xf32>
    %376 = tpu.concatenate %124, %273 in 1 : vector<2x32xf32>, vector<2x32xf32> -> vector<2x64xf32>
    %377 = tpu.concatenate %168, %229 in 1 : vector<2x32xf32>, vector<2x32xf32> -> vector<2x64xf32>
    %378 = tpu.concatenate %212, %185 in 1 : vector<2x32xf32>, vector<2x32xf32> -> vector<2x64xf32>
    %379 = tpu.concatenate %256, %141 in 1 : vector<2x32xf32>, vector<2x32xf32> -> vector<2x64xf32>
    %380 = tpu.concatenate %300, %97 in 1 : vector<2x32xf32>, vector<2x32xf32> -> vector<2x64xf32>
    %381 = tpu.concatenate %344, %53 in 1 : vector<2x32xf32>, vector<2x32xf32> -> vector<2x64xf32>
    %382 = vector.shape_cast %374 : vector<2x64xf32> to vector<1x2x64xf32>
    %383 = vector.shape_cast %375 : vector<2x64xf32> to vector<1x2x64xf32>
    %384 = vector.shape_cast %376 : vector<2x64xf32> to vector<1x2x64xf32>
    %385 = vector.shape_cast %377 : vector<2x64xf32> to vector<1x2x64xf32>
    %386 = vector.shape_cast %378 : vector<2x64xf32> to vector<1x2x64xf32>
    %387 = vector.shape_cast %379 : vector<2x64xf32> to vector<1x2x64xf32>
    %388 = vector.shape_cast %380 : vector<2x64xf32> to vector<1x2x64xf32>
    %389 = vector.shape_cast %381 : vector<2x64xf32> to vector<1x2x64xf32>
    %390 = tpu.concatenate %382, %383, %384, %385, %386, %387, %388, %389 in 0 : vector<1x2x64xf32>, vector<1x2x64xf32>, vector<1x2x64xf32>, vector<1x2x64xf32>, vector<1x2x64xf32>, vector<1x2x64xf32>, vector<1x2x64xf32>, vector<1x2x64xf32> -> vector<8x2x64xf32>
    %c0_44 = arith.constant 0 : index
    %c0_45 = arith.constant 0 : index
    %391 = vector.load %arg4[%c0_44, %c0_45] : memref<64x256xf32, #tpu.memory_space<vmem>>, vector<64x256xf32>
    %c0_46 = arith.constant 0 : index
    %c0_47 = arith.constant 0 : index
    %392 = vector.load %arg5[%c0_46, %c0_47] : memref<64x256xf32, #tpu.memory_space<vmem>>, vector<64x256xf32>
    %c0_48 = arith.constant 0 : index
    %c0_49 = arith.constant 0 : index
    %393 = vector.load %arg6[%c0_48, %c0_49] : memref<1x256xf32, #tpu.memory_space<vmem>>, vector<1x256xf32>
    %394 = vector.shape_cast %390 : vector<8x2x64xf32> to vector<16x64xf32>
    %cst_50 = arith.constant dense<0.000000e+00> : vector<16x256xf32>
    %395 = tpu.matmul %394, %391, %cst_50 {dimension_numbers = #tpu.dot_dimension_numbers<[1], [0], [0], [1], [0, 0, 1, 1], [], []>} : vector<16x64xf32>, vector<64x256xf32>, vector<16x256xf32> -> vector<16x256xf32>
    %396 = vector.broadcast %393 : vector<1x256xf32> to vector<16x256xf32>
    %397 = arith.addf %395, %396 : vector<16x256xf32>
    %398 = vector.shape_cast %397 : vector<16x256xf32> to vector<8x2x256xf32>
    %cst_51 = arith.constant 0.000000e+00 : f32
    %399 = vector.broadcast %cst_51 : f32 to vector<2x32xf32>
    %400 = vector.extract_strided_slice %398 {offsets = [0, 0, 0], sizes = [1, 2, 256], strides = [1, 1, 1]} : vector<8x2x256xf32> to vector<1x2x256xf32>
    %401 = vector.shape_cast %400 : vector<1x2x256xf32> to vector<2x256xf32>
    %402 = vector.extract_strided_slice %401 {offsets = [0, 0], sizes = [2, 128], strides = [1, 1]} : vector<2x256xf32> to vector<2x128xf32>
    %403 = vector.extract_strided_slice %398 {offsets = [7, 0, 0], sizes = [1, 2, 256], strides = [1, 1, 1]} : vector<8x2x256xf32> to vector<1x2x256xf32>
    %404 = vector.shape_cast %403 : vector<1x2x256xf32> to vector<2x256xf32>
    %405 = vector.extract_strided_slice %404 {offsets = [0, 128], sizes = [2, 128], strides = [1, 1]} : vector<2x256xf32> to vector<2x128xf32>
    %406 = tpu.concatenate %402, %405 in 1 : vector<2x128xf32>, vector<2x128xf32> -> vector<2x256xf32>
    %407 = tpu.concatenate %399, %399 in 1 : vector<2x32xf32>, vector<2x32xf32> -> vector<2x64xf32>
    %cst_52 = arith.constant dense<0.000000e+00> : vector<2x256xf32>
    %408 = tpu.matmul %407, %392, %cst_52 {dimension_numbers = #tpu.dot_dimension_numbers<[1], [0], [0], [1], [0, 0, 1, 1], [], []>} : vector<2x64xf32>, vector<64x256xf32>, vector<2x256xf32> -> vector<2x256xf32>
    %409 = arith.addf %406, %408 : vector<2x256xf32>
    %410 = vector.extract_strided_slice %409 {offsets = [0, 0], sizes = [2, 128], strides = [1, 1]} : vector<2x256xf32> to vector<2x128xf32>
    %411 = vector.extract_strided_slice %410 {offsets = [0, 0], sizes = [2, 96], strides = [1, 1]} : vector<2x128xf32> to vector<2x96xf32>
    %412 = arith.negf %411 : vector<2x96xf32>
    %413 = math.exp %412 : vector<2x96xf32>
    %cst_53 = arith.constant 1.000000e+00 : f32
    %414 = vector.broadcast %cst_53 : f32 to vector<2x96xf32>
    %415 = arith.addf %414, %413 : vector<2x96xf32>
    %416 = arith.divf %414, %415 : vector<2x96xf32>
    %417 = vector.extract_strided_slice %416 {offsets = [0, 0], sizes = [2, 32], strides = [1, 1]} : vector<2x96xf32> to vector<2x32xf32>
    %418 = vector.extract_strided_slice %416 {offsets = [0, 32], sizes = [2, 32], strides = [1, 1]} : vector<2x96xf32> to vector<2x32xf32>
    %419 = vector.extract_strided_slice %416 {offsets = [0, 64], sizes = [2, 32], strides = [1, 1]} : vector<2x96xf32> to vector<2x32xf32>
    %420 = vector.extract_strided_slice %410 {offsets = [0, 96], sizes = [2, 32], strides = [1, 1]} : vector<2x128xf32> to vector<2x32xf32>
    %421 = math.tanh %420 : vector<2x32xf32>
    %422 = arith.mulf %418, %399 : vector<2x32xf32>
    %423 = arith.mulf %417, %421 : vector<2x32xf32>
    %424 = arith.addf %422, %423 : vector<2x32xf32>
    %425 = math.tanh %424 : vector<2x32xf32>
    %426 = arith.mulf %419, %425 : vector<2x32xf32>
    %427 = vector.extract_strided_slice %409 {offsets = [0, 128], sizes = [2, 128], strides = [1, 1]} : vector<2x256xf32> to vector<2x128xf32>
    %428 = vector.extract_strided_slice %427 {offsets = [0, 0], sizes = [2, 96], strides = [1, 1]} : vector<2x128xf32> to vector<2x96xf32>
    %429 = arith.negf %428 : vector<2x96xf32>
    %430 = math.exp %429 : vector<2x96xf32>
    %cst_54 = arith.constant 1.000000e+00 : f32
    %431 = vector.broadcast %cst_54 : f32 to vector<2x96xf32>
    %432 = arith.addf %431, %430 : vector<2x96xf32>
    %433 = arith.divf %431, %432 : vector<2x96xf32>
    %434 = vector.extract_strided_slice %433 {offsets = [0, 0], sizes = [2, 32], strides = [1, 1]} : vector<2x96xf32> to vector<2x32xf32>
    %435 = vector.extract_strided_slice %433 {offsets = [0, 32], sizes = [2, 32], strides = [1, 1]} : vector<2x96xf32> to vector<2x32xf32>
    %436 = vector.extract_strided_slice %433 {offsets = [0, 64], sizes = [2, 32], strides = [1, 1]} : vector<2x96xf32> to vector<2x32xf32>
    %437 = vector.extract_strided_slice %427 {offsets = [0, 96], sizes = [2, 32], strides = [1, 1]} : vector<2x128xf32> to vector<2x32xf32>
    %438 = math.tanh %437 : vector<2x32xf32>
    %439 = arith.mulf %435, %399 : vector<2x32xf32>
    %440 = arith.mulf %434, %438 : vector<2x32xf32>
    %441 = arith.addf %439, %440 : vector<2x32xf32>
    %442 = math.tanh %441 : vector<2x32xf32>
    %443 = arith.mulf %436, %442 : vector<2x32xf32>
    %444 = vector.extract_strided_slice %398 {offsets = [1, 0, 0], sizes = [1, 2, 256], strides = [1, 1, 1]} : vector<8x2x256xf32> to vector<1x2x256xf32>
    %445 = vector.shape_cast %444 : vector<1x2x256xf32> to vector<2x256xf32>
    %446 = vector.extract_strided_slice %445 {offsets = [0, 0], sizes = [2, 128], strides = [1, 1]} : vector<2x256xf32> to vector<2x128xf32>
    %447 = vector.extract_strided_slice %398 {offsets = [6, 0, 0], sizes = [1, 2, 256], strides = [1, 1, 1]} : vector<8x2x256xf32> to vector<1x2x256xf32>
    %448 = vector.shape_cast %447 : vector<1x2x256xf32> to vector<2x256xf32>
    %449 = vector.extract_strided_slice %448 {offsets = [0, 128], sizes = [2, 128], strides = [1, 1]} : vector<2x256xf32> to vector<2x128xf32>
    %450 = tpu.concatenate %446, %449 in 1 : vector<2x128xf32>, vector<2x128xf32> -> vector<2x256xf32>
    %451 = tpu.concatenate %426, %443 in 1 : vector<2x32xf32>, vector<2x32xf32> -> vector<2x64xf32>
    %cst_55 = arith.constant dense<0.000000e+00> : vector<2x256xf32>
    %452 = tpu.matmul %451, %392, %cst_55 {dimension_numbers = #tpu.dot_dimension_numbers<[1], [0], [0], [1], [0, 0, 1, 1], [], []>} : vector<2x64xf32>, vector<64x256xf32>, vector<2x256xf32> -> vector<2x256xf32>
    %453 = arith.addf %450, %452 : vector<2x256xf32>
    %454 = vector.extract_strided_slice %453 {offsets = [0, 0], sizes = [2, 128], strides = [1, 1]} : vector<2x256xf32> to vector<2x128xf32>
    %455 = vector.extract_strided_slice %454 {offsets = [0, 0], sizes = [2, 96], strides = [1, 1]} : vector<2x128xf32> to vector<2x96xf32>
    %456 = arith.negf %455 : vector<2x96xf32>
    %457 = math.exp %456 : vector<2x96xf32>
    %cst_56 = arith.constant 1.000000e+00 : f32
    %458 = vector.broadcast %cst_56 : f32 to vector<2x96xf32>
    %459 = arith.addf %458, %457 : vector<2x96xf32>
    %460 = arith.divf %458, %459 : vector<2x96xf32>
    %461 = vector.extract_strided_slice %460 {offsets = [0, 0], sizes = [2, 32], strides = [1, 1]} : vector<2x96xf32> to vector<2x32xf32>
    %462 = vector.extract_strided_slice %460 {offsets = [0, 32], sizes = [2, 32], strides = [1, 1]} : vector<2x96xf32> to vector<2x32xf32>
    %463 = vector.extract_strided_slice %460 {offsets = [0, 64], sizes = [2, 32], strides = [1, 1]} : vector<2x96xf32> to vector<2x32xf32>
    %464 = vector.extract_strided_slice %454 {offsets = [0, 96], sizes = [2, 32], strides = [1, 1]} : vector<2x128xf32> to vector<2x32xf32>
    %465 = math.tanh %464 : vector<2x32xf32>
    %466 = arith.mulf %462, %424 : vector<2x32xf32>
    %467 = arith.mulf %461, %465 : vector<2x32xf32>
    %468 = arith.addf %466, %467 : vector<2x32xf32>
    %469 = math.tanh %468 : vector<2x32xf32>
    %470 = arith.mulf %463, %469 : vector<2x32xf32>
    %471 = vector.extract_strided_slice %453 {offsets = [0, 128], sizes = [2, 128], strides = [1, 1]} : vector<2x256xf32> to vector<2x128xf32>
    %472 = vector.extract_strided_slice %471 {offsets = [0, 0], sizes = [2, 96], strides = [1, 1]} : vector<2x128xf32> to vector<2x96xf32>
    %473 = arith.negf %472 : vector<2x96xf32>
    %474 = math.exp %473 : vector<2x96xf32>
    %cst_57 = arith.constant 1.000000e+00 : f32
    %475 = vector.broadcast %cst_57 : f32 to vector<2x96xf32>
    %476 = arith.addf %475, %474 : vector<2x96xf32>
    %477 = arith.divf %475, %476 : vector<2x96xf32>
    %478 = vector.extract_strided_slice %477 {offsets = [0, 0], sizes = [2, 32], strides = [1, 1]} : vector<2x96xf32> to vector<2x32xf32>
    %479 = vector.extract_strided_slice %477 {offsets = [0, 32], sizes = [2, 32], strides = [1, 1]} : vector<2x96xf32> to vector<2x32xf32>
    %480 = vector.extract_strided_slice %477 {offsets = [0, 64], sizes = [2, 32], strides = [1, 1]} : vector<2x96xf32> to vector<2x32xf32>
    %481 = vector.extract_strided_slice %471 {offsets = [0, 96], sizes = [2, 32], strides = [1, 1]} : vector<2x128xf32> to vector<2x32xf32>
    %482 = math.tanh %481 : vector<2x32xf32>
    %483 = arith.mulf %479, %441 : vector<2x32xf32>
    %484 = arith.mulf %478, %482 : vector<2x32xf32>
    %485 = arith.addf %483, %484 : vector<2x32xf32>
    %486 = math.tanh %485 : vector<2x32xf32>
    %487 = arith.mulf %480, %486 : vector<2x32xf32>
    %488 = vector.extract_strided_slice %398 {offsets = [2, 0, 0], sizes = [1, 2, 256], strides = [1, 1, 1]} : vector<8x2x256xf32> to vector<1x2x256xf32>
    %489 = vector.shape_cast %488 : vector<1x2x256xf32> to vector<2x256xf32>
    %490 = vector.extract_strided_slice %489 {offsets = [0, 0], sizes = [2, 128], strides = [1, 1]} : vector<2x256xf32> to vector<2x128xf32>
    %491 = vector.extract_strided_slice %398 {offsets = [5, 0, 0], sizes = [1, 2, 256], strides = [1, 1, 1]} : vector<8x2x256xf32> to vector<1x2x256xf32>
    %492 = vector.shape_cast %491 : vector<1x2x256xf32> to vector<2x256xf32>
    %493 = vector.extract_strided_slice %492 {offsets = [0, 128], sizes = [2, 128], strides = [1, 1]} : vector<2x256xf32> to vector<2x128xf32>
    %494 = tpu.concatenate %490, %493 in 1 : vector<2x128xf32>, vector<2x128xf32> -> vector<2x256xf32>
    %495 = tpu.concatenate %470, %487 in 1 : vector<2x32xf32>, vector<2x32xf32> -> vector<2x64xf32>
    %cst_58 = arith.constant dense<0.000000e+00> : vector<2x256xf32>
    %496 = tpu.matmul %495, %392, %cst_58 {dimension_numbers = #tpu.dot_dimension_numbers<[1], [0], [0], [1], [0, 0, 1, 1], [], []>} : vector<2x64xf32>, vector<64x256xf32>, vector<2x256xf32> -> vector<2x256xf32>
    %497 = arith.addf %494, %496 : vector<2x256xf32>
    %498 = vector.extract_strided_slice %497 {offsets = [0, 0], sizes = [2, 128], strides = [1, 1]} : vector<2x256xf32> to vector<2x128xf32>
    %499 = vector.extract_strided_slice %498 {offsets = [0, 0], sizes = [2, 96], strides = [1, 1]} : vector<2x128xf32> to vector<2x96xf32>
    %500 = arith.negf %499 : vector<2x96xf32>
    %501 = math.exp %500 : vector<2x96xf32>
    %cst_59 = arith.constant 1.000000e+00 : f32
    %502 = vector.broadcast %cst_59 : f32 to vector<2x96xf32>
    %503 = arith.addf %502, %501 : vector<2x96xf32>
    %504 = arith.divf %502, %503 : vector<2x96xf32>
    %505 = vector.extract_strided_slice %504 {offsets = [0, 0], sizes = [2, 32], strides = [1, 1]} : vector<2x96xf32> to vector<2x32xf32>
    %506 = vector.extract_strided_slice %504 {offsets = [0, 32], sizes = [2, 32], strides = [1, 1]} : vector<2x96xf32> to vector<2x32xf32>
    %507 = vector.extract_strided_slice %504 {offsets = [0, 64], sizes = [2, 32], strides = [1, 1]} : vector<2x96xf32> to vector<2x32xf32>
    %508 = vector.extract_strided_slice %498 {offsets = [0, 96], sizes = [2, 32], strides = [1, 1]} : vector<2x128xf32> to vector<2x32xf32>
    %509 = math.tanh %508 : vector<2x32xf32>
    %510 = arith.mulf %506, %468 : vector<2x32xf32>
    %511 = arith.mulf %505, %509 : vector<2x32xf32>
    %512 = arith.addf %510, %511 : vector<2x32xf32>
    %513 = math.tanh %512 : vector<2x32xf32>
    %514 = arith.mulf %507, %513 : vector<2x32xf32>
    %515 = vector.extract_strided_slice %497 {offsets = [0, 128], sizes = [2, 128], strides = [1, 1]} : vector<2x256xf32> to vector<2x128xf32>
    %516 = vector.extract_strided_slice %515 {offsets = [0, 0], sizes = [2, 96], strides = [1, 1]} : vector<2x128xf32> to vector<2x96xf32>
    %517 = arith.negf %516 : vector<2x96xf32>
    %518 = math.exp %517 : vector<2x96xf32>
    %cst_60 = arith.constant 1.000000e+00 : f32
    %519 = vector.broadcast %cst_60 : f32 to vector<2x96xf32>
    %520 = arith.addf %519, %518 : vector<2x96xf32>
    %521 = arith.divf %519, %520 : vector<2x96xf32>
    %522 = vector.extract_strided_slice %521 {offsets = [0, 0], sizes = [2, 32], strides = [1, 1]} : vector<2x96xf32> to vector<2x32xf32>
    %523 = vector.extract_strided_slice %521 {offsets = [0, 32], sizes = [2, 32], strides = [1, 1]} : vector<2x96xf32> to vector<2x32xf32>
    %524 = vector.extract_strided_slice %521 {offsets = [0, 64], sizes = [2, 32], strides = [1, 1]} : vector<2x96xf32> to vector<2x32xf32>
    %525 = vector.extract_strided_slice %515 {offsets = [0, 96], sizes = [2, 32], strides = [1, 1]} : vector<2x128xf32> to vector<2x32xf32>
    %526 = math.tanh %525 : vector<2x32xf32>
    %527 = arith.mulf %523, %485 : vector<2x32xf32>
    %528 = arith.mulf %522, %526 : vector<2x32xf32>
    %529 = arith.addf %527, %528 : vector<2x32xf32>
    %530 = math.tanh %529 : vector<2x32xf32>
    %531 = arith.mulf %524, %530 : vector<2x32xf32>
    %532 = vector.extract_strided_slice %398 {offsets = [3, 0, 0], sizes = [1, 2, 256], strides = [1, 1, 1]} : vector<8x2x256xf32> to vector<1x2x256xf32>
    %533 = vector.shape_cast %532 : vector<1x2x256xf32> to vector<2x256xf32>
    %534 = vector.extract_strided_slice %533 {offsets = [0, 0], sizes = [2, 128], strides = [1, 1]} : vector<2x256xf32> to vector<2x128xf32>
    %535 = vector.extract_strided_slice %398 {offsets = [4, 0, 0], sizes = [1, 2, 256], strides = [1, 1, 1]} : vector<8x2x256xf32> to vector<1x2x256xf32>
    %536 = vector.shape_cast %535 : vector<1x2x256xf32> to vector<2x256xf32>
    %537 = vector.extract_strided_slice %536 {offsets = [0, 128], sizes = [2, 128], strides = [1, 1]} : vector<2x256xf32> to vector<2x128xf32>
    %538 = tpu.concatenate %534, %537 in 1 : vector<2x128xf32>, vector<2x128xf32> -> vector<2x256xf32>
    %539 = tpu.concatenate %514, %531 in 1 : vector<2x32xf32>, vector<2x32xf32> -> vector<2x64xf32>
    %cst_61 = arith.constant dense<0.000000e+00> : vector<2x256xf32>
    %540 = tpu.matmul %539, %392, %cst_61 {dimension_numbers = #tpu.dot_dimension_numbers<[1], [0], [0], [1], [0, 0, 1, 1], [], []>} : vector<2x64xf32>, vector<64x256xf32>, vector<2x256xf32> -> vector<2x256xf32>
    %541 = arith.addf %538, %540 : vector<2x256xf32>
    %542 = vector.extract_strided_slice %541 {offsets = [0, 0], sizes = [2, 128], strides = [1, 1]} : vector<2x256xf32> to vector<2x128xf32>
    %543 = vector.extract_strided_slice %542 {offsets = [0, 0], sizes = [2, 96], strides = [1, 1]} : vector<2x128xf32> to vector<2x96xf32>
    %544 = arith.negf %543 : vector<2x96xf32>
    %545 = math.exp %544 : vector<2x96xf32>
    %cst_62 = arith.constant 1.000000e+00 : f32
    %546 = vector.broadcast %cst_62 : f32 to vector<2x96xf32>
    %547 = arith.addf %546, %545 : vector<2x96xf32>
    %548 = arith.divf %546, %547 : vector<2x96xf32>
    %549 = vector.extract_strided_slice %548 {offsets = [0, 0], sizes = [2, 32], strides = [1, 1]} : vector<2x96xf32> to vector<2x32xf32>
    %550 = vector.extract_strided_slice %548 {offsets = [0, 32], sizes = [2, 32], strides = [1, 1]} : vector<2x96xf32> to vector<2x32xf32>
    %551 = vector.extract_strided_slice %548 {offsets = [0, 64], sizes = [2, 32], strides = [1, 1]} : vector<2x96xf32> to vector<2x32xf32>
    %552 = vector.extract_strided_slice %542 {offsets = [0, 96], sizes = [2, 32], strides = [1, 1]} : vector<2x128xf32> to vector<2x32xf32>
    %553 = math.tanh %552 : vector<2x32xf32>
    %554 = arith.mulf %550, %512 : vector<2x32xf32>
    %555 = arith.mulf %549, %553 : vector<2x32xf32>
    %556 = arith.addf %554, %555 : vector<2x32xf32>
    %557 = math.tanh %556 : vector<2x32xf32>
    %558 = arith.mulf %551, %557 : vector<2x32xf32>
    %559 = vector.extract_strided_slice %541 {offsets = [0, 128], sizes = [2, 128], strides = [1, 1]} : vector<2x256xf32> to vector<2x128xf32>
    %560 = vector.extract_strided_slice %559 {offsets = [0, 0], sizes = [2, 96], strides = [1, 1]} : vector<2x128xf32> to vector<2x96xf32>
    %561 = arith.negf %560 : vector<2x96xf32>
    %562 = math.exp %561 : vector<2x96xf32>
    %cst_63 = arith.constant 1.000000e+00 : f32
    %563 = vector.broadcast %cst_63 : f32 to vector<2x96xf32>
    %564 = arith.addf %563, %562 : vector<2x96xf32>
    %565 = arith.divf %563, %564 : vector<2x96xf32>
    %566 = vector.extract_strided_slice %565 {offsets = [0, 0], sizes = [2, 32], strides = [1, 1]} : vector<2x96xf32> to vector<2x32xf32>
    %567 = vector.extract_strided_slice %565 {offsets = [0, 32], sizes = [2, 32], strides = [1, 1]} : vector<2x96xf32> to vector<2x32xf32>
    %568 = vector.extract_strided_slice %565 {offsets = [0, 64], sizes = [2, 32], strides = [1, 1]} : vector<2x96xf32> to vector<2x32xf32>
    %569 = vector.extract_strided_slice %559 {offsets = [0, 96], sizes = [2, 32], strides = [1, 1]} : vector<2x128xf32> to vector<2x32xf32>
    %570 = math.tanh %569 : vector<2x32xf32>
    %571 = arith.mulf %567, %529 : vector<2x32xf32>
    %572 = arith.mulf %566, %570 : vector<2x32xf32>
    %573 = arith.addf %571, %572 : vector<2x32xf32>
    %574 = math.tanh %573 : vector<2x32xf32>
    %575 = arith.mulf %568, %574 : vector<2x32xf32>
    %576 = vector.extract_strided_slice %398 {offsets = [4, 0, 0], sizes = [1, 2, 256], strides = [1, 1, 1]} : vector<8x2x256xf32> to vector<1x2x256xf32>
    %577 = vector.shape_cast %576 : vector<1x2x256xf32> to vector<2x256xf32>
    %578 = vector.extract_strided_slice %577 {offsets = [0, 0], sizes = [2, 128], strides = [1, 1]} : vector<2x256xf32> to vector<2x128xf32>
    %579 = vector.extract_strided_slice %398 {offsets = [3, 0, 0], sizes = [1, 2, 256], strides = [1, 1, 1]} : vector<8x2x256xf32> to vector<1x2x256xf32>
    %580 = vector.shape_cast %579 : vector<1x2x256xf32> to vector<2x256xf32>
    %581 = vector.extract_strided_slice %580 {offsets = [0, 128], sizes = [2, 128], strides = [1, 1]} : vector<2x256xf32> to vector<2x128xf32>
    %582 = tpu.concatenate %578, %581 in 1 : vector<2x128xf32>, vector<2x128xf32> -> vector<2x256xf32>
    %583 = tpu.concatenate %558, %575 in 1 : vector<2x32xf32>, vector<2x32xf32> -> vector<2x64xf32>
    %cst_64 = arith.constant dense<0.000000e+00> : vector<2x256xf32>
    %584 = tpu.matmul %583, %392, %cst_64 {dimension_numbers = #tpu.dot_dimension_numbers<[1], [0], [0], [1], [0, 0, 1, 1], [], []>} : vector<2x64xf32>, vector<64x256xf32>, vector<2x256xf32> -> vector<2x256xf32>
    %585 = arith.addf %582, %584 : vector<2x256xf32>
    %586 = vector.extract_strided_slice %585 {offsets = [0, 0], sizes = [2, 128], strides = [1, 1]} : vector<2x256xf32> to vector<2x128xf32>
    %587 = vector.extract_strided_slice %586 {offsets = [0, 0], sizes = [2, 96], strides = [1, 1]} : vector<2x128xf32> to vector<2x96xf32>
    %588 = arith.negf %587 : vector<2x96xf32>
    %589 = math.exp %588 : vector<2x96xf32>
    %cst_65 = arith.constant 1.000000e+00 : f32
    %590 = vector.broadcast %cst_65 : f32 to vector<2x96xf32>
    %591 = arith.addf %590, %589 : vector<2x96xf32>
    %592 = arith.divf %590, %591 : vector<2x96xf32>
    %593 = vector.extract_strided_slice %592 {offsets = [0, 0], sizes = [2, 32], strides = [1, 1]} : vector<2x96xf32> to vector<2x32xf32>
    %594 = vector.extract_strided_slice %592 {offsets = [0, 32], sizes = [2, 32], strides = [1, 1]} : vector<2x96xf32> to vector<2x32xf32>
    %595 = vector.extract_strided_slice %592 {offsets = [0, 64], sizes = [2, 32], strides = [1, 1]} : vector<2x96xf32> to vector<2x32xf32>
    %596 = vector.extract_strided_slice %586 {offsets = [0, 96], sizes = [2, 32], strides = [1, 1]} : vector<2x128xf32> to vector<2x32xf32>
    %597 = math.tanh %596 : vector<2x32xf32>
    %598 = arith.mulf %594, %556 : vector<2x32xf32>
    %599 = arith.mulf %593, %597 : vector<2x32xf32>
    %600 = arith.addf %598, %599 : vector<2x32xf32>
    %601 = math.tanh %600 : vector<2x32xf32>
    %602 = arith.mulf %595, %601 : vector<2x32xf32>
    %603 = vector.extract_strided_slice %585 {offsets = [0, 128], sizes = [2, 128], strides = [1, 1]} : vector<2x256xf32> to vector<2x128xf32>
    %604 = vector.extract_strided_slice %603 {offsets = [0, 0], sizes = [2, 96], strides = [1, 1]} : vector<2x128xf32> to vector<2x96xf32>
    %605 = arith.negf %604 : vector<2x96xf32>
    %606 = math.exp %605 : vector<2x96xf32>
    %cst_66 = arith.constant 1.000000e+00 : f32
    %607 = vector.broadcast %cst_66 : f32 to vector<2x96xf32>
    %608 = arith.addf %607, %606 : vector<2x96xf32>
    %609 = arith.divf %607, %608 : vector<2x96xf32>
    %610 = vector.extract_strided_slice %609 {offsets = [0, 0], sizes = [2, 32], strides = [1, 1]} : vector<2x96xf32> to vector<2x32xf32>
    %611 = vector.extract_strided_slice %609 {offsets = [0, 32], sizes = [2, 32], strides = [1, 1]} : vector<2x96xf32> to vector<2x32xf32>
    %612 = vector.extract_strided_slice %609 {offsets = [0, 64], sizes = [2, 32], strides = [1, 1]} : vector<2x96xf32> to vector<2x32xf32>
    %613 = vector.extract_strided_slice %603 {offsets = [0, 96], sizes = [2, 32], strides = [1, 1]} : vector<2x128xf32> to vector<2x32xf32>
    %614 = math.tanh %613 : vector<2x32xf32>
    %615 = arith.mulf %611, %573 : vector<2x32xf32>
    %616 = arith.mulf %610, %614 : vector<2x32xf32>
    %617 = arith.addf %615, %616 : vector<2x32xf32>
    %618 = math.tanh %617 : vector<2x32xf32>
    %619 = arith.mulf %612, %618 : vector<2x32xf32>
    %620 = vector.extract_strided_slice %398 {offsets = [5, 0, 0], sizes = [1, 2, 256], strides = [1, 1, 1]} : vector<8x2x256xf32> to vector<1x2x256xf32>
    %621 = vector.shape_cast %620 : vector<1x2x256xf32> to vector<2x256xf32>
    %622 = vector.extract_strided_slice %621 {offsets = [0, 0], sizes = [2, 128], strides = [1, 1]} : vector<2x256xf32> to vector<2x128xf32>
    %623 = vector.extract_strided_slice %398 {offsets = [2, 0, 0], sizes = [1, 2, 256], strides = [1, 1, 1]} : vector<8x2x256xf32> to vector<1x2x256xf32>
    %624 = vector.shape_cast %623 : vector<1x2x256xf32> to vector<2x256xf32>
    %625 = vector.extract_strided_slice %624 {offsets = [0, 128], sizes = [2, 128], strides = [1, 1]} : vector<2x256xf32> to vector<2x128xf32>
    %626 = tpu.concatenate %622, %625 in 1 : vector<2x128xf32>, vector<2x128xf32> -> vector<2x256xf32>
    %627 = tpu.concatenate %602, %619 in 1 : vector<2x32xf32>, vector<2x32xf32> -> vector<2x64xf32>
    %cst_67 = arith.constant dense<0.000000e+00> : vector<2x256xf32>
    %628 = tpu.matmul %627, %392, %cst_67 {dimension_numbers = #tpu.dot_dimension_numbers<[1], [0], [0], [1], [0, 0, 1, 1], [], []>} : vector<2x64xf32>, vector<64x256xf32>, vector<2x256xf32> -> vector<2x256xf32>
    %629 = arith.addf %626, %628 : vector<2x256xf32>
    %630 = vector.extract_strided_slice %629 {offsets = [0, 0], sizes = [2, 128], strides = [1, 1]} : vector<2x256xf32> to vector<2x128xf32>
    %631 = vector.extract_strided_slice %630 {offsets = [0, 0], sizes = [2, 96], strides = [1, 1]} : vector<2x128xf32> to vector<2x96xf32>
    %632 = arith.negf %631 : vector<2x96xf32>
    %633 = math.exp %632 : vector<2x96xf32>
    %cst_68 = arith.constant 1.000000e+00 : f32
    %634 = vector.broadcast %cst_68 : f32 to vector<2x96xf32>
    %635 = arith.addf %634, %633 : vector<2x96xf32>
    %636 = arith.divf %634, %635 : vector<2x96xf32>
    %637 = vector.extract_strided_slice %636 {offsets = [0, 0], sizes = [2, 32], strides = [1, 1]} : vector<2x96xf32> to vector<2x32xf32>
    %638 = vector.extract_strided_slice %636 {offsets = [0, 32], sizes = [2, 32], strides = [1, 1]} : vector<2x96xf32> to vector<2x32xf32>
    %639 = vector.extract_strided_slice %636 {offsets = [0, 64], sizes = [2, 32], strides = [1, 1]} : vector<2x96xf32> to vector<2x32xf32>
    %640 = vector.extract_strided_slice %630 {offsets = [0, 96], sizes = [2, 32], strides = [1, 1]} : vector<2x128xf32> to vector<2x32xf32>
    %641 = math.tanh %640 : vector<2x32xf32>
    %642 = arith.mulf %638, %600 : vector<2x32xf32>
    %643 = arith.mulf %637, %641 : vector<2x32xf32>
    %644 = arith.addf %642, %643 : vector<2x32xf32>
    %645 = math.tanh %644 : vector<2x32xf32>
    %646 = arith.mulf %639, %645 : vector<2x32xf32>
    %647 = vector.extract_strided_slice %629 {offsets = [0, 128], sizes = [2, 128], strides = [1, 1]} : vector<2x256xf32> to vector<2x128xf32>
    %648 = vector.extract_strided_slice %647 {offsets = [0, 0], sizes = [2, 96], strides = [1, 1]} : vector<2x128xf32> to vector<2x96xf32>
    %649 = arith.negf %648 : vector<2x96xf32>
    %650 = math.exp %649 : vector<2x96xf32>
    %cst_69 = arith.constant 1.000000e+00 : f32
    %651 = vector.broadcast %cst_69 : f32 to vector<2x96xf32>
    %652 = arith.addf %651, %650 : vector<2x96xf32>
    %653 = arith.divf %651, %652 : vector<2x96xf32>
    %654 = vector.extract_strided_slice %653 {offsets = [0, 0], sizes = [2, 32], strides = [1, 1]} : vector<2x96xf32> to vector<2x32xf32>
    %655 = vector.extract_strided_slice %653 {offsets = [0, 32], sizes = [2, 32], strides = [1, 1]} : vector<2x96xf32> to vector<2x32xf32>
    %656 = vector.extract_strided_slice %653 {offsets = [0, 64], sizes = [2, 32], strides = [1, 1]} : vector<2x96xf32> to vector<2x32xf32>
    %657 = vector.extract_strided_slice %647 {offsets = [0, 96], sizes = [2, 32], strides = [1, 1]} : vector<2x128xf32> to vector<2x32xf32>
    %658 = math.tanh %657 : vector<2x32xf32>
    %659 = arith.mulf %655, %617 : vector<2x32xf32>
    %660 = arith.mulf %654, %658 : vector<2x32xf32>
    %661 = arith.addf %659, %660 : vector<2x32xf32>
    %662 = math.tanh %661 : vector<2x32xf32>
    %663 = arith.mulf %656, %662 : vector<2x32xf32>
    %664 = vector.extract_strided_slice %398 {offsets = [6, 0, 0], sizes = [1, 2, 256], strides = [1, 1, 1]} : vector<8x2x256xf32> to vector<1x2x256xf32>
    %665 = vector.shape_cast %664 : vector<1x2x256xf32> to vector<2x256xf32>
    %666 = vector.extract_strided_slice %665 {offsets = [0, 0], sizes = [2, 128], strides = [1, 1]} : vector<2x256xf32> to vector<2x128xf32>
    %667 = vector.extract_strided_slice %398 {offsets = [1, 0, 0], sizes = [1, 2, 256], strides = [1, 1, 1]} : vector<8x2x256xf32> to vector<1x2x256xf32>
    %668 = vector.shape_cast %667 : vector<1x2x256xf32> to vector<2x256xf32>
    %669 = vector.extract_strided_slice %668 {offsets = [0, 128], sizes = [2, 128], strides = [1, 1]} : vector<2x256xf32> to vector<2x128xf32>
    %670 = tpu.concatenate %666, %669 in 1 : vector<2x128xf32>, vector<2x128xf32> -> vector<2x256xf32>
    %671 = tpu.concatenate %646, %663 in 1 : vector<2x32xf32>, vector<2x32xf32> -> vector<2x64xf32>
    %cst_70 = arith.constant dense<0.000000e+00> : vector<2x256xf32>
    %672 = tpu.matmul %671, %392, %cst_70 {dimension_numbers = #tpu.dot_dimension_numbers<[1], [0], [0], [1], [0, 0, 1, 1], [], []>} : vector<2x64xf32>, vector<64x256xf32>, vector<2x256xf32> -> vector<2x256xf32>
    %673 = arith.addf %670, %672 : vector<2x256xf32>
    %674 = vector.extract_strided_slice %673 {offsets = [0, 0], sizes = [2, 128], strides = [1, 1]} : vector<2x256xf32> to vector<2x128xf32>
    %675 = vector.extract_strided_slice %674 {offsets = [0, 0], sizes = [2, 96], strides = [1, 1]} : vector<2x128xf32> to vector<2x96xf32>
    %676 = arith.negf %675 : vector<2x96xf32>
    %677 = math.exp %676 : vector<2x96xf32>
    %cst_71 = arith.constant 1.000000e+00 : f32
    %678 = vector.broadcast %cst_71 : f32 to vector<2x96xf32>
    %679 = arith.addf %678, %677 : vector<2x96xf32>
    %680 = arith.divf %678, %679 : vector<2x96xf32>
    %681 = vector.extract_strided_slice %680 {offsets = [0, 0], sizes = [2, 32], strides = [1, 1]} : vector<2x96xf32> to vector<2x32xf32>
    %682 = vector.extract_strided_slice %680 {offsets = [0, 32], sizes = [2, 32], strides = [1, 1]} : vector<2x96xf32> to vector<2x32xf32>
    %683 = vector.extract_strided_slice %680 {offsets = [0, 64], sizes = [2, 32], strides = [1, 1]} : vector<2x96xf32> to vector<2x32xf32>
    %684 = vector.extract_strided_slice %674 {offsets = [0, 96], sizes = [2, 32], strides = [1, 1]} : vector<2x128xf32> to vector<2x32xf32>
    %685 = math.tanh %684 : vector<2x32xf32>
    %686 = arith.mulf %682, %644 : vector<2x32xf32>
    %687 = arith.mulf %681, %685 : vector<2x32xf32>
    %688 = arith.addf %686, %687 : vector<2x32xf32>
    %689 = math.tanh %688 : vector<2x32xf32>
    %690 = arith.mulf %683, %689 : vector<2x32xf32>
    %691 = vector.extract_strided_slice %673 {offsets = [0, 128], sizes = [2, 128], strides = [1, 1]} : vector<2x256xf32> to vector<2x128xf32>
    %692 = vector.extract_strided_slice %691 {offsets = [0, 0], sizes = [2, 96], strides = [1, 1]} : vector<2x128xf32> to vector<2x96xf32>
    %693 = arith.negf %692 : vector<2x96xf32>
    %694 = math.exp %693 : vector<2x96xf32>
    %cst_72 = arith.constant 1.000000e+00 : f32
    %695 = vector.broadcast %cst_72 : f32 to vector<2x96xf32>
    %696 = arith.addf %695, %694 : vector<2x96xf32>
    %697 = arith.divf %695, %696 : vector<2x96xf32>
    %698 = vector.extract_strided_slice %697 {offsets = [0, 0], sizes = [2, 32], strides = [1, 1]} : vector<2x96xf32> to vector<2x32xf32>
    %699 = vector.extract_strided_slice %697 {offsets = [0, 32], sizes = [2, 32], strides = [1, 1]} : vector<2x96xf32> to vector<2x32xf32>
    %700 = vector.extract_strided_slice %697 {offsets = [0, 64], sizes = [2, 32], strides = [1, 1]} : vector<2x96xf32> to vector<2x32xf32>
    %701 = vector.extract_strided_slice %691 {offsets = [0, 96], sizes = [2, 32], strides = [1, 1]} : vector<2x128xf32> to vector<2x32xf32>
    %702 = math.tanh %701 : vector<2x32xf32>
    %703 = arith.mulf %699, %661 : vector<2x32xf32>
    %704 = arith.mulf %698, %702 : vector<2x32xf32>
    %705 = arith.addf %703, %704 : vector<2x32xf32>
    %706 = math.tanh %705 : vector<2x32xf32>
    %707 = arith.mulf %700, %706 : vector<2x32xf32>
    %708 = vector.extract_strided_slice %398 {offsets = [7, 0, 0], sizes = [1, 2, 256], strides = [1, 1, 1]} : vector<8x2x256xf32> to vector<1x2x256xf32>
    %709 = vector.shape_cast %708 : vector<1x2x256xf32> to vector<2x256xf32>
    %710 = vector.extract_strided_slice %709 {offsets = [0, 0], sizes = [2, 128], strides = [1, 1]} : vector<2x256xf32> to vector<2x128xf32>
    %711 = vector.extract_strided_slice %398 {offsets = [0, 0, 0], sizes = [1, 2, 256], strides = [1, 1, 1]} : vector<8x2x256xf32> to vector<1x2x256xf32>
    %712 = vector.shape_cast %711 : vector<1x2x256xf32> to vector<2x256xf32>
    %713 = vector.extract_strided_slice %712 {offsets = [0, 128], sizes = [2, 128], strides = [1, 1]} : vector<2x256xf32> to vector<2x128xf32>
    %714 = tpu.concatenate %710, %713 in 1 : vector<2x128xf32>, vector<2x128xf32> -> vector<2x256xf32>
    %715 = tpu.concatenate %690, %707 in 1 : vector<2x32xf32>, vector<2x32xf32> -> vector<2x64xf32>
    %cst_73 = arith.constant dense<0.000000e+00> : vector<2x256xf32>
    %716 = tpu.matmul %715, %392, %cst_73 {dimension_numbers = #tpu.dot_dimension_numbers<[1], [0], [0], [1], [0, 0, 1, 1], [], []>} : vector<2x64xf32>, vector<64x256xf32>, vector<2x256xf32> -> vector<2x256xf32>
    %717 = arith.addf %714, %716 : vector<2x256xf32>
    %718 = vector.extract_strided_slice %717 {offsets = [0, 0], sizes = [2, 128], strides = [1, 1]} : vector<2x256xf32> to vector<2x128xf32>
    %719 = vector.extract_strided_slice %718 {offsets = [0, 0], sizes = [2, 96], strides = [1, 1]} : vector<2x128xf32> to vector<2x96xf32>
    %720 = arith.negf %719 : vector<2x96xf32>
    %721 = math.exp %720 : vector<2x96xf32>
    %cst_74 = arith.constant 1.000000e+00 : f32
    %722 = vector.broadcast %cst_74 : f32 to vector<2x96xf32>
    %723 = arith.addf %722, %721 : vector<2x96xf32>
    %724 = arith.divf %722, %723 : vector<2x96xf32>
    %725 = vector.extract_strided_slice %724 {offsets = [0, 0], sizes = [2, 32], strides = [1, 1]} : vector<2x96xf32> to vector<2x32xf32>
    %726 = vector.extract_strided_slice %724 {offsets = [0, 32], sizes = [2, 32], strides = [1, 1]} : vector<2x96xf32> to vector<2x32xf32>
    %727 = vector.extract_strided_slice %724 {offsets = [0, 64], sizes = [2, 32], strides = [1, 1]} : vector<2x96xf32> to vector<2x32xf32>
    %728 = vector.extract_strided_slice %718 {offsets = [0, 96], sizes = [2, 32], strides = [1, 1]} : vector<2x128xf32> to vector<2x32xf32>
    %729 = math.tanh %728 : vector<2x32xf32>
    %730 = arith.mulf %726, %688 : vector<2x32xf32>
    %731 = arith.mulf %725, %729 : vector<2x32xf32>
    %732 = arith.addf %730, %731 : vector<2x32xf32>
    %733 = math.tanh %732 : vector<2x32xf32>
    %734 = arith.mulf %727, %733 : vector<2x32xf32>
    %735 = vector.extract_strided_slice %717 {offsets = [0, 128], sizes = [2, 128], strides = [1, 1]} : vector<2x256xf32> to vector<2x128xf32>
    %736 = vector.extract_strided_slice %735 {offsets = [0, 0], sizes = [2, 96], strides = [1, 1]} : vector<2x128xf32> to vector<2x96xf32>
    %737 = arith.negf %736 : vector<2x96xf32>
    %738 = math.exp %737 : vector<2x96xf32>
    %cst_75 = arith.constant 1.000000e+00 : f32
    %739 = vector.broadcast %cst_75 : f32 to vector<2x96xf32>
    %740 = arith.addf %739, %738 : vector<2x96xf32>
    %741 = arith.divf %739, %740 : vector<2x96xf32>
    %742 = vector.extract_strided_slice %741 {offsets = [0, 0], sizes = [2, 32], strides = [1, 1]} : vector<2x96xf32> to vector<2x32xf32>
    %743 = vector.extract_strided_slice %741 {offsets = [0, 32], sizes = [2, 32], strides = [1, 1]} : vector<2x96xf32> to vector<2x32xf32>
    %744 = vector.extract_strided_slice %741 {offsets = [0, 64], sizes = [2, 32], strides = [1, 1]} : vector<2x96xf32> to vector<2x32xf32>
    %745 = vector.extract_strided_slice %735 {offsets = [0, 96], sizes = [2, 32], strides = [1, 1]} : vector<2x128xf32> to vector<2x32xf32>
    %746 = math.tanh %745 : vector<2x32xf32>
    %747 = arith.mulf %743, %705 : vector<2x32xf32>
    %748 = arith.mulf %742, %746 : vector<2x32xf32>
    %749 = arith.addf %747, %748 : vector<2x32xf32>
    %750 = math.tanh %749 : vector<2x32xf32>
    %751 = arith.mulf %744, %750 : vector<2x32xf32>
    %c2 = arith.constant 2 : index
    %c0_76 = arith.constant 0 : index
    %c0_77 = arith.constant 0 : index
    %752 = vector.load %arg10[%c2, %c0_76, %c0_77] : memref<4x2x32xf32, #tpu.memory_space<vmem>>, vector<1x2x32xf32>
    %753 = vector.shape_cast %752 : vector<1x2x32xf32> to vector<2x32xf32>
    %754 = vector.shape_cast %734 : vector<2x32xf32> to vector<1x2x32xf32>
    tpu.vector_store %arg10[%c2, %c0_76, %c0_77], %754 {strides = array<i32>} : memref<4x2x32xf32, #tpu.memory_space<vmem>>, vector<1x2x32xf32>,
    %c3 = arith.constant 3 : index
    %c0_78 = arith.constant 0 : index
    %c0_79 = arith.constant 0 : index
    %755 = vector.load %arg10[%c3, %c0_78, %c0_79] : memref<4x2x32xf32, #tpu.memory_space<vmem>>, vector<1x2x32xf32>
    %756 = vector.shape_cast %755 : vector<1x2x32xf32> to vector<2x32xf32>
    %757 = vector.shape_cast %751 : vector<2x32xf32> to vector<1x2x32xf32>
    tpu.vector_store %arg10[%c3, %c0_78, %c0_79], %757 {strides = array<i32>} : memref<4x2x32xf32, #tpu.memory_space<vmem>>, vector<1x2x32xf32>,
    %c2_80 = arith.constant 2 : index
    %c0_81 = arith.constant 0 : index
    %c0_82 = arith.constant 0 : index
    %758 = vector.load %arg11[%c2_80, %c0_81, %c0_82] : memref<4x2x32xf32, #tpu.memory_space<vmem>>, vector<1x2x32xf32>
    %759 = vector.shape_cast %758 : vector<1x2x32xf32> to vector<2x32xf32>
    %760 = vector.shape_cast %732 : vector<2x32xf32> to vector<1x2x32xf32>
    tpu.vector_store %arg11[%c2_80, %c0_81, %c0_82], %760 {strides = array<i32>} : memref<4x2x32xf32, #tpu.memory_space<vmem>>, vector<1x2x32xf32>,
    %c3_83 = arith.constant 3 : index
    %c0_84 = arith.constant 0 : index
    %c0_85 = arith.constant 0 : index
    %761 = vector.load %arg11[%c3_83, %c0_84, %c0_85] : memref<4x2x32xf32, #tpu.memory_space<vmem>>, vector<1x2x32xf32>
    %762 = vector.shape_cast %761 : vector<1x2x32xf32> to vector<2x32xf32>
    %763 = vector.shape_cast %749 : vector<2x32xf32> to vector<1x2x32xf32>
    tpu.vector_store %arg11[%c3_83, %c0_84, %c0_85], %763 {strides = array<i32>} : memref<4x2x32xf32, #tpu.memory_space<vmem>>, vector<1x2x32xf32>,
    %764 = tpu.concatenate %734, %443 in 1 : vector<2x32xf32>, vector<2x32xf32> -> vector<2x64xf32>
    %c0_86 = arith.constant 0 : index
    %c0_87 = arith.constant 0 : index
    %765 = vector.load %arg7[%c0_86, %c0_87] : memref<64x4xf32, #tpu.memory_space<vmem>>, vector<64x4xf32>
    %cst_88 = arith.constant dense<0.000000e+00> : vector<2x4xf32>
    %766 = tpu.matmul %764, %765, %cst_88 {dimension_numbers = #tpu.dot_dimension_numbers<[1], [0], [0], [1], [0, 0, 1, 1], [], []>} : vector<2x64xf32>, vector<64x4xf32>, vector<2x4xf32> -> vector<2x4xf32>
    %c0_89 = arith.constant 0 : index
    %c0_90 = arith.constant 0 : index
    %767 = vector.load %arg8[%c0_89, %c0_90] : memref<1x4xf32, #tpu.memory_space<vmem>>, vector<1x4xf32>
    %768 = vector.broadcast %767 : vector<1x4xf32> to vector<2x4xf32>
    %769 = arith.addf %766, %768 : vector<2x4xf32>
    %c0_91 = arith.constant 0 : index
    %c0_92 = arith.constant 0 : index
    %770 = vector.load %arg9[%c0_91, %c0_92] : memref<2x4xf32, #tpu.memory_space<vmem>>, vector<2x4xf32>
    tpu.vector_store %arg9[%c0_91, %c0_92], %769 {strides = array<i32>} : memref<2x4xf32, #tpu.memory_space<vmem>>, vector<2x4xf32>,
    return
  }
}

</mosaic_0001>

<bundles_post_ra>
// kernel: forward.1
= control target key start
LH: loop header
LB: loop body
LE: loop exit
PB: predicated region body
PF: predicated region fallthrough
CT: control target
= control target key end

     0   :  { %17 = vsyncpa [#allocation3], 0  ;;  %s4659_s0 = inlined_call_operand.vmem [shape: f32[8,2,32], index: 0, kind: input, shape index: {}]   ;;  %s4660_s1 = inlined_call_operand.hbm [shape: f32[32,256], index: 1, kind: input, shape index: {}]   ;;  %s4661_s2 = inlined_call_operand.vmem [shape: f32[64,256], index: 2, kind: input, shape index: {}]   ;;  %s4662_s3 = inlined_call_operand.vmem [shape: f32[1,256], index: 3, kind: input, shape index: {}]   ;;  %s4663_s4 = inlined_call_operand.vmem [shape: f32[64,256], index: 4, kind: input, shape index: {}]   ;;  %s4664_s5 = inlined_call_operand.vmem [shape: f32[64,256], index: 5, kind: input, shape index: {}]   ;;  %s4665_s6 = inlined_call_operand.vmem [shape: f32[1,256], index: 6, kind: input, shape index: {}]   ;;  %s4666_s7 = inlined_call_operand.vmem [shape: f32[64,4], index: 7, kind: input, shape index: {}]   ;;  %s4667_s8 = inlined_call_operand.hbm [shape: f32[1,4], index: 8, kind: input, shape index: {}]   ;;  %s4668_s9 = inlined_call_operand.hbm [shape: f32[2,4], index: 9, kind: output, shape index: {0}]   ;;  %s4669_s10 = inlined_call_operand.hbm [shape: f32[4,2,32], index: 10, kind: output, shape index: {1}]   ;;  %s4670_s11 = inlined_call_operand.hbm [shape: f32[4,2,32], index: 11, kind: output, shape index: {2}]  }
   0x1   :  { %18 = vsyncpa [#allocation6], 0 }
   0x2   :  { %19 = vsyncpa [#allocation4], 0 }
   0x3   :  { %20 = vsyncpa [#allocation9], 0  ;;  %s3703_s17 = smov [#allocation2]   ;;  %s3585_s21 = scalar_lea.hbm %s4660_s1, 1024 }
   0x4   :  { %s28_s18 = sshll.u32 %s3703_s17, 4  ;;  %p3586_p0 = scmp.ne.s32.totalorder %s4660_s1, %s3585_s21  ;;  %s29_s18 = int_to_ptr.vmem [resolvable:$true] %s28_s18 }
   0x5   :  { %p3589_p1 = scmp.lt.u32.totalorder %s3585_s21, %s4660_s1 }
   0x7   :  { %p3591_p2 = pnand %p3589_p1, %p3586_p0 }
   0x9   :  { %3594 = shalt.err (!%p3591_p2)
}
   0xa   :  { %s3595_s26 = scalar_lea.vmem %s29_s18, 1024  ;;  %p3600_p4 = scmp.lt.s32.totalorder %s29_s18, %s29_s18 }
   0xb   :  { %p3596_p3 = scmp.ne.s32.totalorder %s29_s18, %s3595_s26  ;;  %p3601_p5 = scmp.lt.s32.totalorder %s3595_s26, %s3595_s26 }
   0xd   :  { %p3602_p6 = por %p3601_p5, %p3600_p4 }
   0xf   :  { %p3603_p7 = pnand %p3602_p6, %p3596_p3 }
  0x11   :  { %3606 = shalt.err (!%p3603_p7)
}
  0x12   :  { %s3704_s27 = smov 256   ;;  %s3705_s28 = smov 16  }
  0x13   :  { %34 = dma.hbm_to_vmem [thread:$0]  %s4660_s1, 1024, %s29_s18, [#allocation3], %s3704_s27, %s3704_s27, %s3705_s28  }
  0x14   :  { %s3706_s12 = smov [#allocation5]   ;;  %s3607_s16 = scalar_lea.hbm %s4667_s8, 16 }
  0x15   :  { %s53_s13 = sshll.u32 %s3706_s12, 4  ;;  %p3608_p8 = scmp.ne.s32.totalorder %s4667_s8, %s3607_s16  ;;  %s54_s13 = int_to_ptr.vmem [resolvable:$true] %s53_s13 }
  0x16   :  { %p3611_p9 = scmp.lt.u32.totalorder %s3607_s16, %s4667_s8 }
  0x18   :  { %p3613_p10 = pnand %p3611_p9, %p3608_p8 }
  0x1a   :  { %3616 = shalt.err (!%p3613_p10)
}
  0x1b   :  { %s3617_s22 = scalar_lea.vmem %s54_s13, 16  ;;  %s3621_s1 = scalar_lea.vmem %s54_s13, 32 }
  0x1c   :  { %p3618_p11 = scmp.ne.s32.totalorder %s54_s13, %s3617_s22  ;;  %p3622_p12 = scmp.lt.s32.totalorder %s54_s13, %s54_s13 }
  0x1d   :  { %p3623_p13 = scmp.lt.s32.totalorder %s3621_s1, %s3617_s22 }
  0x1f   :  { %p3624_p0 = por %p3623_p13, %p3622_p12 }
  0x21   :  { %p3625_p1 = pnand %p3624_p0, %p3618_p11 }
  0x23   :  { %3628 = shalt.err (!%p3625_p1)
}
  0x24   :  { %56 = dma.hbm_to_vmem [thread:$0]  %s4667_s8, 16, %s54_s13, [#allocation6]  }
  0x25   :  { %3695 = dma.done.wait [#allocation3], 1024  }
  0x26   :  { %3696 = vsyncadd [#allocation3], 4294966272 }
  0x27   :  { %3697 = dma.done.wait [#allocation6], 16  }
  0x28   :  { %3698 = vsyncadd [#allocation6], 4294967280  ;;  %v3707_v0 = vmov 0.0   ;;  %v97_v1 = vlaneseq  ;;  %v3708_v2 = vmov 1983009808   ;;  %v72_v4 = vld [vmem:[#allocation2 + $0x8] sm:$0xff] }
  0x29   :  { %218 = vmatprep.mubr.f32.mxu0 %v3707_v0  ;;  %356 = vmatprep.mubr.f32.mxu1 %v3707_v0  ;;  %v118_v3 = vunpack.c.l.s4 %v3708_v2  ;;  %v74_v5 = vld [vmem:[#allocation2 + $0x18] sm:$0xff]  ;;  %v80_v6 = vld [vmem:[%s4661_s2 + $0x8] sm:$0xff]  ;;  %v71_v11 = vld [vmem:[#allocation2] sm:$0xff]  ;;  %vm149_vm0 = vcmask 261120   ;;  %s3710_s29 = smov 64   ;;  %s3711_s30 = smov 96  }
  0x2a   :  { %v3807_v7 = vshrl.u32 %v97_v1, 7  ;;  %v3022_v9 = vpack.c.bf16 %v74_v5, %v72_v4  ;;  %v82_v10 = vld [vmem:[%s4661_s2 + $0x18] sm:$0xff]  ;;  %v73_v12 = vld [vmem:[#allocation2 + $0x10] sm:$0xff]  ;;  %v79_v15 = vld [vmem:[%s4661_s2] sm:$0xff]  ;;  %vm288_vm1 = vcmask 523264   ;;  %vm1411_vm2 = vcmask 254976  }
  0x2b   :  { %v119_v8 = vunpack.c.0.s8 %v118_v3  ;;  %v3812_v13 = vpack.c.bf16 %v82_v10, %v80_v6  ;;  %v3024_v14 = vpack.c.bf16 %v73_v12, %v71_v11  ;;  %v81_v16 = vld [vmem:[%s4661_s2 + $0x10] sm:$0xff]  ;;  %v76_v17 = vld [vmem:[#allocation2 + $0x28] sm:$0xff]  ;;  %v78_v19 = vld [vmem:[#allocation2 + $0x38] sm:$0xff]  ;;  %vm3713_vm3 = vmmov 0  }
  0x2c   :  { %3023 = vmatprep.subr.bf16.mxu0 %v3022_v9  ;;  %v3820_v18 = vpack.c.bf16 %v81_v16, %v79_v15  ;;  %v84_v20 = vld [vmem:[%s4661_s2 + $0x28] sm:$0xff]  ;;  %v86_v21 = vld [vmem:[%s4661_s2 + $0x38] sm:$0xff]  ;;  %v3026_v22 = vpack.c.bf16 %v78_v19, %v76_v17  ;;  %v75_v24 = vld [vmem:[#allocation2 + $0x20] sm:$0xff]  ;;  %v99_v61 = vsub.s32 0, %v3807_v7  ;;  %v103_v63 = vsub.s32 1, %v3807_v7 }
  0x2d   :  { %3031 = vmatprep.subr.bf16.mxu1 %v3812_v13  ;;  %3025 = vmatpush1.bf16.msra.mxu0 %v3024_v14  ;;  %v3829_v23 = vpack.c.bf16 %v86_v21, %v84_v20  ;;  %v77_v25 = vld [vmem:[#allocation2 + $0x30] sm:$0xff]  ;;  %v83_v26 = vld [vmem:[%s4661_s2 + $0x20] sm:$0xff]  ;;  %v3835_v27 = vsub.s32 %v119_v8, %v3807_v7  ;;  %v88_v36 = vld [vmem:[%s4661_s2 + $0x48] sm:$0xff]  ;;  %vm2893_vm4 = vcmask 25600  }
  0x2e   :  { %3033 = vmatpush1.bf16.msra.mxu1 %v3820_v18  ;;  %v3028_v28 = vpack.c.bf16 %v77_v25, %v75_v24  ;;  %v85_v29 = vld [vmem:[%s4661_s2 + $0x30] sm:$0xff]  ;;  %v63_v30 = vld [vmem:[%s4659_s0] sm:$0x3]  ;;  %v64_v31 = vld [vmem:[%s4659_s0 + $0x2] sm:$0x3]  ;;  %3027 = vmatprep.subr.bf16.mxu0 %v3026_v22 }
  0x2f   :  { %3035 = vmatprep.subr.bf16.mxu1 %v3829_v23  ;;  %v3848_v32 = vpack.c.bf16 %v85_v29, %v83_v26  ;;  %v65_v33 = vld [vmem:[%s4659_s0 + $0x4] sm:$0x3]  ;;  %v66_v34 = vld [vmem:[%s4659_s0 + $0x6] sm:$0x3]  ;;  %v115_v35 = vcombine.low %v63_v30, %v64_v31  ;;  %v90_v38 = vld [vmem:[%s4661_s2 + $0x58] sm:$0xff] }
  0x30   :  { %v116_v37 = vcombine.low %v65_v33, %v66_v34  ;;  %v87_v39 = vld [vmem:[%s4661_s2 + $0x40] sm:$0xff]  ;;  %v89_v40 = vld [vmem:[%s4661_s2 + $0x50] sm:$0xff]  ;;  %v3869_v42 = vpack.c.bf16 %v90_v38, %v88_v36  ;;  %v67_v43 = vld [vmem:[%s4659_s0 + $0x8] sm:$0x3] }
  0x31   :  { %3029 = vmatpush1.bf16.msra.mxu0 %v3028_v28  ;;  %v123_v41 = vrot.slane %v115_v35, %v3835_v27  ;;  %v68_v44 = vld [vmem:[%s4659_s0 + $0xa] sm:$0x3]  ;;  %v69_v45 = vld [vmem:[%s4659_s0 + $0xc] sm:$0x3]  ;;  %v3882_v47 = vpack.c.bf16 %v89_v40, %v87_v39  ;;  %v70_v48 = vld [vmem:[%s4659_s0 + $0xe] sm:$0x3] }
  0x32   :  { %3037 = vmatpush1.bf16.msra.mxu1 %v3848_v32  ;;  %v130_v46 = vrot.slane %v116_v37, %v3835_v27  ;;  %v132_v49 = vcombine.low %v67_v43, %v68_v44  ;;  %v92_v50 = vld [vmem:[%s4661_s2 + $0x68] sm:$0xff]  ;;  %v94_v51 = vld [vmem:[%s4661_s2 + $0x78] sm:$0xff]  ;;  %3047 = vmatprep.subr.bf16.mxu0 %v3812_v13  ;;  %v133_v52 = vcombine.low %v69_v45, %v70_v48  ;;  %v91_v54 = vld [vmem:[%s4661_s2 + $0x60] sm:$0xff] }
  0x33   :  { %3039 = vmatprep.subr.bf16.mxu1 %v3869_v42  ;;  %v3895_v53 = vpack.c.bf16 %v94_v51, %v92_v50  ;;  %v93_v55 = vld [vmem:[%s4661_s2 + $0x70] sm:$0xff]  ;;  %v95_v62 = vld [vmem:[%s4662_s3] sm:$0x3]  ;;  %s3709_s3 = smov 32  }
  0x34   :  { %v131_v56 = vcombine.low %v123_v41, %v130_v46  ;;  %v140_v57 = vrot.slane %v132_v49, %v3835_v27  ;;  %v147_v58 = vrot.slane %v133_v52, %v3835_v27  ;;  %v3907_v59 = vpack.c.bf16 %v93_v55, %v91_v54 }
  0x35   :  { %v100_v1 = vrot.slane %v95_v62, %v99_v61  ;;  %v104_v2 = vrot.slane %v95_v62, %v103_v63 }
  0x36   :  { %2942 = vmatmul.mubr.msk.f32.vlgmr.msra.gmra.mrb[0].mxu0 %vm149_vm0, %v131_v56  ;;  %3041 = vmatpush1.bf16.msra.mxu1 %v3882_v47  ;;  %v148_v60 = vcombine.low %v140_v57, %v147_v58 }
  0x37   :  { %224 = vmatprep.mubr.f32.mxu0 %v3707_v0  ;;  %3043 = vmatprep.subr.bf16.mxu1 %v3895_v53 }
  0x38   :  { %3049 = vmatpush1.bf16.msra.mxu0 %v3820_v18 }
  0x39   :  { %3051 = vmatprep.subr.bf16.mxu0 %v3829_v23 }
  0x3a   :  { %2943 = vmatmul.mubr.msk.f32.gmra.mrb[2].mxu0 %vm149_vm0, %v148_v60  ;;  %3045 = vmatpush1.bf16.msra.mxu1 %v3907_v59 }
  0x3b   :  { %498 = vmatprep.mubr.f32.mxu0 %v3707_v0  ;;  %3063 = vmatprep.subr.bf16.mxu1 %v3812_v13 }
  0x3c   :  { %3053 = vmatpush1.bf16.msra.mxu0 %v3848_v32 }
  0x3d   :  { %357 = vmatmul.mubr.f32.vlgmr.msra.gmra.mrb[0].mxu1 %v3707_v0  ;;  %3055 = vmatprep.subr.bf16.mxu0 %v3869_v42 }
  0x3e   :  { %3065 = vmatpush1.bf16.msra.mxu1 %v3820_v18  ;;  %640 = vmatprep.mubr.f32.mxu1 %v3707_v0 }
  0x3f   :  { %3067 = vmatprep.subr.bf16.mxu1 %v3829_v23 }
  0x40   :  { %3057 = vmatpush1.bf16.msra.mxu0 %v3882_v47 }
  0x41   :  { %3059 = vmatprep.subr.bf16.mxu0 %v3895_v53 }
  0x42   :  { %3069 = vmatpush1.bf16.msra.mxu1 %v3848_v32 }
  0x43   :  { %3071 = vmatprep.subr.bf16.mxu1 %v3869_v42 }
  0x44   :  { %3061 = vmatpush1.bf16.msra.mxu0 %v3907_v59 }
  0x45   :  { %3079 = vmatprep.subr.bf16.mxu0 %v3812_v13 }
  0x46   :  { %3073 = vmatpush1.bf16.msra.mxu1 %v3882_v47 }
  0x47   :  { %3075 = vmatprep.subr.bf16.mxu1 %v3895_v53 }
  0x4a   :  { %3077 = vmatpush1.bf16.msra.mxu1 %v3907_v59 }
  0x4b   :  { %3095 = vmatprep.subr.bf16.mxu1 %v3812_v13 }
 0x109   :  { %v220_v3 = vpop.f32.mrb[0].mxu0 }
 0x10a   :  { %v3942_v4 = vadd.f32 %v220_v3, %v100_v1  ;;  %v222_v5 = vpop.f32.mrb[1].mxu0 }
 0x10b   :  { %v3944_v6 = vadd.f32 %v222_v5, %v104_v2 }
 0x10d   :  { %v235_v8 = vcombine.low %v3942_v4, %v3944_v6  ;;  %v236_v9 = vcombine.high %v3942_v4, %v3944_v6  ;;  %v226_v10 = vpop.f32.mrb[2].mxu0 }
 0x10e   :  { %v3950_v11 = vadd.f32 %v226_v10, %v100_v1  ;;  %v228_v12 = vpop.f32.mrb[3].mxu0 }
 0x10f   :  { %v3953_v14 = vrot.slane %v235_v8, %v3835_v27  ;;  %v3955_v15 = vadd.f32 %v228_v12, %v104_v2 }
 0x110   :  { %v358_v16 = vpop.f32.mrb[0].mxu1 }
 0x111   :  { %v253_v17 = vcombine.low %v3950_v11, %v3955_v15  ;;  %v254_v19 = vcombine.high %v3950_v11, %v3955_v15  ;;  %v363_v20 = vadd.f32 %v358_v16, %v3953_v14  ;;  %v360_v21 = vpop.f32.mrb[1].mxu1  ;;  %v4003_v3 = vcombine.high %v3953_v14, %v3953_v14 }
 0x113   :  { %v3963_v22 = vrot.slane %v254_v19, %v3835_v27  ;;  %3329 = vtanh.f32 %v363_v20  ;;  %v2944_v31 = vmul.f32 -1.442695, %v363_v20 }
 0x115   :  { %v3967_v24 = vcombine.high %v3963_v22, %v3963_v22  ;;  %v419_v2 = vrot.slane %v3963_v22, %v3835_v27 }
 0x117   :  { %v285_v25 = vrot.slane %v3967_v24, %v3835_v27  ;;  %v420_v8 = vcombine.high %v419_v2, %v419_v2 }
 0x119   :  { %v286_v26 = vcombine.high %v285_v25, %v285_v25 }
 0x11b   :  { %v364_v28 = vadd.f32 %v360_v21, %v286_v26 }
 0x11d   :  { %v3330_v29 = vpop.eup %3329  ;;  %3331 = vtanh.f32 %v364_v28  ;;  %v2945_v33 = vmul.f32 -1.442695, %v364_v28 }
 0x11e   :  { %374 = vrot.lane.b32.xlu0 %v3330_v29, %s3709_s3  ;;  %3333 = vpow2.f32 %v2944_v31 }
 0x11f   :  { %3335 = vpow2.f32 %v2945_v33 }
 0x127   :  { %v3332_v30 = vpop.eup %3331 }
 0x128   :  { %398 = vrot.lane.b32.xlu0 %v3332_v30, %s3709_s3  ;;  %v3334_v34 = vpop.eup %3333 }
 0x129   :  { %v368_v35 = vadd.f32 1.0, %v3334_v34  ;;  %v3336_v36 = vpop.eup %3335 }
 0x12a   :  { %v392_v37 = vadd.f32 1.0, %v3336_v36 }
 0x12b   :  { %3337 = vrcp.f32 %v368_v35 }
 0x12c   :  { %3339 = vrcp.f32 %v392_v37 }
 0x135   :  { %v3338_v38 = vpop.eup %3337 }
 0x136   :  { %v3340_v41 = vpop.eup %3339  ;;  %v372_v45 = vmul.f32 0.0, %v3338_v38 }
 0x137   :  { %v396_v49 = vmul.f32 0.0, %v3340_v41 }
 0x190   :  { %v375_v39 = vpop.permute.xlu0 %374 }
 0x191   :  { %v377_v40 = vmul.f32 %v3338_v38, %v375_v39 }
 0x193   :  { %379 = vrot.lane.b32.xlu1 %v377_v40, %s3709_s3 }
 0x19a   :  { %v399_v43 = vpop.permute.xlu0 %398 }
 0x19b   :  { %v401_v44 = vmul.f32 %v3340_v41, %v399_v43 }
 0x19d   :  { %403 = vrot.lane.b32.xlu1 %v401_v44, %s3709_s3 }
 0x205   :  { %v380_v46 = vpop.permute.xlu1 %379 }
 0x206   :  { %v3975_v48 = vadd.f32 %v380_v46, %v372_v45 }
 0x208   :  { %3341 = vtanh.f32 %v3975_v48 }
 0x20f   :  { %v404_v50 = vpop.permute.xlu1 %403 }
 0x210   :  { %v406_v51 = vadd.f32 %v404_v50, %v396_v49 }
 0x212   :  { %v3342_v52 = vpop.eup %3341  ;;  %3343 = vtanh.f32 %v406_v51 }
 0x213   :  { %385 = vrot.lane.b32.xlu0 %v3342_v52, %s3709_s3 }
 0x21c   :  { %v3344_v54 = vpop.eup %3343 }
 0x21d   :  { %409 = vrot.lane.b32.xlu1 %v3344_v54, %s3709_s3 }
 0x285   :  { %v386_v55 = vpop.permute.xlu0 %385 }
 0x286   :  { %v388_v56 = vmul.f32 %v3338_v38, %v386_v55 }
 0x288   :  { %423 = vrot.lane.b32.xlu0 %v388_v56, %s3710_s29  ;;  %v4036_v56 = vrot.slane %v253_v17, %v3835_v27 }
 0x28f   :  { %v410_v57 = vpop.permute.xlu1 %409 }
 0x290   :  { %v412_v58 = vmul.f32 %v3340_v41, %v410_v57  ;;  %v4040_v57 = vcombine.high %v4036_v56, %v4036_v56 }
 0x292   :  { %427 = vrot.lane.b32.xlu1 %v412_v58, %s3711_s30  ;;  %v561_v58 = vrot.slane %v4040_v57, %v3835_v27 }
 0x2fa   :  { %v3982_v60 = vpop.permute.xlu0 %423 }
 0x304   :  { %v3984_v62 = vpop.permute.xlu1 %427 }
 0x305   :  { %v430_v1 = vsel %vm149_vm0, %v3982_v60, %v3984_v62 }
 0x306   :  { %2946 = vmatmul.mubr.msk.f32.vlgmr.msra.gmra.mrb[4].mxu0 %vm288_vm1, %v430_v1  ;;  %v4048_v1 = vrot.slane %v236_v9, %v3835_v27 }
 0x307   :  { %3081 = vmatpush1.bf16.msra.mxu0 %v3820_v18  ;;  %782 = vmatprep.mubr.f32.mxu0 %v3707_v0 }
 0x308   :  { %3083 = vmatprep.subr.bf16.mxu0 %v3829_v23 }
 0x30b   :  { %3085 = vmatpush1.bf16.msra.mxu0 %v3848_v32 }
 0x30c   :  { %3087 = vmatprep.subr.bf16.mxu0 %v3869_v42 }
 0x30f   :  { %3089 = vmatpush1.bf16.msra.mxu0 %v3882_v47 }
 0x310   :  { %3091 = vmatprep.subr.bf16.mxu0 %v3895_v53 }
 0x313   :  { %3093 = vmatpush1.bf16.msra.mxu0 %v3907_v59 }
 0x314   :  { %3111 = vmatprep.subr.bf16.mxu0 %v3812_v13 }
 0x3d9   :  { %v500_v5 = vpop.f32.mrb[4].mxu0 }
 0x3da   :  { %v505_v10 = vadd.f32 %v500_v5, %v4003_v3  ;;  %v502_v12 = vpop.f32.mrb[5].mxu0  ;;  %v562_v5 = vcombine.high %v561_v58, %v561_v58 }
 0x3db   :  { %v506_v16 = vadd.f32 %v502_v12, %v420_v8 }
 0x3dc   :  { %3345 = vtanh.f32 %v505_v10  ;;  %v2947_v21 = vmul.f32 -1.442695, %v505_v10 }
 0x3dd   :  { %3347 = vtanh.f32 %v506_v16  ;;  %v2948_v25 = vmul.f32 -1.442695, %v506_v16 }
 0x3de   :  { %3349 = vpow2.f32 %v2947_v21 }
 0x3df   :  { %3351 = vpow2.f32 %v2948_v25 }
 0x3e6   :  { %v3346_v19 = vpop.eup %3345 }
 0x3e7   :  { %v3348_v20 = vpop.eup %3347  ;;  %516 = vrot.lane.b32.xlu0 %v3346_v19, %s3709_s3 }
 0x3e8   :  { %540 = vrot.lane.b32.xlu1 %v3348_v20, %s3709_s3  ;;  %v3350_v26 = vpop.eup %3349 }
 0x3e9   :  { %v3352_v28 = vpop.eup %3351  ;;  %v510_v29 = vadd.f32 1.0, %v3350_v26 }
 0x3ea   :  { %v534_v30 = vadd.f32 1.0, %v3352_v28 }
 0x3eb   :  { %3353 = vrcp.f32 %v510_v29 }
 0x3ec   :  { %3355 = vrcp.f32 %v534_v30 }
 0x3f5   :  { %v3354_v31 = vpop.eup %3353 }
 0x3f6   :  { %v3356_v34 = vpop.eup %3355  ;;  %v514_v38 = vmul.f32 %v3354_v31, %v3975_v48 }
 0x3f7   :  { %v538_v40 = vmul.f32 %v3356_v34, %v406_v51 }
 0x459   :  { %v517_v33 = vpop.permute.xlu0 %516 }
 0x45a   :  { %v519_v35 = vmul.f32 %v3354_v31, %v517_v33  ;;  %v541_v36 = vpop.permute.xlu1 %540 }
 0x45b   :  { %v543_v37 = vmul.f32 %v3356_v34, %v541_v36 }
 0x45c   :  { %521 = vrot.lane.b32.xlu0 %v519_v35, %s3709_s3 }
 0x45d   :  { %545 = vrot.lane.b32.xlu1 %v543_v37, %s3709_s3 }
 0x4ce   :  { %v522_v39 = vpop.permute.xlu0 %521 }
 0x4cf   :  { %v524_v41 = vadd.f32 %v522_v39, %v514_v38  ;;  %v546_v43 = vpop.permute.xlu1 %545 }
 0x4d0   :  { %v548_v44 = vadd.f32 %v546_v43, %v538_v40 }
 0x4d1   :  { %3357 = vtanh.f32 %v524_v41 }
 0x4d2   :  { %3359 = vtanh.f32 %v548_v44 }
 0x4db   :  { %v3358_v45 = vpop.eup %3357 }
 0x4dc   :  { %v3360_v46 = vpop.eup %3359  ;;  %527 = vrot.lane.b32.xlu0 %v3358_v45, %s3709_s3 }
 0x4dd   :  { %551 = vrot.lane.b32.xlu1 %v3360_v46, %s3709_s3 }
 0x54e   :  { %v528_v49 = vpop.permute.xlu0 %527 }
 0x54f   :  { %v530_v50 = vmul.f32 %v3354_v31, %v528_v49  ;;  %v552_v52 = vpop.permute.xlu1 %551  ;;  %v703_v49 = vrot.slane %v4036_v56, %v3835_v27 }
 0x550   :  { %v554_v54 = vmul.f32 %v3356_v34, %v552_v52 }
 0x551   :  { %565 = vrot.lane.b32.xlu0 %v530_v50, %s3710_s29  ;;  %v252_v50 = vcombine.high %v4048_v1, %v4048_v1 }
 0x552   :  { %569 = vrot.lane.b32.xlu1 %v554_v54, %s3711_s30  ;;  %v704_v54 = vcombine.high %v703_v49, %v703_v49 }
 0x5c3   :  { %v4015_v48 = vpop.permute.xlu0 %565 }
 0x5c4   :  { %v4017_v51 = vpop.permute.xlu1 %569 }
 0x5c5   :  { %v572_v55 = vsel %vm149_vm0, %v4015_v48, %v4017_v51 }
 0x5c6   :  { %2949 = vmatmul.mubr.msk.f32.vlgmr.msra.gmra.mrb[2].mxu1 %vm288_vm1, %v572_v55 }
 0x5c7   :  { %3097 = vmatpush1.bf16.msra.mxu1 %v3820_v18  ;;  %924 = vmatprep.mubr.f32.mxu1 %v3707_v0 }
 0x5c8   :  { %3099 = vmatprep.subr.bf16.mxu1 %v3829_v23 }
 0x5cb   :  { %3101 = vmatpush1.bf16.msra.mxu1 %v3848_v32 }
 0x5cc   :  { %3103 = vmatprep.subr.bf16.mxu1 %v3869_v42 }
 0x5cf   :  { %3105 = vmatpush1.bf16.msra.mxu1 %v3882_v47 }
 0x5d0   :  { %3107 = vmatprep.subr.bf16.mxu1 %v3895_v53 }
 0x5d3   :  { %3109 = vmatpush1.bf16.msra.mxu1 %v3907_v59 }
 0x5d4   :  { %3127 = vmatprep.subr.bf16.mxu1 %v3812_v13 }
 0x699   :  { %v642_v2 = vpop.f32.mrb[2].mxu1 }
 0x69a   :  { %v647_v8 = vadd.f32 %v642_v2, %v4048_v1  ;;  %v644_v11 = vpop.f32.mrb[3].mxu1 }
 0x69b   :  { %v648_v15 = vadd.f32 %v644_v11, %v562_v5 }
 0x69c   :  { %3361 = vtanh.f32 %v647_v8  ;;  %v2950_v12 = vmul.f32 -1.442695, %v647_v8 }
 0x69d   :  { %3363 = vtanh.f32 %v648_v15  ;;  %v2951_v16 = vmul.f32 -1.442695, %v648_v15 }
 0x69e   :  { %3365 = vpow2.f32 %v2950_v12 }
 0x69f   :  { %3367 = vpow2.f32 %v2951_v16 }
 0x6a6   :  { %v3362_v17 = vpop.eup %3361 }
 0x6a7   :  { %v3364_v10 = vpop.eup %3363  ;;  %658 = vrot.lane.b32.xlu0 %v3362_v17, %s3709_s3 }
 0x6a8   :  { %682 = vrot.lane.b32.xlu1 %v3364_v10, %s3709_s3  ;;  %v3366_v4 = vpop.eup %3365 }
 0x6a9   :  { %v3368_v6 = vpop.eup %3367  ;;  %v652_v9 = vadd.f32 1.0, %v3366_v4 }
 0x6aa   :  { %v676_v19 = vadd.f32 1.0, %v3368_v6 }
 0x6ab   :  { %3369 = vrcp.f32 %v652_v9 }
 0x6ac   :  { %3371 = vrcp.f32 %v676_v19 }
 0x6b5   :  { %v3370_v20 = vpop.eup %3369 }
 0x6b6   :  { %v3372_v25 = vpop.eup %3371  ;;  %v656_v30 = vmul.f32 %v3370_v20, %v524_v41 }
 0x6b7   :  { %v680_v33 = vmul.f32 %v3372_v25, %v548_v44 }
 0x719   :  { %v659_v21 = vpop.permute.xlu0 %658 }
 0x71a   :  { %v661_v26 = vmul.f32 %v3370_v20, %v659_v21  ;;  %v683_v28 = vpop.permute.xlu1 %682 }
 0x71b   :  { %v685_v29 = vmul.f32 %v3372_v25, %v683_v28 }
 0x71c   :  { %663 = vrot.lane.b32.xlu0 %v661_v26, %s3709_s3 }
 0x71d   :  { %687 = vrot.lane.b32.xlu1 %v685_v29, %s3709_s3 }
 0x78e   :  { %v664_v31 = vpop.permute.xlu0 %663 }
 0x78f   :  { %v666_v34 = vadd.f32 %v664_v31, %v656_v30  ;;  %v688_v35 = vpop.permute.xlu1 %687 }
 0x790   :  { %v690_v36 = vadd.f32 %v688_v35, %v680_v33 }
 0x791   :  { %3373 = vtanh.f32 %v666_v34 }
 0x792   :  { %3375 = vtanh.f32 %v690_v36 }
 0x79b   :  { %v3374_v37 = vpop.eup %3373 }
 0x79c   :  { %v3376_v38 = vpop.eup %3375  ;;  %669 = vrot.lane.b32.xlu0 %v3374_v37, %s3709_s3 }
 0x79d   :  { %693 = vrot.lane.b32.xlu1 %v3376_v38, %s3709_s3 }
 0x80e   :  { %v670_v39 = vpop.permute.xlu0 %669 }
 0x80f   :  { %v672_v40 = vmul.f32 %v3370_v20, %v670_v39  ;;  %v694_v43 = vpop.permute.xlu1 %693 }
 0x810   :  { %v696_v45 = vmul.f32 %v3372_v25, %v694_v43  ;;  %v845_v43 = vrot.slane %v252_v50, %v3835_v27 }
 0x811   :  { %707 = vrot.lane.b32.xlu0 %v672_v40, %s3710_s29 }
 0x812   :  { %711 = vrot.lane.b32.xlu1 %v696_v45, %s3711_s30 }
 0x883   :  { %v4059_v41 = vpop.permute.xlu0 %707 }
 0x884   :  { %v4061_v44 = vpop.permute.xlu1 %711 }
 0x885   :  { %v714_v46 = vsel %vm149_vm0, %v4059_v41, %v4061_v44 }
 0x886   :  { %2952 = vmatmul.mubr.msk.f32.vlgmr.msra.gmra.mrb[6].mxu0 %vm288_vm1, %v714_v46  ;;  %v846_v46 = vcombine.high %v845_v43, %v845_v43 }
 0x887   :  { %3113 = vmatpush1.bf16.msra.mxu0 %v3820_v18  ;;  %1066 = vmatprep.mubr.f32.mxu0 %v3707_v0 }
 0x888   :  { %3115 = vmatprep.subr.bf16.mxu0 %v3829_v23 }
 0x88b   :  { %3117 = vmatpush1.bf16.msra.mxu0 %v3848_v32 }
 0x88c   :  { %3119 = vmatprep.subr.bf16.mxu0 %v3869_v42 }
 0x88f   :  { %3121 = vmatpush1.bf16.msra.mxu0 %v3882_v47 }
 0x890   :  { %3123 = vmatprep.subr.bf16.mxu0 %v3895_v53 }
 0x893   :  { %3125 = vmatpush1.bf16.msra.mxu0 %v3907_v59 }
 0x894   :  { %3143 = vmatprep.subr.bf16.mxu0 %v3812_v13 }
 0x959   :  { %v784_v52 = vpop.f32.mrb[6].mxu0 }
 0x95a   :  { %v789_v55 = vadd.f32 %v784_v52, %v252_v50  ;;  %v786_v58 = vpop.f32.mrb[7].mxu0 }
 0x95b   :  { %v790_v2 = vadd.f32 %v786_v58, %v704_v54 }
 0x95c   :  { %3377 = vtanh.f32 %v789_v55  ;;  %v2953_v13 = vmul.f32 -1.442695, %v789_v55 }
 0x95d   :  { %3379 = vtanh.f32 %v790_v2  ;;  %v2954_v11 = vmul.f32 -1.442695, %v790_v2 }
 0x95e   :  { %3381 = vpow2.f32 %v2953_v13 }
 0x95f   :  { %3383 = vpow2.f32 %v2954_v11 }
 0x966   :  { %v3378_v5 = vpop.eup %3377 }
 0x967   :  { %v3380_v8 = vpop.eup %3379  ;;  %800 = vrot.lane.b32.xlu0 %v3378_v5, %s3709_s3 }
 0x968   :  { %824 = vrot.lane.b32.xlu1 %v3380_v8, %s3709_s3  ;;  %v3382_v15 = vpop.eup %3381 }
 0x969   :  { %v3384_v17 = vpop.eup %3383  ;;  %v794_v10 = vadd.f32 1.0, %v3382_v15 }
 0x96a   :  { %v818_v12 = vadd.f32 1.0, %v3384_v17 }
 0x96b   :  { %3385 = vrcp.f32 %v794_v10 }
 0x96c   :  { %3387 = vrcp.f32 %v818_v12 }
 0x975   :  { %v3386_v16 = vpop.eup %3385 }
 0x976   :  { %v3388_v6 = vpop.eup %3387  ;;  %v798_v21 = vmul.f32 %v3386_v16, %v666_v34 }
 0x977   :  { %v822_v26 = vmul.f32 %v3388_v6, %v690_v36 }
 0x9d9   :  { %v801_v4 = vpop.permute.xlu0 %800 }
 0x9da   :  { %v803_v9 = vmul.f32 %v3386_v16, %v801_v4  ;;  %v825_v19 = vpop.permute.xlu1 %824 }
 0x9db   :  { %v827_v20 = vmul.f32 %v3388_v6, %v825_v19 }
 0x9dc   :  { %805 = vrot.lane.b32.xlu0 %v803_v9, %s3709_s3 }
 0x9dd   :  { %829 = vrot.lane.b32.xlu1 %v827_v20, %s3709_s3 }
 0xa4e   :  { %v806_v25 = vpop.permute.xlu0 %805 }
 0xa4f   :  { %v808_v28 = vadd.f32 %v806_v25, %v798_v21  ;;  %v830_v29 = vpop.permute.xlu1 %829 }
 0xa50   :  { %v832_v30 = vadd.f32 %v830_v29, %v822_v26 }
 0xa51   :  { %3389 = vtanh.f32 %v808_v28 }
 0xa52   :  { %3391 = vtanh.f32 %v832_v30 }
 0xa5b   :  { %v3390_v31 = vpop.eup %3389 }
 0xa5c   :  { %v3392_v33 = vpop.eup %3391  ;;  %811 = vrot.lane.b32.xlu0 %v3390_v31, %s3709_s3 }
 0xa5d   :  { %835 = vrot.lane.b32.xlu1 %v3392_v33, %s3709_s3 }
 0xace   :  { %v812_v35 = vpop.permute.xlu0 %811 }
 0xacf   :  { %v814_v37 = vmul.f32 %v3386_v16, %v812_v35  ;;  %v836_v38 = vpop.permute.xlu1 %835 }
 0xad0   :  { %v838_v39 = vmul.f32 %v3388_v6, %v836_v38  ;;  %v987_v38 = vrot.slane %v4048_v1, %v3835_v27 }
 0xad1   :  { %849 = vrot.lane.b32.xlu0 %v814_v37, %s3710_s29 }
 0xad2   :  { %853 = vrot.lane.b32.xlu1 %v838_v39, %s3711_s30 }
 0xb43   :  { %v4088_v34 = vpop.permute.xlu0 %849 }
 0xb44   :  { %v4090_v36 = vpop.permute.xlu1 %853 }
 0xb45   :  { %v856_v40 = vsel %vm149_vm0, %v4088_v34, %v4090_v36 }
 0xb46   :  { %2955 = vmatmul.mubr.msk.f32.vlgmr.msra.gmra.mrb[4].mxu1 %vm288_vm1, %v856_v40  ;;  %v988_v40 = vcombine.high %v987_v38, %v987_v38 }
 0xb47   :  { %3129 = vmatpush1.bf16.msra.mxu1 %v3820_v18  ;;  %1208 = vmatprep.mubr.f32.mxu1 %v3707_v0 }
 0xb48   :  { %3131 = vmatprep.subr.bf16.mxu1 %v3829_v23 }
 0xb4b   :  { %3133 = vmatpush1.bf16.msra.mxu1 %v3848_v32 }
 0xb4c   :  { %3135 = vmatprep.subr.bf16.mxu1 %v3869_v42 }
 0xb4f   :  { %3137 = vmatpush1.bf16.msra.mxu1 %v3882_v47 }
 0xb50   :  { %3139 = vmatprep.subr.bf16.mxu1 %v3895_v53 }
 0xb53   :  { %3141 = vmatpush1.bf16.msra.mxu1 %v3907_v59 }
 0xc19   :  { %v926_v45 = vpop.f32.mrb[4].mxu1 }
 0xc1a   :  { %v931_v49 = vadd.f32 %v926_v45, %v4036_v56  ;;  %v928_v52 = vpop.f32.mrb[5].mxu1 }
 0xc1b   :  { %v932_v54 = vadd.f32 %v928_v52, %v846_v46 }
 0xc1c   :  { %3393 = vtanh.f32 %v931_v49  ;;  %v2956_v2 = vmul.f32 -1.442695, %v931_v49 }
 0xc1d   :  { %3395 = vtanh.f32 %v932_v54  ;;  %v2957_v5 = vmul.f32 -1.442695, %v932_v54 }
 0xc1e   :  { %3397 = vpow2.f32 %v2956_v2 }
 0xc1f   :  { %3399 = vpow2.f32 %v2957_v5 }
 0xc26   :  { %v3394_v55 = vpop.eup %3393 }
 0xc27   :  { %v3396_v58 = vpop.eup %3395  ;;  %942 = vrot.lane.b32.xlu0 %v3394_v55, %s3709_s3 }
 0xc28   :  { %966 = vrot.lane.b32.xlu1 %v3396_v58, %s3709_s3  ;;  %v3398_v8 = vpop.eup %3397 }
 0xc29   :  { %v3400_v50 = vpop.eup %3399  ;;  %v936_v13 = vadd.f32 1.0, %v3398_v8 }
 0xc2a   :  { %v960_v11 = vadd.f32 1.0, %v3400_v50 }
 0xc2b   :  { %3401 = vrcp.f32 %v936_v13 }
 0xc2c   :  { %3403 = vrcp.f32 %v960_v11 }
 0xc35   :  { %v3402_v56 = vpop.eup %3401 }
 0xc36   :  { %v3404_v17 = vpop.eup %3403  ;;  %v940_v4 = vmul.f32 %v3402_v56, %v808_v28 }
 0xc37   :  { %v964_v9 = vmul.f32 %v3404_v17, %v832_v30 }
 0xc99   :  { %v943_v15 = vpop.permute.xlu0 %942 }
 0xc9a   :  { %v945_v10 = vmul.f32 %v3402_v56, %v943_v15  ;;  %v967_v12 = vpop.permute.xlu1 %966 }
 0xc9b   :  { %v969_v16 = vmul.f32 %v3404_v17, %v967_v12 }
 0xc9c   :  { %947 = vrot.lane.b32.xlu0 %v945_v10, %s3709_s3 }
 0xc9d   :  { %971 = vrot.lane.b32.xlu1 %v969_v16, %s3709_s3 }
 0xd0e   :  { %v948_v6 = vpop.permute.xlu0 %947 }
 0xd0f   :  { %v950_v19 = vadd.f32 %v948_v6, %v940_v4  ;;  %v972_v20 = vpop.permute.xlu1 %971 }
 0xd10   :  { %v974_v21 = vadd.f32 %v972_v20, %v964_v9 }
 0xd11   :  { %3405 = vtanh.f32 %v950_v19 }
 0xd12   :  { %3407 = vtanh.f32 %v974_v21 }
 0xd1b   :  { %v3406_v25 = vpop.eup %3405 }
 0xd1c   :  { %v3408_v26 = vpop.eup %3407  ;;  %953 = vrot.lane.b32.xlu0 %v3406_v25, %s3709_s3 }
 0xd1d   :  { %977 = vrot.lane.b32.xlu1 %v3408_v26, %s3709_s3 }
 0xd8e   :  { %v954_v29 = vpop.permute.xlu0 %953 }
 0xd8f   :  { %v956_v31 = vmul.f32 %v3402_v56, %v954_v29  ;;  %v978_v33 = vpop.permute.xlu1 %977 }
 0xd90   :  { %v980_v35 = vmul.f32 %v3404_v17, %v978_v33 }
 0xd91   :  { %991 = vrot.lane.b32.xlu0 %v956_v31, %s3710_s29 }
 0xd92   :  { %995 = vrot.lane.b32.xlu1 %v980_v35, %s3711_s30 }
 0xe03   :  { %v4114_v28 = vpop.permute.xlu0 %991 }
 0xe04   :  { %v4116_v30 = vpop.permute.xlu1 %995 }
 0xe05   :  { %v998_v37 = vsel %vm149_vm0, %v4114_v28, %v4116_v30 }
 0xe06   :  { %2958 = vmatmul.mubr.msk.f32.vlgmr.msra.gmra.mrb[8].mxu0 %vm288_vm1, %v998_v37 }
 0xe07   :  { %3145 = vmatpush1.bf16.msra.mxu0 %v3820_v18  ;;  %1350 = vmatprep.mubr.f32.mxu0 %v3707_v0 }
 0xe08   :  { %3147 = vmatprep.subr.bf16.mxu0 %v3829_v23 }
 0xe0b   :  { %3149 = vmatpush1.bf16.msra.mxu0 %v3848_v32 }
 0xe0c   :  { %3151 = vmatprep.subr.bf16.mxu0 %v3869_v42 }
 0xe0f   :  { %3153 = vmatpush1.bf16.msra.mxu0 %v3882_v47 }
 0xe10   :  { %3155 = vmatprep.subr.bf16.mxu0 %v3895_v53 }
 0xe13   :  { %3157 = vmatpush1.bf16.msra.mxu0 %v3907_v59 }
 0xed9   :  { %v1068_v39 = vpop.f32.mrb[8].mxu0 }
 0xeda   :  { %v1073_v18 = vadd.f32 %v1068_v39, %v4040_v57  ;;  %v1070_v43 = vpop.f32.mrb[9].mxu0 }
 0xedb   :  { %v1074_v45 = vadd.f32 %v1070_v43, %v988_v40 }
 0xedc   :  { %3409 = vtanh.f32 %v1073_v18  ;;  %v2959_v42 = vmul.f32 -1.442695, %v1073_v18 }
 0xedd   :  { %3411 = vtanh.f32 %v1074_v45  ;;  %v2960_v47 = vmul.f32 -1.442695, %v1074_v45 }
 0xede   :  { %3413 = vpow2.f32 %v2959_v42 }
 0xedf   :  { %3415 = vpow2.f32 %v2960_v47 }
 0xee6   :  { %v3410_v23 = vpop.eup %3409 }
 0xee7   :  { %v3412_v32 = vpop.eup %3411  ;;  %1084 = vrot.lane.b32.xlu0 %v3410_v23, %s3709_s3 }
 0xee8   :  { %1108 = vrot.lane.b32.xlu1 %v3412_v32, %s3709_s3  ;;  %v3414_v53 = vpop.eup %3413 }
 0xee9   :  { %v3416_v59 = vpop.eup %3415  ;;  %v1078_v1 = vadd.f32 1.0, %v3414_v53 }
 0xeea   :  { %v1102_v46 = vadd.f32 1.0, %v3416_v59 }
 0xeeb   :  { %3417 = vrcp.f32 %v1078_v1 }
 0xeec   :  { %3419 = vrcp.f32 %v1102_v46 }
 0xef5   :  { %v3418_v57 = vpop.eup %3417 }
 0xef6   :  { %v3420_v52 = vpop.eup %3419  ;;  %v1082_v2 = vmul.f32 %v3418_v57, %v950_v19  ;;  %v1129_v19 = vrot.slane %v4003_v3, %v3835_v27 }
 0xef7   :  { %v1106_v8 = vmul.f32 %v3420_v52, %v974_v21 }
 0xef8   :  { %v1130_v21 = vcombine.high %v1129_v19, %v1129_v19 }
 0xf59   :  { %v1085_v49 = vpop.permute.xlu0 %1084 }
 0xf5a   :  { %v1087_v54 = vmul.f32 %v3418_v57, %v1085_v49  ;;  %v1109_v55 = vpop.permute.xlu1 %1108 }
 0xf5b   :  { %v1111_v58 = vmul.f32 %v3420_v52, %v1109_v55 }
 0xf5c   :  { %1089 = vrot.lane.b32.xlu0 %v1087_v54, %s3709_s3 }
 0xf5d   :  { %1113 = vrot.lane.b32.xlu1 %v1111_v58, %s3709_s3 }
 0xfce   :  { %v1090_v5 = vpop.permute.xlu0 %1089 }
 0xfcf   :  { %v1092_v50 = vadd.f32 %v1090_v5, %v1082_v2  ;;  %v1114_v13 = vpop.permute.xlu1 %1113 }
 0xfd0   :  { %v1116_v11 = vadd.f32 %v1114_v13, %v1106_v8 }
 0xfd1   :  { %3421 = vtanh.f32 %v1092_v50 }
 0xfd2   :  { %3423 = vtanh.f32 %v1116_v11 }
 0xfdb   :  { %v3422_v56 = vpop.eup %3421 }
 0xfdc   :  { %v3424_v15 = vpop.eup %3423  ;;  %1095 = vrot.lane.b32.xlu0 %v3422_v56, %s3709_s3 }
 0xfdd   :  { %1119 = vrot.lane.b32.xlu1 %v3424_v15, %s3709_s3 }
0x104e   :  { %v1096_v17 = vpop.permute.xlu0 %1095 }
0x104f   :  { %v1098_v10 = vmul.f32 %v3418_v57, %v1096_v17  ;;  %v1120_v12 = vpop.permute.xlu1 %1119 }
0x1050   :  { %v1122_v16 = vmul.f32 %v3420_v52, %v1120_v12 }
0x1051   :  { %1133 = vrot.lane.b32.xlu0 %v1098_v10, %s3710_s29 }
0x1052   :  { %1137 = vrot.lane.b32.xlu1 %v1122_v16, %s3711_s30 }
0x10c3   :  { %v4141_v4 = vpop.permute.xlu0 %1133 }
0x10c4   :  { %v4143_v6 = vpop.permute.xlu1 %1137 }
0x10c5   :  { %v1140_v9 = vsel %vm149_vm0, %v4141_v4, %v4143_v6 }
0x10c6   :  { %2961 = vmatmul.mubr.msk.f32.vlgmr.msra.gmra.mrb[6].mxu1 %vm288_vm1, %v1140_v9 }
0x10c7   :  { %1595 = vmatprep.mubr.f32.mxu1 %v3707_v0 }
0x1199   :  { %v1210_v20 = vpop.f32.mrb[6].mxu1 }
0x119a   :  { %v1215_v25 = vadd.f32 %v1210_v20, %v3963_v22  ;;  %v1212_v26 = vpop.f32.mrb[7].mxu1 }
0x119b   :  { %v1216_v29 = vadd.f32 %v1212_v26, %v1130_v21 }
0x119c   :  { %3425 = vtanh.f32 %v1215_v25  ;;  %v2962_v35 = vmul.f32 -1.442695, %v1215_v25 }
0x119d   :  { %3427 = vtanh.f32 %v1216_v29  ;;  %v2963_v37 = vmul.f32 -1.442695, %v1216_v29 }
0x119e   :  { %3429 = vpow2.f32 %v2962_v35 }
0x119f   :  { %3431 = vpow2.f32 %v2963_v37 }
0x11a6   :  { %v3426_v31 = vpop.eup %3425 }
0x11a7   :  { %v3428_v33 = vpop.eup %3427  ;;  %1226 = vrot.lane.b32.xlu0 %v3426_v31, %s3709_s3 }
0x11a8   :  { %1250 = vrot.lane.b32.xlu1 %v3428_v33, %s3709_s3  ;;  %v3430_v38 = vpop.eup %3429 }
0x11a9   :  { %v3432_v3 = vpop.eup %3431  ;;  %v1220_v39 = vadd.f32 1.0, %v3430_v38 }
0x11aa   :  { %v1244_v40 = vadd.f32 1.0, %v3432_v3 }
0x11ab   :  { %3433 = vrcp.f32 %v1220_v39 }
0x11ac   :  { %3435 = vrcp.f32 %v1244_v40 }
0x11b5   :  { %v3434_v22 = vpop.eup %3433 }
0x11b6   :  { %v3436_v43 = vpop.eup %3435  ;;  %v1224_v42 = vmul.f32 %v3434_v22, %v1092_v50  ;;  %v1271_v50 = vrot.slane %v3953_v14, %v3835_v27 }
0x11b7   :  { %v1248_v53 = vmul.f32 %v3436_v43, %v1116_v11 }
0x11b8   :  { %v1272_v11 = vcombine.high %v1271_v50, %v1271_v50  ;;  %v1457_v50 = vld [vmem:[%s4664_s5] sm:$0xff] }
0x1219   :  { %v1227_v18 = vpop.permute.xlu0 %1226 }
0x121a   :  { %v1229_v45 = vmul.f32 %v3434_v22, %v1227_v18  ;;  %v1251_v23 = vpop.permute.xlu1 %1250  ;;  %v1444_v18 = vld [vmem:[%s4663_s4 + $0x18] sm:$0xff] }
0x121b   :  { %v1253_v32 = vmul.f32 %v3436_v43, %v1251_v23  ;;  %v1443_v23 = vld [vmem:[%s4663_s4 + $0x10] sm:$0xff] }
0x121c   :  { %1231 = vrot.lane.b32.xlu0 %v1229_v45, %s3709_s3 }
0x121d   :  { %1255 = vrot.lane.b32.xlu1 %v1253_v32, %s3709_s3  ;;  %v1446_v32 = vld [vmem:[%s4663_s4 + $0x28] sm:$0xff] }
0x128e   :  { %v1232_v47 = vpop.permute.xlu0 %1231 }
0x128f   :  { %v1234_v59 = vadd.f32 %v1232_v47, %v1224_v42  ;;  %v1256_v1 = vpop.permute.xlu1 %1255  ;;  %v1448_v42 = vld [vmem:[%s4663_s4 + $0x38] sm:$0xff] }
0x1290   :  { %v1258_v46 = vadd.f32 %v1256_v1, %v1248_v53  ;;  %v3162_v53 = vpack.c.bf16 %v1448_v42, %v1446_v32  ;;  %v1447_v1 = vld [vmem:[%s4663_s4 + $0x30] sm:$0xff] }
0x1291   :  { %3437 = vtanh.f32 %v1234_v59 }
0x1292   :  { %3439 = vtanh.f32 %v1258_v46 }
0x129b   :  { %v3438_v57 = vpop.eup %3437 }
0x129c   :  { %v3440_v49 = vpop.eup %3439  ;;  %1237 = vrot.lane.b32.xlu0 %v3438_v57, %s3709_s3  ;;  %v1460_v57 = vld [vmem:[%s4664_s5 + $0x18] sm:$0xff] }
0x129d   :  { %1261 = vrot.lane.b32.xlu1 %v3440_v49, %s3709_s3 }
0x130e   :  { %v1238_v52 = vpop.permute.xlu0 %1237 }
0x130f   :  { %v1240_v54 = vmul.f32 %v3434_v22, %v1238_v52  ;;  %v1262_v55 = vpop.permute.xlu1 %1261  ;;  %v1442_v22 = vld [vmem:[%s4663_s4 + $0x8] sm:$0xff] }
0x1310   :  { %v1264_v58 = vmul.f32 %v3436_v43, %v1262_v55  ;;  %v1441_v43 = vld [vmem:[%s4663_s4] sm:$0xff]  ;;  %v3158_v45 = vpack.c.bf16 %v1444_v18, %v1442_v22  ;;  %v1467_v18 = vld [vmem:[%s4664_s5 + $0x50] sm:$0xff] }
0x1311   :  { %1275 = vrot.lane.b32.xlu0 %v1240_v54, %s3710_s29  ;;  %v3160_v47 = vpack.c.bf16 %v1443_v23, %v1441_v43  ;;  %v1465_v22 = vld [vmem:[%s4664_s5 + $0x40] sm:$0xff]  ;;  %v1472_v23 = vld [vmem:[%s4664_s5 + $0x78] sm:$0xff] }
0x1312   :  { %1279 = vrot.lane.b32.xlu1 %v1264_v58, %s3711_s30  ;;  %3159 = vmatprep.subr.bf16.mxu1 %v3158_v45  ;;  %v1450_v58 = vld [vmem:[%s4663_s4 + $0x48] sm:$0xff]  ;;  %v4291_v43 = vpack.c.bf16 %v1467_v18, %v1465_v22 }
0x1313   :  { %3161 = vmatpush1.bf16.msra.mxu1 %v3160_v47  ;;  %v1470_v45 = vld [vmem:[%s4664_s5 + $0x68] sm:$0xff]  ;;  %v1469_v47 = vld [vmem:[%s4664_s5 + $0x60] sm:$0xff] }
0x1314   :  { %3163 = vmatprep.subr.bf16.mxu1 %v3162_v53  ;;  %v4302_v42 = vpack.c.bf16 %v1472_v23, %v1470_v45  ;;  %v1471_v53 = vld [vmem:[%s4664_s5 + $0x70] sm:$0xff] }
0x1383   :  { %v4161_v2 = vpop.permute.xlu0 %1275 }
0x1384   :  { %v4163_v5 = vpop.permute.xlu1 %1279 }
0x1385   :  { %v1282_v8 = vsel %vm149_vm0, %v4161_v2, %v4163_v5 }
0x1386   :  { %2964 = vmatmul.mubr.msk.f32.vlgmr.msra.gmra.mrb[10].mxu0 %vm288_vm1, %v1282_v8  ;;  %v1452_v8 = vld [vmem:[%s4663_s4 + $0x58] sm:$0xff] }
0x1387   :  { %1729 = vmatprep.mubr.f32.mxu0 %v3707_v0 }
0x1459   :  { %v1352_v13 = vpop.f32.mrb[10].mxu0 }
0x145a   :  { %v1357_v56 = vadd.f32 %v1352_v13, %v3967_v24  ;;  %v1354_v15 = vpop.f32.mrb[11].mxu0  ;;  %v3166_v13 = vpack.c.bf16 %v1452_v8, %v1450_v58  ;;  %v1438_v8 = vsel %vm149_vm0, %v4141_v4, %v4061_v44 }
0x145b   :  { %v1358_v17 = vadd.f32 %v1354_v15, %v1272_v11  ;;  %v1459_v11 = vld [vmem:[%s4664_s5 + $0x10] sm:$0xff] }
0x145c   :  { %3441 = vtanh.f32 %v1357_v56  ;;  %v2965_v16 = vmul.f32 -1.442695, %v1357_v56  ;;  %v1449_v56 = vld [vmem:[%s4663_s4 + $0x40] sm:$0xff]  ;;  %v1451_v15 = vld [vmem:[%s4663_s4 + $0x50] sm:$0xff] }
0x145d   :  { %3443 = vtanh.f32 %v1358_v17  ;;  %v2966_v9 = vmul.f32 -1.442695, %v1358_v17  ;;  %v4244_v17 = vpack.c.bf16 %v1459_v11, %v1457_v50 }
0x145e   :  { %3445 = vpow2.f32 %v2965_v16  ;;  %v1464_v16 = vld [vmem:[%s4664_s5 + $0x38] sm:$0xff] }
0x145f   :  { %3447 = vpow2.f32 %v2966_v9 }
0x1466   :  { %v3442_v10 = vpop.eup %3441 }
0x1467   :  { %v3444_v12 = vpop.eup %3443  ;;  %1368 = vrot.lane.b32.xlu1 %v3442_v10, %s3709_s3  ;;  %v3168_v10 = vpack.c.bf16 %v1451_v15, %v1449_v56 }
0x1468   :  { %1392 = vrot.lane.b32.xlu0 %v3444_v12, %s3709_s3  ;;  %v3446_v19 = vpop.eup %3445  ;;  %v1462_v12 = vld [vmem:[%s4664_s5 + $0x28] sm:$0xff] }
0x1469   :  { %v3448_v14 = vpop.eup %3447  ;;  %v1362_v20 = vadd.f32 1.0, %v3446_v19  ;;  %v4253_v9 = vpack.c.bf16 %v1464_v16, %v1462_v12  ;;  %v1454_v19 = vld [vmem:[%s4663_s4 + $0x68] sm:$0xff] }
0x146a   :  { %v1386_v21 = vadd.f32 1.0, %v3448_v14  ;;  %v1456_v14 = vld [vmem:[%s4663_s4 + $0x78] sm:$0xff] }
0x146b   :  { %3449 = vrcp.f32 %v1362_v20  ;;  %v1461_v20 = vld [vmem:[%s4664_s5 + $0x20] sm:$0xff] }
0x146c   :  { %3451 = vrcp.f32 %v1386_v21  ;;  %v3170_v21 = vpack.c.bf16 %v1456_v14, %v1454_v19 }
0x1475   :  { %v4175_v24 = vpop.eup %3449 }
0x1476   :  { %v4177_v26 = vpop.eup %3451  ;;  %v1366_v35 = vmul.f32 %v4175_v24, %v1234_v59  ;;  %v1445_v59 = vld [vmem:[%s4663_s4 + $0x20] sm:$0xff] }
0x1477   :  { %v1390_v38 = vmul.f32 %v4177_v26, %v1258_v46  ;;  %v1458_v46 = vld [vmem:[%s4664_s5 + $0x8] sm:$0xff]  ;;  %v3164_v49 = vpack.c.bf16 %v1447_v1, %v1445_v59 }
0x1478   :  { %v4221_v52 = vpack.c.bf16 %v1460_v57, %v1458_v46  ;;  %v4311_v46 = vpack.c.bf16 %v1471_v53, %v1469_v47 }
0x1479   :  { %3165 = vmatpush1.bf16.msra.mxu1 %v3164_v49 }
0x147a   :  { %3175 = vmatprep.subr.bf16.mxu0 %v4221_v52  ;;  %3167 = vmatprep.subr.bf16.mxu1 %v3166_v13 }
0x147b   :  { %3177 = vmatpush1.bf16.msra.mxu0 %v4244_v17 }
0x147c   :  { %3179 = vmatprep.subr.bf16.mxu0 %v4253_v9 }
0x147d   :  { %3169 = vmatpush1.bf16.msra.mxu1 %v3168_v10 }
0x147e   :  { %3171 = vmatprep.subr.bf16.mxu1 %v3170_v21 }
0x14d9   :  { %v1369_v25 = vpop.permute.xlu1 %1368 }
0x14da   :  { %v1371_v29 = vmul.f32 %v4175_v24, %v1369_v25  ;;  %v1393_v31 = vpop.permute.xlu0 %1392  ;;  %v1463_v25 = vld [vmem:[%s4664_s5 + $0x30] sm:$0xff] }
0x14db   :  { %v1395_v33 = vmul.f32 %v4177_v26, %v1393_v31  ;;  %v1455_v31 = vld [vmem:[%s4663_s4 + $0x70] sm:$0xff] }
0x14dc   :  { %1373 = vrot.lane.b32.xlu1 %v1371_v29, %s3709_s3  ;;  %v1453_v29 = vld [vmem:[%s4663_s4 + $0x60] sm:$0xff] }
0x14dd   :  { %1397 = vrot.lane.b32.xlu0 %v1395_v33, %s3709_s3  ;;  %v4274_v33 = vpack.c.bf16 %v1463_v25, %v1461_v20 }
0x14df   :  { %3181 = vmatpush1.bf16.msra.mxu0 %v4274_v33 }
0x154e   :  { %v1374_v37 = vpop.permute.xlu1 %1373 }
0x154f   :  { %v4185_v3 = vadd.f32 %v1374_v37, %v1366_v35  ;;  %v1398_v39 = vpop.permute.xlu0 %1397  ;;  %v3172_v35 = vpack.c.bf16 %v1455_v31, %v1453_v29  ;;  %v1466_v37 = vld [vmem:[%s4664_s5 + $0x48] sm:$0xff] }
0x1550   :  { %v4187_v40 = vadd.f32 %v1398_v39, %v1390_v38  ;;  %v1468_v38 = vld [vmem:[%s4664_s5 + $0x58] sm:$0xff] }
0x1551   :  { %3453 = vtanh.f32 %v4185_v3  ;;  %3173 = vmatpush1.bf16.msra.mxu1 %v3172_v35  ;;  %v4283_v39 = vpack.c.bf16 %v1468_v38, %v1466_v37 }
0x1552   :  { %3455 = vtanh.f32 %v4187_v40  ;;  %3191 = vmatprep.subr.bf16.mxu1 %v4221_v52 }
0x1553   :  { %3183 = vmatprep.subr.bf16.mxu0 %v4283_v39 }
0x1554   :  { %3185 = vmatpush1.bf16.msra.mxu0 %v4291_v43 }
0x1555   :  { %3187 = vmatprep.subr.bf16.mxu0 %v4302_v42 }
0x1558   :  { %3189 = vmatpush1.bf16.msra.mxu0 %v4311_v46 }
0x1559   :  { %3207 = vmatprep.subr.bf16.mxu0 %v4221_v52 }
0x155b   :  { %v3454_v54 = vpop.eup %3453  ;;  %1730 = vmatmul.mubr.f32.vlgmr.msra.gmra.mrb[12].mxu0 %v3707_v0 }
0x155c   :  { %v3456_v55 = vpop.eup %3455  ;;  %1379 = vrot.lane.b32.xlu1 %v3454_v54, %s3709_s3  ;;  %3209 = vmatpush1.bf16.msra.mxu0 %v4244_v17 }
0x155d   :  { %1403 = vrot.lane.b32.xlu0 %v3456_v55, %s3709_s3  ;;  %2013 = vmatprep.mubr.f32.mxu0 %v3707_v0 }
0x155e   :  { %3211 = vmatprep.subr.bf16.mxu0 %v4253_v9 }
0x1560   :  { %3213 = vmatpush1.bf16.msra.mxu0 %v4274_v33 }
0x1561   :  { %3215 = vmatprep.subr.bf16.mxu0 %v4283_v39 }
0x1564   :  { %3217 = vmatpush1.bf16.msra.mxu0 %v4291_v43 }
0x1565   :  { %3219 = vmatprep.subr.bf16.mxu0 %v4302_v42 }
0x1568   :  { %3221 = vmatpush1.bf16.msra.mxu0 %v4311_v46 }
0x1569   :  { %3239 = vmatprep.subr.bf16.mxu0 %v4221_v52 }
0x15ce   :  { %v1380_v32 = vpop.permute.xlu1 %1379 }
0x15cf   :  { %v1382_v59 = vmul.f32 %v4175_v24, %v1380_v32  ;;  %v1404_v1 = vpop.permute.xlu0 %1403  ;;  %v1435_v24 = vsel %vm149_vm0, %v4059_v41, %v4143_v6  ;;  %v1439_v41 = vsel %vm149_vm0, %v4161_v2, %v4017_v51 }
0x15d0   :  { %v4314_v57 = vmul.f32 %v4177_v26, %v1404_v1  ;;  %v1436_v26 = vsel %vm149_vm0, %v4088_v34, %v4116_v30  ;;  %v1434_v34 = vsel %vm149_vm0, %v4015_v48, %v4163_v5 }
0x15d1   :  { %1408 = vrot.lane.b32.xlu1 %v1382_v59, %s3710_s29  ;;  %v1494_v54 = vcombine.low %v1435_v24, %v1436_v26 }
0x15d2   :  { %1430 = vrot.lane.b32.xlu0 %v4314_v57, %s3711_s30 }
0x15d3   :  { %v1508_v44 = vrot.slane %v1494_v54, %v3835_v27 }
0x162e   :  { %v1731_v48 = vpop.f32.mrb[12].mxu0 }
0x1643   :  { %v1409_v49 = vpop.permute.xlu1 %1408 }
0x1644   :  { %1412 = vst.msk [vmem:[#allocation8] sm:$0x3] %vm1411_vm2, %v1409_v49  ;;  %v1440_v55 = vsel %vm149_vm0, %v1409_v49, %v3984_v62  ;;  %v1431_v58 = vpop.permute.xlu0 %1430  ;;  %v1437_v62 = vsel %vm149_vm0, %v4114_v28, %v4090_v36  ;;  %v1733_v36 = vpop.f32.mrb[13].mxu0  ;;  %v1473_v28 = vld [vmem:[%s4665_s6] sm:$0x3] }
0x1645   :  { %v1433_v30 = vsel %vm149_vm0, %v3982_v60, %v1431_v58  ;;  %v1511_v6 = vcombine.low %v1439_v41, %v1440_v55  ;;  %v1510_v13 = vcombine.low %v1437_v62, %v1438_v8  ;;  %v1478_v5 = vrot.slane %v1473_v28, %v99_v61 }
0x1646   :  { %v1493_v50 = vcombine.low %v1433_v30, %v1434_v34  ;;  %v1482_v56 = vrot.slane %v1473_v28, %v103_v63 }
0x1647   :  { %v1525_v51 = vrot.slane %v1511_v6, %v3835_v27  ;;  %v1518_v11 = vrot.slane %v1510_v13, %v3835_v27 }
0x1648   :  { %v1501_v4 = vrot.slane %v1493_v50, %v3835_v27 }
0x1649   :  { %v1526_v60 = vcombine.low %v1518_v11, %v1525_v51 }
0x164a   :  { %v1509_v2 = vcombine.low %v1501_v4, %v1508_v44 }
0x164c   :  { %2967 = vmatmul.mubr.msk.f32.vlgmr.msra.gmra.mrb[8].mxu1 %vm288_vm1, %v1509_v2 }
0x164d   :  { %1601 = vmatprep.mubr.f32.mxu1 %v3707_v0  ;;  %3193 = vmatpush1.bf16.msra.mxu1 %v4244_v17 }
0x164e   :  { %3195 = vmatprep.subr.bf16.mxu1 %v4253_v9 }
0x1650   :  { %2968 = vmatmul.mubr.msk.f32.gmra.mrb[10].mxu1 %vm288_vm1, %v1526_v60 }
0x1651   :  { %3197 = vmatpush1.bf16.msra.mxu1 %v4274_v33  ;;  %1871 = vmatprep.mubr.f32.mxu1 %v3707_v0 }
0x1652   :  { %3199 = vmatprep.subr.bf16.mxu1 %v4283_v39 }
0x1655   :  { %3201 = vmatpush1.bf16.msra.mxu1 %v4291_v43 }
0x1656   :  { %3203 = vmatprep.subr.bf16.mxu1 %v4302_v42 }
0x1659   :  { %3205 = vmatpush1.bf16.msra.mxu1 %v4311_v46 }
0x165a   :  { %3223 = vmatprep.subr.bf16.mxu1 %v4221_v52 }
0x171f   :  { %v1597_v15 = vpop.f32.mrb[8].mxu1 }
0x1720   :  { %v4378_v10 = vadd.f32 %v1597_v15, %v1478_v5  ;;  %v1599_v12 = vpop.f32.mrb[9].mxu1 }
0x1721   :  { %v4380_v16 = vadd.f32 %v1599_v12, %v1482_v56 }
0x1723   :  { %v1612_v19 = vcombine.low %v4378_v10, %v4380_v16  ;;  %v1613_v14 = vcombine.high %v4378_v10, %v4380_v16  ;;  %v1603_v20 = vpop.f32.mrb[10].mxu1 }
0x1724   :  { %v4386_v21 = vadd.f32 %v1603_v20, %v1478_v5  ;;  %v1605_v25 = vpop.f32.mrb[11].mxu1 }
0x1725   :  { %v4389_v61 = vrot.slane %v1612_v19, %v3835_v27  ;;  %v4391_v7 = vadd.f32 %v1605_v25, %v1482_v56 }
0x1727   :  { %v1630_v63 = vcombine.low %v4386_v21, %v4391_v7  ;;  %v1631_v29 = vcombine.high %v4386_v21, %v4391_v7  ;;  %v1736_v31 = vadd.f32 %v1731_v48, %v4389_v61  ;;  %v4433_v5 = vcombine.high %v4389_v61, %v4389_v61 }
0x1729   :  { %v4399_v35 = vrot.slane %v1631_v29, %v3835_v27  ;;  %3457 = vtanh.f32 %v1736_v31  ;;  %v2969_v32 = vmul.f32 -1.442695, %v1736_v31 }
0x172b   :  { %v4403_v37 = vcombine.high %v4399_v35, %v4399_v35  ;;  %v1792_v28 = vrot.slane %v4399_v35, %v3835_v27 }
0x172d   :  { %v1662_v38 = vrot.slane %v4403_v37, %v3835_v27  ;;  %v1793_v15 = vcombine.high %v1792_v28, %v1792_v28 }
0x172f   :  { %v1663_v22 = vcombine.high %v1662_v38, %v1662_v38 }
0x1731   :  { %v1737_v18 = vadd.f32 %v1733_v36, %v1663_v22 }
0x1733   :  { %v3458_v45 = vpop.eup %3457  ;;  %3459 = vtanh.f32 %v1737_v18  ;;  %v2970_v47 = vmul.f32 -1.442695, %v1737_v18 }
0x1734   :  { %1747 = vrot.lane.b32.xlu0 %v3458_v45, %s3709_s3  ;;  %3461 = vpow2.f32 %v2969_v32 }
0x1735   :  { %3463 = vpow2.f32 %v2970_v47 }
0x173d   :  { %v3460_v23 = vpop.eup %3459 }
0x173e   :  { %1771 = vrot.lane.b32.xlu1 %v3460_v23, %s3709_s3  ;;  %v3462_v53 = vpop.eup %3461 }
0x173f   :  { %v1741_v59 = vadd.f32 1.0, %v3462_v53  ;;  %v3464_v1 = vpop.eup %3463 }
0x1740   :  { %v1765_v24 = vadd.f32 1.0, %v3464_v1 }
0x1741   :  { %3465 = vrcp.f32 %v1741_v59 }
0x1742   :  { %3467 = vrcp.f32 %v1765_v24 }
0x174b   :  { %v3466_v26 = vpop.eup %3465 }
0x174c   :  { %v3468_v55 = vpop.eup %3467  ;;  %v1745_v41 = vmul.f32 0.0, %v3466_v26 }
0x174d   :  { %v1769_v6 = vmul.f32 0.0, %v3468_v55 }
0x17a6   :  { %v1748_v49 = vpop.permute.xlu0 %1747 }
0x17a7   :  { %v1750_v54 = vmul.f32 %v3466_v26, %v1748_v49 }
0x17a9   :  { %1752 = vrot.lane.b32.xlu0 %v1750_v54, %s3709_s3 }
0x17b0   :  { %v1772_v58 = vpop.permute.xlu1 %1771 }
0x17b1   :  { %v1774_v8 = vmul.f32 %v3468_v55, %v1772_v58 }
0x17b3   :  { %1776 = vrot.lane.b32.xlu1 %v1774_v8, %s3709_s3 }
0x181b   :  { %v1753_v34 = vpop.permute.xlu0 %1752 }
0x181c   :  { %v1755_v30 = vadd.f32 %v1753_v34, %v1745_v41 }
0x181e   :  { %3469 = vtanh.f32 %v1755_v30 }
0x1825   :  { %v1777_v50 = vpop.permute.xlu1 %1776 }
0x1826   :  { %v1779_v62 = vadd.f32 %v1777_v50, %v1769_v6 }
0x1828   :  { %v3470_v13 = vpop.eup %3469  ;;  %3471 = vtanh.f32 %v1779_v62 }
0x1829   :  { %1758 = vrot.lane.b32.xlu0 %v3470_v13, %s3709_s3 }
0x1832   :  { %v3472_v44 = vpop.eup %3471 }
0x1833   :  { %1782 = vrot.lane.b32.xlu1 %v3472_v44, %s3709_s3 }
0x189b   :  { %v1759_v4 = vpop.permute.xlu0 %1758 }
0x189c   :  { %v1761_v51 = vmul.f32 %v3466_v26, %v1759_v4 }
0x189e   :  { %1796 = vrot.lane.b32.xlu0 %v1761_v51, %s3710_s29  ;;  %v4459_v51 = vrot.slane %v1630_v63, %v3835_v27 }
0x18a5   :  { %v1783_v2 = vpop.permute.xlu1 %1782 }
0x18a6   :  { %v1785_v11 = vmul.f32 %v3468_v55, %v1783_v2  ;;  %v4463_v2 = vcombine.high %v4459_v51, %v4459_v51 }
0x18a8   :  { %1800 = vrot.lane.b32.xlu1 %v1785_v11, %s3711_s30  ;;  %v1934_v11 = vrot.slane %v4463_v2, %v3835_v27 }
0x18aa   :  { %v1935_v28 = vcombine.high %v1934_v11, %v1934_v11 }
0x1910   :  { %v1797_v60 = vpop.permute.xlu0 %1796 }
0x191a   :  { %v4415_v48 = vpop.permute.xlu1 %1800 }
0x191b   :  { %v1803_v36 = vsel %vm149_vm0, %v1797_v60, %v4415_v48  ;;  %v4471_v60 = vrot.slane %v1613_v14, %v3835_v27 }
0x191c   :  { %2971 = vmatmul.mubr.msk.f32.vlgmr.msra.gmra.mrb[12].mxu1 %vm288_vm1, %v1803_v36 }
0x191d   :  { %3225 = vmatpush1.bf16.msra.mxu1 %v4244_v17  ;;  %2155 = vmatprep.mubr.f32.mxu1 %v3707_v0 }
0x191e   :  { %3227 = vmatprep.subr.bf16.mxu1 %v4253_v9 }
0x1921   :  { %3229 = vmatpush1.bf16.msra.mxu1 %v4274_v33 }
0x1922   :  { %3231 = vmatprep.subr.bf16.mxu1 %v4283_v39 }
0x1925   :  { %3233 = vmatpush1.bf16.msra.mxu1 %v4291_v43 }
0x1926   :  { %3235 = vmatprep.subr.bf16.mxu1 %v4302_v42 }
0x1929   :  { %3237 = vmatpush1.bf16.msra.mxu1 %v4311_v46 }
0x192a   :  { %3255 = vmatprep.subr.bf16.mxu1 %v4221_v52 }
0x19ef   :  { %v1873_v56 = vpop.f32.mrb[12].mxu1 }
0x19f0   :  { %v1878_v12 = vadd.f32 %v1873_v56, %v4433_v5  ;;  %v1875_v19 = vpop.f32.mrb[13].mxu1 }
0x19f1   :  { %v1879_v20 = vadd.f32 %v1875_v19, %v1793_v15 }
0x19f2   :  { %3473 = vtanh.f32 %v1878_v12  ;;  %v2972_v31 = vmul.f32 -1.442695, %v1878_v12 }
0x19f3   :  { %3475 = vtanh.f32 %v1879_v20  ;;  %v2973_v38 = vmul.f32 -1.442695, %v1879_v20 }
0x19f4   :  { %3477 = vpow2.f32 %v2972_v31 }
0x19f5   :  { %3479 = vpow2.f32 %v2973_v38 }
0x19fc   :  { %v3474_v25 = vpop.eup %3473 }
0x19fd   :  { %v3476_v29 = vpop.eup %3475  ;;  %1889 = vrot.lane.b32.xlu0 %v3474_v25, %s3709_s3 }
0x19fe   :  { %1913 = vrot.lane.b32.xlu1 %v3476_v29, %s3709_s3  ;;  %v3478_v22 = vpop.eup %3477 }
0x19ff   :  { %v3480_v18 = vpop.eup %3479  ;;  %v1883_v45 = vadd.f32 1.0, %v3478_v22 }
0x1a00   :  { %v1907_v23 = vadd.f32 1.0, %v3480_v18 }
0x1a01   :  { %3481 = vrcp.f32 %v1883_v45 }
0x1a02   :  { %3483 = vrcp.f32 %v1907_v23 }
0x1a0b   :  { %v3482_v32 = vpop.eup %3481 }
0x1a0c   :  { %v3484_v53 = vpop.eup %3483  ;;  %v1887_v26 = vmul.f32 %v3482_v32, %v1755_v30 }
0x1a0d   :  { %v1911_v54 = vmul.f32 %v3484_v53, %v1779_v62 }
0x1a6f   :  { %v1890_v47 = vpop.permute.xlu0 %1889 }
0x1a70   :  { %v1892_v59 = vmul.f32 %v3482_v32, %v1890_v47  ;;  %v1914_v1 = vpop.permute.xlu1 %1913 }
0x1a71   :  { %v1916_v24 = vmul.f32 %v3484_v53, %v1914_v1 }
0x1a72   :  { %1894 = vrot.lane.b32.xlu0 %v1892_v59, %s3709_s3 }
0x1a73   :  { %1918 = vrot.lane.b32.xlu1 %v1916_v24, %s3709_s3 }
0x1ae4   :  { %v1895_v49 = vpop.permute.xlu0 %1894 }
0x1ae5   :  { %v1897_v55 = vadd.f32 %v1895_v49, %v1887_v26  ;;  %v1919_v58 = vpop.permute.xlu1 %1918 }
0x1ae6   :  { %v1921_v8 = vadd.f32 %v1919_v58, %v1911_v54 }
0x1ae7   :  { %3485 = vtanh.f32 %v1897_v55 }
0x1ae8   :  { %3487 = vtanh.f32 %v1921_v8 }
0x1af1   :  { %v3486_v41 = vpop.eup %3485 }
0x1af2   :  { %v3488_v34 = vpop.eup %3487  ;;  %1900 = vrot.lane.b32.xlu0 %v3486_v41, %s3709_s3 }
0x1af3   :  { %1924 = vrot.lane.b32.xlu1 %v3488_v34, %s3709_s3  ;;  %v2076_v34 = vrot.slane %v4459_v51, %v3835_v27 }
0x1b64   :  { %v1901_v6 = vpop.permute.xlu0 %1900 }
0x1b65   :  { %v1903_v50 = vmul.f32 %v3482_v32, %v1901_v6  ;;  %v1925_v13 = vpop.permute.xlu1 %1924  ;;  %v1629_v6 = vcombine.high %v4471_v60, %v4471_v60 }
0x1b66   :  { %v1927_v44 = vmul.f32 %v3484_v53, %v1925_v13  ;;  %v2077_v13 = vcombine.high %v2076_v34, %v2076_v34 }
0x1b67   :  { %1938 = vrot.lane.b32.xlu0 %v1903_v50, %s3710_s29 }
0x1b68   :  { %1942 = vrot.lane.b32.xlu1 %v1927_v44, %s3711_s30 }
0x1bd9   :  { %v1939_v30 = vpop.permute.xlu0 %1938 }
0x1bda   :  { %v1943_v62 = vpop.permute.xlu1 %1942 }
0x1bdb   :  { %v1945_v4 = vsel %vm149_vm0, %v1939_v30, %v1943_v62 }
0x1bdc   :  { %2974 = vmatmul.mubr.msk.f32.vlgmr.msra.gmra.mrb[14].mxu0 %vm288_vm1, %v1945_v4 }
0x1bdd   :  { %3241 = vmatpush1.bf16.msra.mxu0 %v4244_v17  ;;  %2297 = vmatprep.mubr.f32.mxu0 %v3707_v0 }
0x1bde   :  { %3243 = vmatprep.subr.bf16.mxu0 %v4253_v9 }
0x1be1   :  { %3245 = vmatpush1.bf16.msra.mxu0 %v4274_v33 }
0x1be2   :  { %3247 = vmatprep.subr.bf16.mxu0 %v4283_v39 }
0x1be5   :  { %3249 = vmatpush1.bf16.msra.mxu0 %v4291_v43 }
0x1be6   :  { %3251 = vmatprep.subr.bf16.mxu0 %v4302_v42 }
0x1be9   :  { %3253 = vmatpush1.bf16.msra.mxu0 %v4311_v46 }
0x1bea   :  { %3271 = vmatprep.subr.bf16.mxu0 %v4221_v52 }
0x1caf   :  { %v2015_v36 = vpop.f32.mrb[14].mxu0 }
0x1cb0   :  { %v2020_v56 = vadd.f32 %v2015_v36, %v4471_v60  ;;  %v2017_v21 = vpop.f32.mrb[15].mxu0 }
0x1cb1   :  { %v2021_v7 = vadd.f32 %v2017_v21, %v1935_v28 }
0x1cb2   :  { %3489 = vtanh.f32 %v2020_v56  ;;  %v2975_v12 = vmul.f32 -1.442695, %v2020_v56 }
0x1cb3   :  { %3491 = vtanh.f32 %v2021_v7  ;;  %v2976_v19 = vmul.f32 -1.442695, %v2021_v7 }
0x1cb4   :  { %3493 = vpow2.f32 %v2975_v12 }
0x1cb5   :  { %3495 = vpow2.f32 %v2976_v19 }
0x1cbc   :  { %v3490_v63 = vpop.eup %3489 }
0x1cbd   :  { %v3492_v15 = vpop.eup %3491  ;;  %2031 = vrot.lane.b32.xlu0 %v3490_v63, %s3709_s3 }
0x1cbe   :  { %2055 = vrot.lane.b32.xlu1 %v3492_v15, %s3709_s3  ;;  %v3494_v10 = vpop.eup %3493 }
0x1cbf   :  { %v3496_v16 = vpop.eup %3495  ;;  %v2025_v14 = vadd.f32 1.0, %v3494_v10 }
0x1cc0   :  { %v2049_v20 = vadd.f32 1.0, %v3496_v16 }
0x1cc1   :  { %3497 = vrcp.f32 %v2025_v14 }
0x1cc2   :  { %3499 = vrcp.f32 %v2049_v20 }
0x1ccb   :  { %v3498_v25 = vpop.eup %3497 }
0x1ccc   :  { %v3500_v31 = vpop.eup %3499  ;;  %v2029_v45 = vmul.f32 %v3498_v25, %v1897_v55 }
0x1ccd   :  { %v2053_v32 = vmul.f32 %v3500_v31, %v1921_v8 }
0x1d2f   :  { %v2032_v29 = vpop.permute.xlu0 %2031 }
0x1d30   :  { %v2034_v38 = vmul.f32 %v3498_v25, %v2032_v29  ;;  %v2056_v22 = vpop.permute.xlu1 %2055 }
0x1d31   :  { %v2058_v18 = vmul.f32 %v3500_v31, %v2056_v22 }
0x1d32   :  { %2036 = vrot.lane.b32.xlu0 %v2034_v38, %s3709_s3 }
0x1d33   :  { %2060 = vrot.lane.b32.xlu1 %v2058_v18, %s3709_s3 }
0x1da4   :  { %v2037_v23 = vpop.permute.xlu0 %2036 }
0x1da5   :  { %v2039_v47 = vadd.f32 %v2037_v23, %v2029_v45  ;;  %v2061_v53 = vpop.permute.xlu1 %2060 }
0x1da6   :  { %v2063_v59 = vadd.f32 %v2061_v53, %v2053_v32 }
0x1da7   :  { %3501 = vtanh.f32 %v2039_v47 }
0x1da8   :  { %3503 = vtanh.f32 %v2063_v59 }
0x1db1   :  { %v3502_v1 = vpop.eup %3501 }
0x1db2   :  { %v3504_v24 = vpop.eup %3503  ;;  %2042 = vrot.lane.b32.xlu0 %v3502_v1, %s3709_s3 }
0x1db3   :  { %2066 = vrot.lane.b32.xlu1 %v3504_v24, %s3709_s3  ;;  %v2218_v24 = vrot.slane %v1629_v6, %v3835_v27 }
0x1e24   :  { %v2043_v26 = vpop.permute.xlu0 %2042 }
0x1e25   :  { %v2045_v49 = vmul.f32 %v3498_v25, %v2043_v26  ;;  %v2067_v54 = vpop.permute.xlu1 %2066 }
0x1e26   :  { %v2069_v58 = vmul.f32 %v3500_v31, %v2067_v54 }
0x1e27   :  { %2080 = vrot.lane.b32.xlu0 %v2045_v49, %s3710_s29  ;;  %v2219_v49 = vcombine.high %v2218_v24, %v2218_v24 }
0x1e28   :  { %2084 = vrot.lane.b32.xlu1 %v2069_v58, %s3711_s30 }
0x1e99   :  { %v2081_v55 = vpop.permute.xlu0 %2080 }
0x1e9a   :  { %v2085_v8 = vpop.permute.xlu1 %2084 }
0x1e9b   :  { %v2087_v41 = vsel %vm149_vm0, %v2081_v55, %v2085_v8 }
0x1e9c   :  { %2977 = vmatmul.mubr.msk.f32.vlgmr.msra.gmra.mrb[14].mxu1 %vm288_vm1, %v2087_v41 }
0x1e9d   :  { %3257 = vmatpush1.bf16.msra.mxu1 %v4244_v17  ;;  %2439 = vmatprep.mubr.f32.mxu1 %v3707_v0 }
0x1e9e   :  { %3259 = vmatprep.subr.bf16.mxu1 %v4253_v9 }
0x1ea1   :  { %3261 = vmatpush1.bf16.msra.mxu1 %v4274_v33 }
0x1ea2   :  { %3263 = vmatprep.subr.bf16.mxu1 %v4283_v39 }
0x1ea5   :  { %3265 = vmatpush1.bf16.msra.mxu1 %v4291_v43 }
0x1ea6   :  { %3267 = vmatprep.subr.bf16.mxu1 %v4302_v42 }
0x1ea9   :  { %3269 = vmatpush1.bf16.msra.mxu1 %v4311_v46 }
0x1eaa   :  { %3287 = vmatprep.subr.bf16.mxu1 %v4221_v52 }
0x1f6f   :  { %v2157_v50 = vpop.f32.mrb[14].mxu1 }
0x1f70   :  { %v2162_v44 = vadd.f32 %v2157_v50, %v1629_v6  ;;  %v2159_v30 = vpop.f32.mrb[15].mxu1 }
0x1f71   :  { %v2163_v62 = vadd.f32 %v2159_v30, %v2077_v13 }
0x1f72   :  { %3505 = vtanh.f32 %v2162_v44  ;;  %v2978_v52 = vmul.f32 -1.442695, %v2162_v44 }
0x1f73   :  { %3507 = vtanh.f32 %v2163_v62  ;;  %v2979_v36 = vmul.f32 -1.442695, %v2163_v62 }
0x1f74   :  { %3509 = vpow2.f32 %v2978_v52 }
0x1f75   :  { %3511 = vpow2.f32 %v2979_v36 }
0x1f7c   :  { %v3506_v4 = vpop.eup %3505 }
0x1f7d   :  { %v3508_v11 = vpop.eup %3507  ;;  %2173 = vrot.lane.b32.xlu0 %v3506_v4, %s3709_s3 }
0x1f7e   :  { %2197 = vrot.lane.b32.xlu1 %v3508_v11, %s3709_s3  ;;  %v3510_v28 = vpop.eup %3509 }
0x1f7f   :  { %v3512_v56 = vpop.eup %3511  ;;  %v2167_v21 = vadd.f32 1.0, %v3510_v28 }
0x1f80   :  { %v2191_v7 = vadd.f32 1.0, %v3512_v56 }
0x1f81   :  { %3513 = vrcp.f32 %v2167_v21 }
0x1f82   :  { %3515 = vrcp.f32 %v2191_v7 }
0x1f8b   :  { %v3514_v63 = vpop.eup %3513 }
0x1f8c   :  { %v3516_v12 = vpop.eup %3515  ;;  %v2171_v14 = vmul.f32 %v3514_v63, %v2039_v47 }
0x1f8d   :  { %v2195_v25 = vmul.f32 %v3516_v12, %v2063_v59 }
0x1fef   :  { %v2174_v15 = vpop.permute.xlu0 %2173 }
0x1ff0   :  { %v2176_v19 = vmul.f32 %v3514_v63, %v2174_v15  ;;  %v2198_v10 = vpop.permute.xlu1 %2197 }
0x1ff1   :  { %v2200_v16 = vmul.f32 %v3516_v12, %v2198_v10 }
0x1ff2   :  { %2178 = vrot.lane.b32.xlu0 %v2176_v19, %s3709_s3 }
0x1ff3   :  { %2202 = vrot.lane.b32.xlu1 %v2200_v16, %s3709_s3 }
0x2064   :  { %v2179_v20 = vpop.permute.xlu0 %2178 }
0x2065   :  { %v2181_v29 = vadd.f32 %v2179_v20, %v2171_v14  ;;  %v2203_v31 = vpop.permute.xlu1 %2202 }
0x2066   :  { %v2205_v38 = vadd.f32 %v2203_v31, %v2195_v25 }
0x2067   :  { %3517 = vtanh.f32 %v2181_v29 }
0x2068   :  { %3519 = vtanh.f32 %v2205_v38 }
0x2071   :  { %v3518_v22 = vpop.eup %3517 }
0x2072   :  { %v3520_v18 = vpop.eup %3519  ;;  %2184 = vrot.lane.b32.xlu0 %v3518_v22, %s3709_s3 }
0x2073   :  { %2208 = vrot.lane.b32.xlu1 %v3520_v18, %s3709_s3 }
0x20e4   :  { %v2185_v45 = vpop.permute.xlu0 %2184 }
0x20e5   :  { %v2187_v23 = vmul.f32 %v3514_v63, %v2185_v45  ;;  %v2209_v32 = vpop.permute.xlu1 %2208 }
0x20e6   :  { %v2211_v53 = vmul.f32 %v3516_v12, %v2209_v32 }
0x20e7   :  { %2222 = vrot.lane.b32.xlu0 %v2187_v23, %s3710_s29 }
0x20e8   :  { %2226 = vrot.lane.b32.xlu1 %v2211_v53, %s3711_s30 }
0x2159   :  { %v2223_v47 = vpop.permute.xlu0 %2222 }
0x215a   :  { %v2227_v59 = vpop.permute.xlu1 %2226 }
0x215b   :  { %v2229_v1 = vsel %vm149_vm0, %v2223_v47, %v2227_v59 }
0x215c   :  { %2980 = vmatmul.mubr.msk.f32.vlgmr.msra.gmra.mrb[16].mxu0 %vm288_vm1, %v2229_v1 }
0x215d   :  { %3273 = vmatpush1.bf16.msra.mxu0 %v4244_v17  ;;  %2581 = vmatprep.mubr.f32.mxu0 %v3707_v0 }
0x215e   :  { %3275 = vmatprep.subr.bf16.mxu0 %v4253_v9 }
0x2161   :  { %3277 = vmatpush1.bf16.msra.mxu0 %v4274_v33 }
0x2162   :  { %3279 = vmatprep.subr.bf16.mxu0 %v4283_v39 }
0x2165   :  { %3281 = vmatpush1.bf16.msra.mxu0 %v4291_v43 }
0x2166   :  { %3283 = vmatprep.subr.bf16.mxu0 %v4302_v42 }
0x2169   :  { %3285 = vmatpush1.bf16.msra.mxu0 %v4311_v46 }
0x222f   :  { %v2299_v26 = vpop.f32.mrb[16].mxu0 }
0x2230   :  { %v2304_v54 = vadd.f32 %v2299_v26, %v4459_v51  ;;  %v2301_v58 = vpop.f32.mrb[17].mxu0 }
0x2231   :  { %v2305_v55 = vadd.f32 %v2301_v58, %v2219_v49 }
0x2232   :  { %3521 = vtanh.f32 %v2304_v54  ;;  %v2981_v34 = vmul.f32 -1.442695, %v2304_v54 }
0x2233   :  { %3523 = vtanh.f32 %v2305_v55  ;;  %v2982_v50 = vmul.f32 -1.442695, %v2305_v55 }
0x2234   :  { %3525 = vpow2.f32 %v2981_v34 }
0x2235   :  { %3527 = vpow2.f32 %v2982_v50 }
0x223c   :  { %v3522_v8 = vpop.eup %3521 }
0x223d   :  { %v3524_v41 = vpop.eup %3523  ;;  %2315 = vrot.lane.b32.xlu0 %v3522_v8, %s3709_s3 }
0x223e   :  { %2339 = vrot.lane.b32.xlu1 %v3524_v41, %s3709_s3  ;;  %v3526_v13 = vpop.eup %3525 }
0x223f   :  { %v3528_v6 = vpop.eup %3527  ;;  %v2309_v44 = vadd.f32 1.0, %v3526_v13 }
0x2240   :  { %v2333_v30 = vadd.f32 1.0, %v3528_v6 }
0x2241   :  { %3529 = vrcp.f32 %v2309_v44 }
0x2242   :  { %3531 = vrcp.f32 %v2333_v30 }
0x224b   :  { %v3530_v51 = vpop.eup %3529 }
0x224c   :  { %v3532_v4 = vpop.eup %3531  ;;  %v2313_v28 = vmul.f32 %v3530_v51, %v2181_v29 }
0x224d   :  { %v2337_v21 = vmul.f32 %v3532_v4, %v2205_v38  ;;  %v2360_v38 = vrot.slane %v4471_v60, %v3835_v27 }
0x224f   :  { %v2361_v18 = vcombine.high %v2360_v38, %v2360_v38 }
0x22af   :  { %v2316_v62 = vpop.permute.xlu0 %2315 }
0x22b0   :  { %v2318_v11 = vmul.f32 %v3530_v51, %v2316_v62  ;;  %v2340_v52 = vpop.permute.xlu1 %2339 }
0x22b1   :  { %v2342_v36 = vmul.f32 %v3532_v4, %v2340_v52 }
0x22b2   :  { %2320 = vrot.lane.b32.xlu0 %v2318_v11, %s3709_s3 }
0x22b3   :  { %2344 = vrot.lane.b32.xlu1 %v2342_v36, %s3709_s3 }
0x2324   :  { %v2321_v56 = vpop.permute.xlu0 %2320 }
0x2325   :  { %v2323_v7 = vadd.f32 %v2321_v56, %v2313_v28  ;;  %v2345_v63 = vpop.permute.xlu1 %2344 }
0x2326   :  { %v2347_v15 = vadd.f32 %v2345_v63, %v2337_v21 }
0x2327   :  { %3533 = vtanh.f32 %v2323_v7 }
0x2328   :  { %3535 = vtanh.f32 %v2347_v15 }
0x2331   :  { %v3534_v12 = vpop.eup %3533 }
0x2332   :  { %v3536_v19 = vpop.eup %3535  ;;  %2326 = vrot.lane.b32.xlu0 %v3534_v12, %s3709_s3 }
0x2333   :  { %2350 = vrot.lane.b32.xlu1 %v3536_v19, %s3709_s3 }
0x23a4   :  { %v2327_v10 = vpop.permute.xlu0 %2326 }
0x23a5   :  { %v2329_v16 = vmul.f32 %v3530_v51, %v2327_v10  ;;  %v2351_v14 = vpop.permute.xlu1 %2350 }
0x23a6   :  { %v2353_v20 = vmul.f32 %v3532_v4, %v2351_v14  ;;  %v2502_v4 = vrot.slane %v4433_v5, %v3835_v27 }
0x23a7   :  { %2364 = vrot.lane.b32.xlu0 %v2329_v16, %s3710_s29 }
0x23a8   :  { %2368 = vrot.lane.b32.xlu1 %v2353_v20, %s3711_s30  ;;  %v2503_v52 = vcombine.high %v2502_v4, %v2502_v4 }
0x2419   :  { %v2365_v25 = vpop.permute.xlu0 %2364 }
0x241a   :  { %v2369_v29 = vpop.permute.xlu1 %2368 }
0x241b   :  { %v2371_v31 = vsel %vm149_vm0, %v2365_v25, %v2369_v29 }
0x241c   :  { %2983 = vmatmul.mubr.msk.f32.vlgmr.msra.gmra.mrb[16].mxu1 %vm288_vm1, %v2371_v31 }
0x241d   :  { %3289 = vmatpush1.bf16.msra.mxu1 %v4244_v17  ;;  %2723 = vmatprep.mubr.f32.mxu1 %v3707_v0 }
0x241e   :  { %3291 = vmatprep.subr.bf16.mxu1 %v4253_v9 }
0x2421   :  { %3293 = vmatpush1.bf16.msra.mxu1 %v4274_v33 }
0x2422   :  { %3295 = vmatprep.subr.bf16.mxu1 %v4283_v39 }
0x2425   :  { %3297 = vmatpush1.bf16.msra.mxu1 %v4291_v43 }
0x2426   :  { %3299 = vmatprep.subr.bf16.mxu1 %v4302_v42 }
0x2429   :  { %3301 = vmatpush1.bf16.msra.mxu1 %v4311_v46 }
0x24ef   :  { %v2441_v22 = vpop.f32.mrb[16].mxu1 }
0x24f0   :  { %v2446_v17 = vadd.f32 %v2441_v22, %v4463_v2  ;;  %v2443_v45 = vpop.f32.mrb[17].mxu1 }
0x24f1   :  { %v2447_v23 = vadd.f32 %v2443_v45, %v2361_v18 }
0x24f2   :  { %3537 = vtanh.f32 %v2446_v17  ;;  %v2984_v39 = vmul.f32 -1.442695, %v2446_v17 }
0x24f3   :  { %3539 = vtanh.f32 %v2447_v23  ;;  %v2985_v43 = vmul.f32 -1.442695, %v2447_v23 }
0x24f4   :  { %3541 = vpow2.f32 %v2984_v39 }
0x24f5   :  { %3543 = vpow2.f32 %v2985_v43 }
0x24fc   :  { %v3538_v9 = vpop.eup %3537 }
0x24fd   :  { %v3540_v33 = vpop.eup %3539  ;;  %2457 = vrot.lane.b32.xlu0 %v3538_v9, %s3709_s3 }
0x24fe   :  { %2481 = vrot.lane.b32.xlu1 %v3540_v33, %s3709_s3  ;;  %v3542_v42 = vpop.eup %3541 }
0x24ff   :  { %v3544_v46 = vpop.eup %3543  ;;  %v2451_v60 = vadd.f32 1.0, %v3542_v42 }
0x2500   :  { %v2475_v32 = vadd.f32 1.0, %v3544_v46 }
0x2501   :  { %3545 = vrcp.f32 %v2451_v60 }
0x2502   :  { %3547 = vrcp.f32 %v2475_v32 }
0x250b   :  { %v3546_v2 = vpop.eup %3545 }
0x250c   :  { %v3548_v47 = vpop.eup %3547  ;;  %v2455_v26 = vmul.f32 %v3546_v2, %v2323_v7 }
0x250d   :  { %v2479_v54 = vmul.f32 %v3548_v47, %v2347_v15 }
0x256f   :  { %v2458_v53 = vpop.permute.xlu0 %2457 }
0x2570   :  { %v2460_v59 = vmul.f32 %v3546_v2, %v2458_v53  ;;  %v2482_v1 = vpop.permute.xlu1 %2481 }
0x2571   :  { %v2484_v24 = vmul.f32 %v3548_v47, %v2482_v1 }
0x2572   :  { %2462 = vrot.lane.b32.xlu0 %v2460_v59, %s3709_s3 }
0x2573   :  { %2486 = vrot.lane.b32.xlu1 %v2484_v24, %s3709_s3 }
0x25e4   :  { %v2463_v49 = vpop.permute.xlu0 %2462 }
0x25e5   :  { %v2465_v58 = vadd.f32 %v2463_v49, %v2455_v26  ;;  %v2487_v55 = vpop.permute.xlu1 %2486 }
0x25e6   :  { %v2489_v8 = vadd.f32 %v2487_v55, %v2479_v54 }
0x25e7   :  { %3549 = vtanh.f32 %v2465_v58 }
0x25e8   :  { %3551 = vtanh.f32 %v2489_v8 }
0x25f1   :  { %v3550_v41 = vpop.eup %3549 }
0x25f2   :  { %v3552_v34 = vpop.eup %3551  ;;  %2468 = vrot.lane.b32.xlu0 %v3550_v41, %s3709_s3 }
0x25f3   :  { %2492 = vrot.lane.b32.xlu1 %v3552_v34, %s3709_s3 }
0x2664   :  { %v2469_v50 = vpop.permute.xlu0 %2468 }
0x2665   :  { %v2471_v13 = vmul.f32 %v3546_v2, %v2469_v50  ;;  %v2493_v6 = vpop.permute.xlu1 %2492  ;;  %v2644_v2 = vrot.slane %v4389_v61, %v3835_v27 }
0x2666   :  { %v2495_v44 = vmul.f32 %v3548_v47, %v2493_v6  ;;  %v2806_v6 = vld [vmem:[%s4666_s7 + $0x8] sm:$0xff] }
0x2667   :  { %2506 = vrot.lane.b32.xlu0 %v2471_v13, %s3710_s29  ;;  %v2645_v47 = vcombine.high %v2644_v2, %v2644_v2  ;;  %v2805_v13 = vld [vmem:[%s4666_s7] sm:$0xff] }
0x2668   :  { %2510 = vrot.lane.b32.xlu1 %v2495_v44, %s3711_s30  ;;  %v2807_v44 = vld [vmem:[%s4666_s7 + $0x10] sm:$0xff] }
0x26d9   :  { %v2507_v30 = vpop.permute.xlu0 %2506 }
0x26da   :  { %v2511_v51 = vpop.permute.xlu1 %2510 }
0x26db   :  { %v2513_v62 = vsel %vm149_vm0, %v2507_v30, %v2511_v51  ;;  %v3712_v30 = vmov 0.0|0.0   ;;  %v3303_v51 = vpack.c.bf16 %v2806_v6, %v2805_v13 }
0x26dc   :  { %2986 = vmatmul.mubr.msk.f32.vlgmr.msra.gmra.mrb[18].mxu0 %vm288_vm1, %v2513_v62  ;;  %3302 = vmatprep.subr.bf16.mxu0 %v3712_v30  ;;  %v2808_v62 = vld [vmem:[%s4666_s7 + $0x18] sm:$0xff] }
0x26dd   :  { %3304 = vmatpush3.bf16.msra.mxu0 %v3303_v51  ;;  %v3306_v4 = vpack.c.bf16 %v2808_v62, %v2807_v44  ;;  %3019 = vmatprep.mubr.msk.f32.mxu0 %vm3713_vm3, %v3707_v0 }
0x26de   :  { %3305 = vmatprep.subr.bf16.mxu0 %v3712_v30 }
0x26e1   :  { %3307 = vmatpush3.bf16.msra.mxu0 %v3306_v4 }
0x26e2   :  { %3308 = vmatprep.subr.bf16.mxu0 %v3712_v30 }
0x27af   :  { %v2583_v11 = vpop.f32.mrb[18].mxu0 }
0x27b0   :  { %v2588_v36 = vadd.f32 %v2583_v11, %v4399_v35  ;;  %v2585_v28 = vpop.f32.mrb[19].mxu0  ;;  %v2809_v11 = vld [vmem:[%s4666_s7 + $0x20] sm:$0xff] }
0x27b1   :  { %v2589_v56 = vadd.f32 %v2585_v28, %v2503_v52  ;;  %v2810_v52 = vld [vmem:[%s4666_s7 + $0x28] sm:$0xff]  ;;  %v2811_v28 = vld [vmem:[%s4666_s7 + $0x30] sm:$0xff] }
0x27b2   :  { %3553 = vtanh.f32 %v2588_v36  ;;  %v2987_v63 = vmul.f32 -1.442695, %v2588_v36  ;;  %v3309_v36 = vpack.c.bf16 %v2810_v52, %v2809_v11 }
0x27b3   :  { %3555 = vtanh.f32 %v2589_v56  ;;  %v2988_v15 = vmul.f32 -1.442695, %v2589_v56  ;;  %v2812_v56 = vld [vmem:[%s4666_s7 + $0x38] sm:$0xff]  ;;  %s3714_s7 = smov [#allocation7]  }
0x27b4   :  { %3557 = vpow2.f32 %v2987_v63  ;;  %3310 = vmatpush3.bf16.msra.mxu0 %v3309_v36  ;;  %s2901_s8 = sshll.u32 %s3714_s7, 4  ;;  %s2902_s8 = int_to_ptr.vmem [resolvable:$true] %s2901_s8 }
0x27b5   :  { %3559 = vpow2.f32 %v2988_v15  ;;  %3311 = vmatprep.subr.bf16.mxu0 %v3712_v30  ;;  %s3629_s26 = scalar_lea.vmem %s2902_s8, 32  ;;  %p3634_p3 = scmp.lt.s32.totalorder %s2902_s8, %s2902_s8 }
0x27b6   :  { %p3630_p2 = scmp.ne.s32.totalorder %s2902_s8, %s3629_s26  ;;  %p3635_p4 = scmp.lt.s32.totalorder %s3629_s26, %s3629_s26 }
0x27b8   :  { %p3636_p5 = por %p3635_p4, %p3634_p3 }
0x27ba   :  { %p3637_p6 = pnand %p3636_p5, %p3630_p2 }
0x27bc   :  { %v3554_v21 = vpop.eup %3553 }
0x27bd   :  { %v3556_v7 = vpop.eup %3555  ;;  %2599 = vrot.lane.b32.xlu0 %v3554_v21, %s3709_s3  ;;  %v3312_v21 = vpack.c.bf16 %v2812_v56, %v2811_v28 }
0x27be   :  { %2623 = vrot.lane.b32.xlu1 %v3556_v7, %s3709_s3  ;;  %v3558_v12 = vpop.eup %3557 }
0x27bf   :  { %v3560_v5 = vpop.eup %3559  ;;  %v2593_v19 = vadd.f32 1.0, %v3558_v12  ;;  %3313 = vmatpush3.bf16.msra.mxu0 %v3312_v21 }
0x27c0   :  { %v2617_v10 = vadd.f32 1.0, %v3560_v5 }
0x27c1   :  { %3561 = vrcp.f32 %v2593_v19 }
0x27c2   :  { %3563 = vrcp.f32 %v2617_v10 }
0x27cb   :  { %v3562_v35 = vpop.eup %3561 }
0x27cc   :  { %v3564_v14 = vpop.eup %3563  ;;  %v2597_v31 = vmul.f32 %v3562_v35, %v2465_v58 }
0x27cd   :  { %v2621_v22 = vmul.f32 %v3564_v14, %v2489_v8 }
0x282f   :  { %v2600_v16 = vpop.permute.xlu0 %2599 }
0x2830   :  { %v2602_v20 = vmul.f32 %v3562_v35, %v2600_v16  ;;  %v2624_v25 = vpop.permute.xlu1 %2623 }
0x2831   :  { %v2626_v29 = vmul.f32 %v3564_v14, %v2624_v25 }
0x2832   :  { %2604 = vrot.lane.b32.xlu0 %v2602_v20, %s3709_s3 }
0x2833   :  { %2628 = vrot.lane.b32.xlu1 %v2626_v29, %s3709_s3 }
0x28a4   :  { %v2605_v38 = vpop.permute.xlu0 %2604 }
0x28a5   :  { %v2607_v18 = vadd.f32 %v2605_v38, %v2597_v31  ;;  %v2629_v17 = vpop.permute.xlu1 %2628 }
0x28a6   :  { %v4555_v45 = vadd.f32 %v2629_v17, %v2621_v22 }
0x28a7   :  { %3565 = vtanh.f32 %v2607_v18 }
0x28a8   :  { %3567 = vtanh.f32 %v4555_v45 }
0x28b1   :  { %v3566_v23 = vpop.eup %3565 }
0x28b2   :  { %v3568_v9 = vpop.eup %3567  ;;  %2610 = vrot.lane.b32.xlu0 %v3566_v23, %s3709_s3 }
0x28b3   :  { %2634 = vrot.lane.b32.xlu1 %v3568_v9, %s3709_s3 }
0x2924   :  { %v2611_v33 = vpop.permute.xlu0 %2610 }
0x2925   :  { %v2613_v39 = vmul.f32 %v3562_v35, %v2611_v33  ;;  %v2635_v43 = vpop.permute.xlu1 %2634 }
0x2926   :  { %v2637_v42 = vmul.f32 %v3564_v14, %v2635_v43 }
0x2927   :  { %2648 = vrot.lane.b32.xlu0 %v2613_v39, %s3710_s29 }
0x2928   :  { %2652 = vrot.lane.b32.xlu1 %v2637_v42, %s3711_s30 }
0x2999   :  { %v2649_v46 = vpop.permute.xlu0 %2648 }
0x299a   :  { %v2653_v60 = vpop.permute.xlu1 %2652 }
0x299b   :  { %v2655_v32 = vsel %vm149_vm0, %v2649_v46, %v2653_v60 }
0x299c   :  { %2989 = vmatmul.mubr.msk.f32.vlgmr.msra.gmra.mrb[18].mxu1 %vm288_vm1, %v2655_v32 }
0x2a6f   :  { %v2725_v53 = vpop.f32.mrb[18].mxu1 }
0x2a70   :  { %v2730_v59 = vadd.f32 %v2725_v53, %v4403_v37  ;;  %v2727_v1 = vpop.f32.mrb[19].mxu1 }
0x2a71   :  { %v2731_v24 = vadd.f32 %v2727_v1, %v2645_v47 }
0x2a72   :  { %3569 = vtanh.f32 %v2730_v59  ;;  %v2990_v49 = vmul.f32 -1.442695, %v2730_v59 }
0x2a73   :  { %v2991_v7 = vmul.f32 -1.442695, %v2731_v24 }
0x2a74   :  { %3571 = vpow2.f32 %v2990_v49 }
0x2a7c   :  { %v3570_v26 = vpop.eup %3569 }
0x2a7d   :  { %2741 = vrot.lane.b32.xlu0 %v3570_v26, %s3709_s3 }
0x2a7e   :  { %v3572_v54 = vpop.eup %3571 }
0x2a7f   :  { %v2735_v58 = vadd.f32 1.0, %v3572_v54 }
0x2a81   :  { %3573 = vrcp.f32 %v2735_v58 }
0x2a8b   :  { %v3574_v55 = vpop.eup %3573 }
0x2a8c   :  { %v2739_v27 = vmul.f32 %v3574_v55, %v2607_v18  ;;  %v2992_v18 = vld [vmem:[#allocation5] ss:$0 sm:$0xff] }
0x2aef   :  { %v2742_v8 = vpop.permute.xlu0 %2741 }
0x2af0   :  { %v2744_v41 = vmul.f32 %v3574_v55, %v2742_v8 }
0x2af2   :  { %2746 = vrot.lane.b32.xlu1 %v2744_v41, %s3709_s3 }
0x2b64   :  { %v2747_v61 = vpop.permute.xlu1 %2746 }
0x2b65   :  { %v2749_v34 = vadd.f32 %v2747_v61, %v2739_v27 }
0x2b67   :  { %3575 = vtanh.f32 %v2749_v34 }
0x2b68   :  { %3577 = vtanh.f32 %v2731_v24 }
0x2b69   :  { %3579 = vpow2.f32 %v2991_v7 }
0x2b71   :  { %v3576_v37 = vpop.eup %3575 }
0x2b72   :  { %2752 = vrot.lane.b32.xlu0 %v3576_v37, %s3709_s3  ;;  %v3578_v50 = vpop.eup %3577 }
0x2b73   :  { %v3580_v63 = vpop.eup %3579 }
0x2b74   :  { %v2759_v15 = vadd.f32 1.0, %v3580_v63 }
0x2b76   :  { %2765 = vrot.lane.b32.xlu0 %v3578_v50, %s3709_s3  ;;  %3581 = vrcp.f32 %v2759_v15 }
0x2b80   :  { %v3582_v19 = vpop.eup %3581 }
0x2b81   :  { %v2763_v14 = vmul.f32 %v3582_v19, %v4555_v45 }
0x2be4   :  { %v2753_v12 = vpop.permute.xlu0 %2752 }
0x2be5   :  { %v2755_v5 = vmul.f32 %v3574_v55, %v2753_v12 }
0x2be7   :  { %2781 = vrot.lane.b32.xlu1 %v2755_v5, %s3710_s29 }
0x2be8   :  { %v2766_v10 = vpop.permute.xlu0 %2765 }
0x2be9   :  { %v2768_v35 = vmul.f32 %v3582_v19, %v2766_v10 }
0x2beb   :  { %2770 = vrot.lane.b32.xlu1 %v2768_v35, %s3709_s3 }
0x2bef   :  { %1414 = vrot.lane.b32.xlu1 %v4314_v57, %s3710_s29 }
0x2bf3   :  { %1420 = vrot.lane.b32.xlu1 %v4185_v3, %s3711_s30 }
0x2bf7   :  { %2793 = vrot.lane.b32.xlu1 %v2749_v34, %s3711_s30 }
0x2c59   :  { %v2782_v16 = vpop.permute.xlu1 %2781 }
0x2c5a   :  { %2785 = vst.msk [vmem:[#allocation8 + $0x4] sm:$0x3] %vm1411_vm2, %v2782_v16  ;;  %v2804_v0 = vsel %vm149_vm0, %v2782_v16, %v4415_v48 }
0x2c5b   :  { %3020 = vmatmul.mubr.msk.f32.vlgmr.msra.gmra.mrb[20].mxu0 %vm288_vm1, %v2804_v0 }
0x2c5d   :  { %v2771_v20 = vpop.permute.xlu1 %2770 }
0x2c5e   :  { %v2773_v25 = vadd.f32 %v2771_v20, %v2763_v14 }
0x2c60   :  { %3583 = vtanh.f32 %v2773_v25 }
0x2c61   :  { %v1415_v29 = vpop.permute.xlu1 %1414 }
0x2c62   :  { %1418 = vst.msk [vmem:[#allocation8 + $0x2] sm:$0x3] %vm1411_vm2, %v1415_v29 }
0x2c65   :  { %v1421_v57 = vpop.permute.xlu1 %1420 }
0x2c66   :  { %1423 = vst.msk [vmem:[#allocation10] sm:$0x3] %vm1411_vm2, %v1421_v57 }
0x2c69   :  { %v2794_v3 = vpop.permute.xlu1 %2793 }
0x2c6a   :  { %v3584_v31 = vpop.eup %3583  ;;  %2797 = vst.msk [vmem:[#allocation10 + $0x4] sm:$0x3] %vm1411_vm2, %v2794_v3 }
0x2c6b   :  { %2776 = vrot.lane.b32.xlu0 %v3584_v31, %s3709_s3 }
0x2c6f   :  { %1425 = vrot.lane.b32.xlu0 %v4187_v40, %s3711_s30 }
0x2cdd   :  { %v2777_v48 = vpop.permute.xlu0 %2776 }
0x2cde   :  { %v2779_v38 = vmul.f32 %v3582_v19, %v2777_v48 }
0x2ce0   :  { %2787 = vrot.lane.b32.xlu0 %v2779_v38, %s3710_s29 }
0x2ce1   :  { %v1426_v22 = vpop.permute.xlu0 %1425 }
0x2ce2   :  { %1429 = vst.msk [vmem:[#allocation10 + $0x2] sm:$0x3] %vm1411_vm2, %v1426_v22 }
0x2ce4   :  { %2799 = vrot.lane.b32.xlu0 %v2773_v25, %s3711_s30 }
0x2d2e   :  { %v2889_v17 = vpop.f32.mrb[20].mxu0 }
0x2d2f   :  { %v2890_v45 = vadd.f32 %v2992_v18, %v2889_v17  ;;  %v3021_v23 = vpop.f32.mrb[21].mxu0 }
0x2d31   :  { %2894 = vst.msk [vmem:[#allocation7] sm:$0x3] %vm2893_vm4, %v2890_v45 }
0x2d32   :  { %3640 = shalt.err (!%p3637_p6)
}
0x2d33   :  { %s3641_s30 = scalar_lea.hbm %s4668_s9, 32 }
0x2d34   :  { %p3642_p7 = scmp.ne.s32.totalorder %s4668_s9, %s3641_s30  ;;  %p3645_p8 = scmp.lt.u32.totalorder %s3641_s30, %s4668_s9 }
0x2d36   :  { %p3647_p9 = pnand %p3645_p8, %p3642_p7 }
0x2d38   :  { %3650 = shalt.err (!%p3647_p9)
}
0x2d39   :  { %2904 = dma.vmem_to_hbm [thread:$0]  %s2902_s8, 32, %s4668_s9, [#allocation4]  }
0x2d3a   :  { %s3715_s13 = smov [#allocation8]   ;;  %s3716_s15 = smov [#allocation10]  }
0x2d3b   :  { %s2910_s14 = sshll.u32 %s3715_s13, 4  ;;  %s2922_s16 = sshll.u32 %s3716_s15, 4  ;;  %s2911_s14 = int_to_ptr.vmem [resolvable:$true] %s2910_s14  ;;  %s2923_s16 = int_to_ptr.vmem [resolvable:$true] %s2922_s16 }
0x2d3c   :  { %s3651_s17 = scalar_lea.vmem %s2911_s14, 128  ;;  %p3656_p11 = scmp.lt.s32.totalorder %s2911_s14, %s2911_s14 }
0x2d3d   :  { %p3652_p10 = scmp.ne.s32.totalorder %s2911_s14, %s3651_s17  ;;  %p3657_p12 = scmp.lt.s32.totalorder %s3651_s17, %s3651_s17 }
0x2d3f   :  { %p3658_p13 = por %p3657_p12, %p3656_p11 }
0x2d41   :  { %p3659_p0 = pnand %p3658_p13, %p3652_p10 }
0x2d52   :  { %v2788_v40 = vpop.permute.xlu0 %2787 }
0x2d53   :  { %2791 = vst.msk [vmem:[#allocation8 + $0x6] sm:$0x3] %vm1411_vm2, %v2788_v40 }
0x2d54   :  { %3662 = shalt.err (!%p3659_p0)
}
0x2d55   :  { %s3663_s21 = scalar_lea.hbm %s4669_s10, 128 }
0x2d56   :  { %p3664_p1 = scmp.ne.s32.totalorder %s4669_s10, %s3663_s21  ;;  %p3667_p2 = scmp.lt.u32.totalorder %s3663_s21, %s4669_s10 }
0x2d58   :  { %p3669_p3 = pnand %p3667_p2, %p3664_p1 }
0x2d5a   :  { %3672 = shalt.err (!%p3669_p3)
}
0x2d5b   :  { %s3717_s18 = smov 2   ;;  %v2800_v9 = vpop.permute.xlu0 %2799  ;;  %s3673_s25 = scalar_lea.vmem %s2923_s16, 128 }
0x2d5c   :  { %2916 = dma.vmem_to_hbm [thread:$0]  %s2911_s14, 128, %s4669_s10, [#allocation9], %s3709_s3, %s3709_s3, %s3717_s18   ;;  %2803 = vst.msk [vmem:[#allocation10 + $0x6] sm:$0x3] %vm1411_vm2, %v2800_v9 }
0x2d5d   :  { %p3674_p4 = scmp.ne.s32.totalorder %s2923_s16, %s3673_s25  ;;  %p3678_p5 = scmp.lt.s32.totalorder %s2923_s16, %s2923_s16 }
0x2d5e   :  { %p3679_p6 = scmp.lt.s32.totalorder %s3673_s25, %s3673_s25 }
0x2d60   :  { %p3680_p7 = por %p3679_p6, %p3678_p5 }
0x2d62   :  { %p3681_p8 = pnand %p3680_p7, %p3674_p4 }
0x2d64   :  { %3684 = shalt.err (!%p3681_p8)
}
0x2d65   :  { %s3685_s26 = scalar_lea.hbm %s4670_s11, 128 }
0x2d66   :  { %p3686_p9 = scmp.ne.s32.totalorder %s4670_s11, %s3685_s26  ;;  %p3689_p10 = scmp.lt.u32.totalorder %s3685_s26, %s4670_s11 }
0x2d68   :  { %p3691_p11 = pnand %p3689_p10, %p3686_p9 }
0x2d6a   :  { %3694 = shalt.err (!%p3691_p11)
}
0x2d6b   :  { %2928 = dma.vmem_to_hbm [thread:$0]  %s2923_s16, 128, %s4670_s11, [#allocation9], %s3709_s3, %s3709_s3, %s3717_s18  }
0x2d6c   :  { %3699 = dma.done.wait [#allocation4], 32  }
0x2d6d   :  { %3700 = vsyncadd [#allocation4], 4294967264 }
0x2d6e   :  { %3701 = dma.done.wait [#allocation9], 256  }
0x2d6f   :  { %3702 = vsyncadd [#allocation9], 4294967040 }
0x2d70   :  { %2938 = vsyncpa [#allocation3], 1 }
0x2d71   :  { %2939 = vsyncpa [#allocation6], 1 }
0x2d72   :  { %2940 = vsyncpa [#allocation4], 1 }
0x2d73   :  { %2941 = vsyncpa [#allocation9], 1 }

</bundles_post_ra>
